<compile_context>
chip_gen: v7x
topology: tpu7x:2x2x1
jax: 0.10.0
libtpu: 0.0.40
codegen_flags: <defaults>
</compile_context>

<pallas_src>
import functools
import numpy as np
import jax
import jax.numpy as jnp
from jax.experimental import pallas as pl
from jax.experimental.pallas import tpu as pltpu


# ----------------------------- Pallas kernel --------------------------------

def _disc_kernel(p1g_ref, w1m_ref, b1_ref, w2t_ref, b2_ref, w3r_ref,
                 msk_ref, phl_ref, pwt_ref, b3_ref, o_ref,
                 y1_ref, acc_ref, *, oh, ow, c1, c2):
    """Fully fused per-image Discriminator forward.

    p1g_ref: (1, 4, oh*ow, K1) bf16  conv1 im2col patches grouped by the
                                     parity of the conv1 output position
                                     (group g = 2*(h%2) + (w%2))
    w1m_ref: (K1, c1) bf16           conv1 weight, rows ordered (kh,kw,cin)
    b1_ref : (1, c1)  f32
    w2t_ref: (16, c1, c2) bf16       conv2 per-tap weights, tap = kh*4 + kw
    b2_ref : (1, c2)  f32
    w3r_ref: (1, c2)  f32            1x1-conv weight as a row
    msk_ref: (oh*ow, ow) f32         msk[m, j] = (m % ow == j)
    phl_ref: (PO, oh*ow) f32         phl[p, m] = Ph[p, m // ow]
    pwt_ref: (ow, QO) f32            Pw^T
    b3_ref : (1, 1)   f32
    o_ref  : (1, PO, QO) f32
    y1_ref : VMEM (2, 2, oh+1, ow+1, c1) f32  parity-split padded conv1 output
    acc_ref: VMEM (oh*ow, c2) f32             conv2 accumulator
    """
    m2 = oh * ow

    # ---- conv1 (4 parity-group MXU matmuls) + bias + LeakyReLU(0.2) -------
    # Group (ar, ac) holds the conv1 outputs at (h, w) with h%2==ar, w%2==ac;
    # writing them straight into the parity-split padded scratch makes every
    # conv2 4x4/stride-2 tap a contiguous (non-strided) slice.
    y1_ref[...] = jnp.zeros_like(y1_ref)        # also provides the zero border
    for ar in range(2):
        for ac in range(2):
            g = 2 * ar + ac
            y = jnp.dot(p1g_ref[0, g], w1m_ref[...],
                        preferred_element_type=jnp.float32)       # (m2, c1)
            y = y + b1_ref[...]
            y = jnp.where(y >= 0, y, 0.2 * y)
            y1_ref[ar, ac, pl.ds(ar, oh), pl.ds(ac, ow), :] = (
                y.reshape(oh, ow, c1))

    # ---- conv2: 16 tap matmuls (bf16 MXU) accumulated in f32 VMEM ----------
    acc_ref[...] = jnp.zeros_like(acc_ref)
    for kh in range(4):
        for kw in range(4):
            a = 1 - (kh % 2)                    # row parity this tap reads
            b = 1 - (kw % 2)                    # col parity this tap reads
            tap = y1_ref[a, b, pl.ds(kh // 2, oh), pl.ds(kw // 2, ow), :]
            acc_ref[...] += jnp.dot(
                tap.reshape(m2, c1).astype(jnp.bfloat16),
                w2t_ref[4 * kh + kw],
                preferred_element_type=jnp.float32)

    # ---- bias + LeakyReLU, 1x1 conv, separable adaptive avg-pool -----------
    y2 = acc_ref[...] + b2_ref[...]
    y2 = jnp.where(y2 >= 0, y2, 0.2 * y2)                          # (m2, c2)
    # channel contraction of the 1x1 conv (lane reduction on the VPU/XLU)
    t = jnp.sum(y2 * w3r_ref[...], axis=-1, keepdims=True)         # (m2, 1)
    # (m2,1) -> pooled rows via a masked selection matmul (avoids reshaping
    # the minor dim):  u[p, j] = sum_i Ph[p, i] * t[i*ow + j]
    r = t * msk_ref[...]                                           # (m2, ow)
    u = jnp.dot(phl_ref[...], r, preferred_element_type=jnp.float32)   # (PO, ow)
    out = jnp.dot(u, pwt_ref[...], preferred_element_type=jnp.float32)  # (PO, QO)
    o_ref[0] = out + b3_ref[...]


# ----------------------------- plain-JAX glue --------------------------------

def spectral_normalize(w, key, n_iter=1, eps=1e-12):
    """PyTorch-style spectral norm of a conv weight (Cout, Cin, kh, kw)."""
    cout = w.shape[0]
    wm = w.reshape(cout, -1)
    u = jax.random.normal(key, (cout,), dtype=jnp.float32)
    u = u / (jnp.linalg.norm(u) + eps)
    v = None
    for _ in range(n_iter):
        v = wm.T @ u
        v = v / (jnp.linalg.norm(v) + eps)
        u = wm @ v
        u = u / (jnp.linalg.norm(u) + eps)
    sigma = u @ (wm @ v)
    return w / sigma


def im2col(x_nhwc, k=4, stride=2, pad=1):
    """Extract k x k patches with stride/pad. Returns (N, Ho*Wo, k*k*C)."""
    N, H, W, C = x_nhwc.shape
    xp = jnp.pad(x_nhwc, ((0, 0), (pad, pad), (pad, pad), (0, 0)))
    Ho = (H + 2 * pad - k) // stride + 1
    Wo = (W + 2 * pad - k) // stride + 1
    cols = []
    for kh in range(k):
        for kw in range(k):
            sl = xp[:,
                    kh:kh + stride * (Ho - 1) + 1:stride,
                    kw:kw + stride * (Wo - 1) + 1:stride, :]        # (N,Ho,Wo,C)
            cols.append(sl)
    patches = jnp.stack(cols, axis=3)                               # (N,Ho,Wo,16,C)
    return patches.reshape(N, Ho * Wo, k * k * C), Ho, Wo


def conv_weight_as_matrix(w):
    """(Cout, Cin, kh, kw) -> (kh*kw*Cin, Cout), matching im2col row layout."""
    cout = w.shape[0]
    return jnp.transpose(w, (2, 3, 1, 0)).reshape(-1, cout)


def adaptive_pool_matrix(in_size, out_size):
    """Row-stochastic matrix P (out, in) with PyTorch AdaptiveAvgPool windows."""
    p = np.zeros((out_size, in_size), dtype=np.float32)
    for i in range(out_size):
        start = (i * in_size) // out_size
        end = -((-(i + 1) * in_size) // out_size)                   # ceil
        p[i, start:end] = 1.0 / (end - start)
    return jnp.asarray(p)


def discriminator_forward(x_nchw, params, ph, pw):
    """Full forward pass; input NCHW, output NCHW (N, 1, 30, 30)."""
    w1, b1, w2, b2, w3, b3 = params
    N, Cin, H, W = x_nchw.shape
    c1 = w1.shape[0]                       # 64
    c2 = w2.shape[0]                       # 128
    po, qo = ph.shape[0], pw.shape[0]      # 30, 30
    h1, w1o = H // 2, W // 2               # conv1 output spatial (32, 32)
    oh, ow = h1 // 2, w1o // 2             # conv2 output spatial (16, 16)
    m2 = oh * ow                           # 256

    # --- weight / constant preprocessing (plain JAX, tiny, runs under jit) ---
    w1m = conv_weight_as_matrix(w1).astype(jnp.bfloat16)            # (48, 64)
    b1m = b1.reshape(1, c1).astype(jnp.float32)
    w2t = jnp.transpose(w2, (2, 3, 1, 0)).reshape(16, c1, c2)       # (16,64,128)
    w2t = w2t.astype(jnp.bfloat16)
    b2m = b2.reshape(1, c2).astype(jnp.float32)
    w3r = w3.reshape(1, c2).astype(jnp.float32)                     # (1,128)
    b3m = b3.reshape(1, 1).astype(jnp.float32)
    phl = jnp.repeat(ph, ow, axis=1).astype(jnp.float32)            # (30, 256)
    msk = (jnp.arange(m2)[:, None] % ow ==
           jnp.arange(ow)[None, :]).astype(jnp.float32)             # (256, 16)
    pwt = pw.T.astype(jnp.float32)                                  # (16, 30)

    # --- conv1 im2col, grouped by conv1-output parity (small: ~98 KB/img) ---
    # TODO(synk): fusing conv1's overlapping 4x4/stride-2 window gather fully
    # in-kernel (halo DMA from x) would also remove this XLA-side gather.
    x = jnp.transpose(x_nchw, (0, 2, 3, 1)).astype(jnp.bfloat16)    # NHWC bf16
    p1, _, _ = im2col(x, 4, 2, 1)                                   # (N,1024,48)
    K1 = p1.shape[-1]
    p1g = (p1.reshape(N, oh, 2, ow, 2, K1)
             .transpose(0, 2, 4, 1, 3, 5)
             .reshape(N, 4, m2, K1))                                # (N,4,256,48)

    # --- single fused kernel, one grid step per image ---
    # TODO(synk): for N == 1 on v7x (2 TensorCores) split the conv2 spatial dim
    # across a second "parallel" grid axis so both cores are busy.
    out = pl.pallas_call(
        functools.partial(_disc_kernel, oh=oh, ow=ow, c1=c1, c2=c2),
        out_shape=jax.ShapeDtypeStruct((N, po, qo), jnp.float32),
        grid=(N,),
        in_specs=[
            pl.BlockSpec((1, 4, m2, K1), lambda n: (n, 0, 0, 0)),
            pl.BlockSpec((K1, c1), lambda n: (0, 0)),
            pl.BlockSpec((1, c1), lambda n: (0, 0)),
            pl.BlockSpec((16, c1, c2), lambda n: (0, 0, 0)),
            pl.BlockSpec((1, c2), lambda n: (0, 0)),
            pl.BlockSpec((1, c2), lambda n: (0, 0)),
            pl.BlockSpec((m2, ow), lambda n: (0, 0)),
            pl.BlockSpec((po, m2), lambda n: (0, 0)),
            pl.BlockSpec((ow, qo), lambda n: (0, 0)),
            pl.BlockSpec((1, 1), lambda n: (0, 0)),
        ],
        out_specs=pl.BlockSpec((1, po, qo), lambda n: (n, 0, 0)),
        scratch_shapes=[
            pltpu.VMEM((2, 2, oh + 1, ow + 1, c1), jnp.float32),    # y1 (split)
            pltpu.VMEM((m2, c2), jnp.float32),                      # conv2 acc
        ],
        compiler_params=pltpu.CompilerParams(
            dimension_semantics=("parallel",)),
    )(p1g, w1m, b1m, w2t, b2m, w3r, msk, phl, pwt, b3m)
    return out.reshape(N, 1, po, qo)


def reference_forward(x_nchw, params, ph, pw):
    """Pure-JAX reference (lax.conv), used only as a sanity check."""
    w1, b1, w2, b2, w3, b3 = params
    hi = jax.lax.Precision.HIGHEST
    dn = ('NCHW', 'OIHW', 'NCHW')
    y = jax.lax.conv_general_dilated(x_nchw, w1, (2, 2), ((1, 1), (1, 1)),
                                     dimension_numbers=dn, precision=hi)
    y = y + b1[None, :, None, None]
    y = jnp.where(y >= 0, y, 0.2 * y)
    y = jax.lax.conv_general_dilated(y, w2, (2, 2), ((1, 1), (1, 1)),
                                     dimension_numbers=dn, precision=hi)
    y = y + b2[None, :, None, None]
    y = jnp.where(y >= 0, y, 0.2 * y)
    y = jnp.einsum('nchw,ph,qw->ncpq', y, ph, pw, precision=hi)     # adaptive pool
    y = jnp.einsum('ncpq,oc->nopq', y, w3.reshape(1, -1), precision=hi)
    return y + b3[None, :, None, None]


# --------------------------------- main --------------------------------------

if __name__ == "__main__":
    key = jax.random.PRNGKey(0)
    (k_x, k_w1, k_b1, k_w2, k_b2, k_w3, k_b3,
     k_u1, k_u2, k_u3) = jax.random.split(key, 10)

    # Small but shape-consistent input: N=2, C_in=3, 64x64 spatial.
    N, Cin, H, W = 2, 3, 64, 64
    x = jax.random.normal(k_x, (N, Cin, H, W), dtype=jnp.float32)

    # Deterministic synthetic parameters (shapes from the nn.Module __init__).
    w1 = 0.05 * jax.random.normal(k_w1, (64, Cin, 4, 4), dtype=jnp.float32)
    b1 = 0.01 * jax.random.normal(k_b1, (64,), dtype=jnp.float32)
    w2 = 0.05 * jax.random.normal(k_w2, (128, 64, 4, 4), dtype=jnp.float32)
    b2 = 0.01 * jax.random.normal(k_b2, (128,), dtype=jnp.float32)
    w3 = 0.05 * jax.random.normal(k_w3, (1, 128, 1, 1), dtype=jnp.float32)
    b3 = 0.01 * jax.random.normal(k_b3, (1,), dtype=jnp.float32)

    # spectral_norm(): divide each conv weight by its top singular value
    # (one power iteration from a deterministic u, as in torch's forward).
    w1 = spectral_normalize(w1, k_u1)
    w2 = spectral_normalize(w2, k_u2)
    w3 = spectral_normalize(w3, k_u3)
    params = (w1, b1, w2, b2, w3, b3)

    # Adaptive-avg-pool mixing matrices for the 16x16 -> 30x30 pool.
    h2 = (H // 2) // 2
    w2s = (W // 2) // 2
    ph = adaptive_pool_matrix(h2, 30)
    pw = adaptive_pool_matrix(w2s, 30)

    fwd = jax.jit(discriminator_forward)
    out = jax.block_until_ready(fwd(x, params, ph, pw))
    assert out.shape == (N, 1, 30, 30), out.shape

    ref = jax.block_until_ready(reference_forward(x, params, ph, pw))
    np.testing.assert_allclose(np.asarray(out), np.asarray(ref),
                               rtol=2e-2, atol=2e-2)

    print("KERNEL_OK")
</pallas_src>

<mosaic_0001>
module attributes {stable_mosaic.version = 11 : i64} {
  func.func @_disc_kernel(%arg0: i32, %arg1: memref<1x4x256x48xbf16, #tpu.memory_space<vmem>>, %arg2: memref<48x64xbf16, #tpu.memory_space<vmem>>, %arg3: memref<1x64xf32, #tpu.memory_space<vmem>>, %arg4: memref<16x64x128xbf16, #tpu.memory_space<vmem>>, %arg5: memref<1x128xf32, #tpu.memory_space<vmem>>, %arg6: memref<1x128xf32, #tpu.memory_space<vmem>>, %arg7: memref<256x16xf32, #tpu.memory_space<vmem>>, %arg8: memref<30x256xf32, #tpu.memory_space<vmem>>, %arg9: memref<16x30xf32, #tpu.memory_space<vmem>>, %arg10: memref<1x1xf32, #tpu.memory_space<vmem>>, %arg11: memref<1x30x30xf32, #tpu.memory_space<vmem>>, %arg12: memref<2x2x17x17x64xf32, #tpu.memory_space<vmem>>, %arg13: memref<256x128xf32, #tpu.memory_space<vmem>>) attributes {dimension_semantics = [#tpu.dimension_semantics<parallel>], iteration_bounds = array<i64: 2>, scalar_prefetch = 0 : i64, scratch_operands = 2 : i64, tpu.core_type = #tpu.core_type<tc>, window_params = [{transform_indices = @transform_0, window_bounds = array<i64: 1, 4, 256, 48>}, {pipeline_mode = #tpu.pipeline_mode<synchronous>, transform_indices = @transform_1, window_bounds = array<i64: 48, 64>}, {pipeline_mode = #tpu.pipeline_mode<synchronous>, transform_indices = @transform_2, window_bounds = array<i64: 1, 64>}, {pipeline_mode = #tpu.pipeline_mode<synchronous>, transform_indices = @transform_3, window_bounds = array<i64: 16, 64, 128>}, {pipeline_mode = #tpu.pipeline_mode<synchronous>, transform_indices = @transform_4, window_bounds = array<i64: 1, 128>}, {pipeline_mode = #tpu.pipeline_mode<synchronous>, transform_indices = @transform_5, window_bounds = array<i64: 1, 128>}, {pipeline_mode = #tpu.pipeline_mode<synchronous>, transform_indices = @transform_6, window_bounds = array<i64: 256, 16>}, {pipeline_mode = #tpu.pipeline_mode<synchronous>, transform_indices = @transform_7, window_bounds = array<i64: 30, 256>}, {pipeline_mode = #tpu.pipeline_mode<synchronous>, transform_indices = @transform_8, window_bounds = array<i64: 16, 30>}, {pipeline_mode = #tpu.pipeline_mode<synchronous>, transform_indices = @transform_9, window_bounds = array<i64: 1, 1>}, {transform_indices = @transform_10, window_bounds = array<i64: 1, 30, 30>}]} {
    %cst = arith.constant 0.000000e+00 : f32
    %0 = vector.broadcast %cst : f32 to vector<2x2x17x17x64xf32>
    %c0 = arith.constant 0 : index
    %c0_0 = arith.constant 0 : index
    %c0_1 = arith.constant 0 : index
    %c0_2 = arith.constant 0 : index
    %c0_3 = arith.constant 0 : index
    %1 = vector.load %arg12[%c0, %c0_0, %c0_1, %c0_2, %c0_3] : memref<2x2x17x17x64xf32, #tpu.memory_space<vmem>>, vector<2x2x17x17x64xf32>
    tpu.vector_store %arg12[%c0, %c0_0, %c0_1, %c0_2, %c0_3], %0 {strides = array<i32>} : memref<2x2x17x17x64xf32, #tpu.memory_space<vmem>>, vector<2x2x17x17x64xf32>,
    %c0_4 = arith.constant 0 : index
    %c0_5 = arith.constant 0 : index
    %c0_6 = arith.constant 0 : index
    %c0_7 = arith.constant 0 : index
    %2 = vector.load %arg1[%c0_4, %c0_5, %c0_6, %c0_7] : memref<1x4x256x48xbf16, #tpu.memory_space<vmem>>, vector<1x1x256x48xbf16>
    %3 = vector.shape_cast %2 : vector<1x1x256x48xbf16> to vector<256x48xbf16>
    %c0_8 = arith.constant 0 : index
    %c0_9 = arith.constant 0 : index
    %4 = vector.load %arg2[%c0_8, %c0_9] : memref<48x64xbf16, #tpu.memory_space<vmem>>, vector<48x64xbf16>
    %cst_10 = arith.constant dense<0.000000e+00> : vector<256x64xf32>
    %5 = tpu.matmul %3, %4, %cst_10 {dimension_numbers = #tpu.dot_dimension_numbers<[1], [0], [0], [1], [0, 0, 1, 1], [], []>} : vector<256x48xbf16>, vector<48x64xbf16>, vector<256x64xf32> -> vector<256x64xf32>
    %c0_11 = arith.constant 0 : index
    %c0_12 = arith.constant 0 : index
    %6 = vector.load %arg3[%c0_11, %c0_12] : memref<1x64xf32, #tpu.memory_space<vmem>>, vector<1x64xf32>
    %7 = vector.broadcast %6 : vector<1x64xf32> to vector<256x64xf32>
    %8 = arith.addf %5, %7 : vector<256x64xf32>
    %cst_13 = arith.constant 0.000000e+00 : f32
    %9 = vector.broadcast %cst_13 : f32 to vector<256x64xf32>
    %10 = arith.cmpf oge, %8, %9 : vector<256x64xf32>
    %cst_14 = arith.constant 2.000000e-01 : f32
    %11 = vector.broadcast %cst_14 : f32 to vector<256x64xf32>
    %12 = arith.mulf %11, %8 : vector<256x64xf32>
    %13 = arith.select %10, %8, %12 : vector<256x64xi1>, vector<256x64xf32>
    %14 = vector.shape_cast %13 : vector<256x64xf32> to vector<16x16x64xf32>
    %c0_15 = arith.constant 0 : index
    %c0_16 = arith.constant 0 : index
    %c0_17 = arith.constant 0 : index
    %c0_18 = arith.constant 0 : index
    %c0_19 = arith.constant 0 : index
    %15 = vector.load %arg12[%c0_15, %c0_16, %c0_17, %c0_18, %c0_19] : memref<2x2x17x17x64xf32, #tpu.memory_space<vmem>>, vector<1x1x16x16x64xf32>
    %16 = vector.shape_cast %15 : vector<1x1x16x16x64xf32> to vector<16x16x64xf32>
    %17 = vector.shape_cast %14 : vector<16x16x64xf32> to vector<1x1x16x16x64xf32>
    tpu.vector_store %arg12[%c0_15, %c0_16, %c0_17, %c0_18, %c0_19], %17 {strides = array<i32>} : memref<2x2x17x17x64xf32, #tpu.memory_space<vmem>>, vector<1x1x16x16x64xf32>,
    %c0_20 = arith.constant 0 : index
    %c1 = arith.constant 1 : index
    %c0_21 = arith.constant 0 : index
    %c0_22 = arith.constant 0 : index
    %18 = vector.load %arg1[%c0_20, %c1, %c0_21, %c0_22] : memref<1x4x256x48xbf16, #tpu.memory_space<vmem>>, vector<1x1x256x48xbf16>
    %19 = vector.shape_cast %18 : vector<1x1x256x48xbf16> to vector<256x48xbf16>
    %c0_23 = arith.constant 0 : index
    %c0_24 = arith.constant 0 : index
    %20 = vector.load %arg2[%c0_23, %c0_24] : memref<48x64xbf16, #tpu.memory_space<vmem>>, vector<48x64xbf16>
    %cst_25 = arith.constant dense<0.000000e+00> : vector<256x64xf32>
    %21 = tpu.matmul %19, %20, %cst_25 {dimension_numbers = #tpu.dot_dimension_numbers<[1], [0], [0], [1], [0, 0, 1, 1], [], []>} : vector<256x48xbf16>, vector<48x64xbf16>, vector<256x64xf32> -> vector<256x64xf32>
    %c0_26 = arith.constant 0 : index
    %c0_27 = arith.constant 0 : index
    %22 = vector.load %arg3[%c0_26, %c0_27] : memref<1x64xf32, #tpu.memory_space<vmem>>, vector<1x64xf32>
    %23 = vector.broadcast %22 : vector<1x64xf32> to vector<256x64xf32>
    %24 = arith.addf %21, %23 : vector<256x64xf32>
    %cst_28 = arith.constant 0.000000e+00 : f32
    %25 = vector.broadcast %cst_28 : f32 to vector<256x64xf32>
    %26 = arith.cmpf oge, %24, %25 : vector<256x64xf32>
    %cst_29 = arith.constant 2.000000e-01 : f32
    %27 = vector.broadcast %cst_29 : f32 to vector<256x64xf32>
    %28 = arith.mulf %27, %24 : vector<256x64xf32>
    %29 = arith.select %26, %24, %28 : vector<256x64xi1>, vector<256x64xf32>
    %30 = vector.shape_cast %29 : vector<256x64xf32> to vector<16x16x64xf32>
    %c0_30 = arith.constant 0 : index
    %c1_31 = arith.constant 1 : index
    %c0_32 = arith.constant 0 : index
    %c1_33 = arith.constant 1 : index
    %c0_34 = arith.constant 0 : index
    %31 = vector.load %arg12[%c0_30, %c1_31, %c0_32, %c1_33, %c0_34] : memref<2x2x17x17x64xf32, #tpu.memory_space<vmem>>, vector<1x1x16x16x64xf32>
    %32 = vector.shape_cast %31 : vector<1x1x16x16x64xf32> to vector<16x16x64xf32>
    %33 = vector.shape_cast %30 : vector<16x16x64xf32> to vector<1x1x16x16x64xf32>
    tpu.vector_store %arg12[%c0_30, %c1_31, %c0_32, %c1_33, %c0_34], %33 {strides = array<i32>} : memref<2x2x17x17x64xf32, #tpu.memory_space<vmem>>, vector<1x1x16x16x64xf32>,
    %c0_35 = arith.constant 0 : index
    %c2 = arith.constant 2 : index
    %c0_36 = arith.constant 0 : index
    %c0_37 = arith.constant 0 : index
    %34 = vector.load %arg1[%c0_35, %c2, %c0_36, %c0_37] : memref<1x4x256x48xbf16, #tpu.memory_space<vmem>>, vector<1x1x256x48xbf16>
    %35 = vector.shape_cast %34 : vector<1x1x256x48xbf16> to vector<256x48xbf16>
    %c0_38 = arith.constant 0 : index
    %c0_39 = arith.constant 0 : index
    %36 = vector.load %arg2[%c0_38, %c0_39] : memref<48x64xbf16, #tpu.memory_space<vmem>>, vector<48x64xbf16>
    %cst_40 = arith.constant dense<0.000000e+00> : vector<256x64xf32>
    %37 = tpu.matmul %35, %36, %cst_40 {dimension_numbers = #tpu.dot_dimension_numbers<[1], [0], [0], [1], [0, 0, 1, 1], [], []>} : vector<256x48xbf16>, vector<48x64xbf16>, vector<256x64xf32> -> vector<256x64xf32>
    %c0_41 = arith.constant 0 : index
    %c0_42 = arith.constant 0 : index
    %38 = vector.load %arg3[%c0_41, %c0_42] : memref<1x64xf32, #tpu.memory_space<vmem>>, vector<1x64xf32>
    %39 = vector.broadcast %38 : vector<1x64xf32> to vector<256x64xf32>
    %40 = arith.addf %37, %39 : vector<256x64xf32>
    %cst_43 = arith.constant 0.000000e+00 : f32
    %41 = vector.broadcast %cst_43 : f32 to vector<256x64xf32>
    %42 = arith.cmpf oge, %40, %41 : vector<256x64xf32>
    %cst_44 = arith.constant 2.000000e-01 : f32
    %43 = vector.broadcast %cst_44 : f32 to vector<256x64xf32>
    %44 = arith.mulf %43, %40 : vector<256x64xf32>
    %45 = arith.select %42, %40, %44 : vector<256x64xi1>, vector<256x64xf32>
    %46 = vector.shape_cast %45 : vector<256x64xf32> to vector<16x16x64xf32>
    %c1_45 = arith.constant 1 : index
    %c0_46 = arith.constant 0 : index
    %c1_47 = arith.constant 1 : index
    %c0_48 = arith.constant 0 : index
    %c0_49 = arith.constant 0 : index
    %47 = vector.load %arg12[%c1_45, %c0_46, %c1_47, %c0_48, %c0_49] : memref<2x2x17x17x64xf32, #tpu.memory_space<vmem>>, vector<1x1x16x16x64xf32>
    %48 = vector.shape_cast %47 : vector<1x1x16x16x64xf32> to vector<16x16x64xf32>
    %49 = vector.shape_cast %46 : vector<16x16x64xf32> to vector<1x1x16x16x64xf32>
    tpu.vector_store %arg12[%c1_45, %c0_46, %c1_47, %c0_48, %c0_49], %49 {strides = array<i32>} : memref<2x2x17x17x64xf32, #tpu.memory_space<vmem>>, vector<1x1x16x16x64xf32>,
    %c0_50 = arith.constant 0 : index
    %c3 = arith.constant 3 : index
    %c0_51 = arith.constant 0 : index
    %c0_52 = arith.constant 0 : index
    %50 = vector.load %arg1[%c0_50, %c3, %c0_51, %c0_52] : memref<1x4x256x48xbf16, #tpu.memory_space<vmem>>, vector<1x1x256x48xbf16>
    %51 = vector.shape_cast %50 : vector<1x1x256x48xbf16> to vector<256x48xbf16>
    %c0_53 = arith.constant 0 : index
    %c0_54 = arith.constant 0 : index
    %52 = vector.load %arg2[%c0_53, %c0_54] : memref<48x64xbf16, #tpu.memory_space<vmem>>, vector<48x64xbf16>
    %cst_55 = arith.constant dense<0.000000e+00> : vector<256x64xf32>
    %53 = tpu.matmul %51, %52, %cst_55 {dimension_numbers = #tpu.dot_dimension_numbers<[1], [0], [0], [1], [0, 0, 1, 1], [], []>} : vector<256x48xbf16>, vector<48x64xbf16>, vector<256x64xf32> -> vector<256x64xf32>
    %c0_56 = arith.constant 0 : index
    %c0_57 = arith.constant 0 : index
    %54 = vector.load %arg3[%c0_56, %c0_57] : memref<1x64xf32, #tpu.memory_space<vmem>>, vector<1x64xf32>
    %55 = vector.broadcast %54 : vector<1x64xf32> to vector<256x64xf32>
    %56 = arith.addf %53, %55 : vector<256x64xf32>
    %cst_58 = arith.constant 0.000000e+00 : f32
    %57 = vector.broadcast %cst_58 : f32 to vector<256x64xf32>
    %58 = arith.cmpf oge, %56, %57 : vector<256x64xf32>
    %cst_59 = arith.constant 2.000000e-01 : f32
    %59 = vector.broadcast %cst_59 : f32 to vector<256x64xf32>
    %60 = arith.mulf %59, %56 : vector<256x64xf32>
    %61 = arith.select %58, %56, %60 : vector<256x64xi1>, vector<256x64xf32>
    %62 = vector.shape_cast %61 : vector<256x64xf32> to vector<16x16x64xf32>
    %c1_60 = arith.constant 1 : index
    %c1_61 = arith.constant 1 : index
    %c1_62 = arith.constant 1 : index
    %c1_63 = arith.constant 1 : index
    %c0_64 = arith.constant 0 : index
    %63 = vector.load %arg12[%c1_60, %c1_61, %c1_62, %c1_63, %c0_64] : memref<2x2x17x17x64xf32, #tpu.memory_space<vmem>>, vector<1x1x16x16x64xf32>
    %64 = vector.shape_cast %63 : vector<1x1x16x16x64xf32> to vector<16x16x64xf32>
    %65 = vector.shape_cast %62 : vector<16x16x64xf32> to vector<1x1x16x16x64xf32>
    tpu.vector_store %arg12[%c1_60, %c1_61, %c1_62, %c1_63, %c0_64], %65 {strides = array<i32>} : memref<2x2x17x17x64xf32, #tpu.memory_space<vmem>>, vector<1x1x16x16x64xf32>,
    %cst_65 = arith.constant 0.000000e+00 : f32
    %66 = vector.broadcast %cst_65 : f32 to vector<256x128xf32>
    %c0_66 = arith.constant 0 : index
    %c0_67 = arith.constant 0 : index
    %67 = vector.load %arg13[%c0_66, %c0_67] : memref<256x128xf32, #tpu.memory_space<vmem>>, vector<256x128xf32>
    tpu.vector_store %arg13[%c0_66, %c0_67], %66 {strides = array<i32>} : memref<256x128xf32, #tpu.memory_space<vmem>>, vector<256x128xf32>,
    %c1_68 = arith.constant 1 : index
    %c1_69 = arith.constant 1 : index
    %c0_70 = arith.constant 0 : index
    %c0_71 = arith.constant 0 : index
    %c0_72 = arith.constant 0 : index
    %68 = vector.load %arg12[%c1_68, %c1_69, %c0_70, %c0_71, %c0_72] : memref<2x2x17x17x64xf32, #tpu.memory_space<vmem>>, vector<1x1x16x16x64xf32>
    %69 = vector.shape_cast %68 : vector<1x1x16x16x64xf32> to vector<16x16x64xf32>
    %c0_73 = arith.constant 0 : index
    %c0_74 = arith.constant 0 : index
    %70 = vector.load %arg13[%c0_73, %c0_74] : memref<256x128xf32, #tpu.memory_space<vmem>>, vector<256x128xf32>
    %71 = vector.shape_cast %69 : vector<16x16x64xf32> to vector<256x64xf32>
    %72 = arith.truncf %71 : vector<256x64xf32> to vector<256x64xbf16>
    %c0_75 = arith.constant 0 : index
    %c0_76 = arith.constant 0 : index
    %c0_77 = arith.constant 0 : index
    %73 = vector.load %arg4[%c0_75, %c0_76, %c0_77] : memref<16x64x128xbf16, #tpu.memory_space<vmem>>, vector<1x64x128xbf16>
    %74 = vector.shape_cast %73 : vector<1x64x128xbf16> to vector<64x128xbf16>
    %cst_78 = arith.constant dense<0.000000e+00> : vector<256x128xf32>
    %75 = tpu.matmul %72, %74, %cst_78 {dimension_numbers = #tpu.dot_dimension_numbers<[1], [0], [0], [1], [0, 0, 1, 1], [], []>} : vector<256x64xbf16>, vector<64x128xbf16>, vector<256x128xf32> -> vector<256x128xf32>
    %76 = arith.addf %70, %75 : vector<256x128xf32>
    %c0_79 = arith.constant 0 : index
    %c0_80 = arith.constant 0 : index
    %77 = vector.load %arg13[%c0_79, %c0_80] : memref<256x128xf32, #tpu.memory_space<vmem>>, vector<256x128xf32>
    tpu.vector_store %arg13[%c0_79, %c0_80], %76 {strides = array<i32>} : memref<256x128xf32, #tpu.memory_space<vmem>>, vector<256x128xf32>,
    %c1_81 = arith.constant 1 : index
    %c0_82 = arith.constant 0 : index
    %c0_83 = arith.constant 0 : index
    %c0_84 = arith.constant 0 : index
    %c0_85 = arith.constant 0 : index
    %78 = vector.load %arg12[%c1_81, %c0_82, %c0_83, %c0_84, %c0_85] : memref<2x2x17x17x64xf32, #tpu.memory_space<vmem>>, vector<1x1x16x16x64xf32>
    %79 = vector.shape_cast %78 : vector<1x1x16x16x64xf32> to vector<16x16x64xf32>
    %c0_86 = arith.constant 0 : index
    %c0_87 = arith.constant 0 : index
    %80 = vector.load %arg13[%c0_86, %c0_87] : memref<256x128xf32, #tpu.memory_space<vmem>>, vector<256x128xf32>
    %81 = vector.shape_cast %79 : vector<16x16x64xf32> to vector<256x64xf32>
    %82 = arith.truncf %81 : vector<256x64xf32> to vector<256x64xbf16>
    %c1_88 = arith.constant 1 : index
    %c0_89 = arith.constant 0 : index
    %c0_90 = arith.constant 0 : index
    %83 = vector.load %arg4[%c1_88, %c0_89, %c0_90] : memref<16x64x128xbf16, #tpu.memory_space<vmem>>, vector<1x64x128xbf16>
    %84 = vector.shape_cast %83 : vector<1x64x128xbf16> to vector<64x128xbf16>
    %cst_91 = arith.constant dense<0.000000e+00> : vector<256x128xf32>
    %85 = tpu.matmul %82, %84, %cst_91 {dimension_numbers = #tpu.dot_dimension_numbers<[1], [0], [0], [1], [0, 0, 1, 1], [], []>} : vector<256x64xbf16>, vector<64x128xbf16>, vector<256x128xf32> -> vector<256x128xf32>
    %86 = arith.addf %80, %85 : vector<256x128xf32>
    %c0_92 = arith.constant 0 : index
    %c0_93 = arith.constant 0 : index
    %87 = vector.load %arg13[%c0_92, %c0_93] : memref<256x128xf32, #tpu.memory_space<vmem>>, vector<256x128xf32>
    tpu.vector_store %arg13[%c0_92, %c0_93], %86 {strides = array<i32>} : memref<256x128xf32, #tpu.memory_space<vmem>>, vector<256x128xf32>,
    %c1_94 = arith.constant 1 : index
    %c1_95 = arith.constant 1 : index
    %c0_96 = arith.constant 0 : index
    %c1_97 = arith.constant 1 : index
    %c0_98 = arith.constant 0 : index
    %88 = vector.load %arg12[%c1_94, %c1_95, %c0_96, %c1_97, %c0_98] : memref<2x2x17x17x64xf32, #tpu.memory_space<vmem>>, vector<1x1x16x16x64xf32>
    %89 = vector.shape_cast %88 : vector<1x1x16x16x64xf32> to vector<16x16x64xf32>
    %c0_99 = arith.constant 0 : index
    %c0_100 = arith.constant 0 : index
    %90 = vector.load %arg13[%c0_99, %c0_100] : memref<256x128xf32, #tpu.memory_space<vmem>>, vector<256x128xf32>
    %91 = vector.shape_cast %89 : vector<16x16x64xf32> to vector<256x64xf32>
    %92 = arith.truncf %91 : vector<256x64xf32> to vector<256x64xbf16>
    %c2_101 = arith.constant 2 : index
    %c0_102 = arith.constant 0 : index
    %c0_103 = arith.constant 0 : index
    %93 = vector.load %arg4[%c2_101, %c0_102, %c0_103] : memref<16x64x128xbf16, #tpu.memory_space<vmem>>, vector<1x64x128xbf16>
    %94 = vector.shape_cast %93 : vector<1x64x128xbf16> to vector<64x128xbf16>
    %cst_104 = arith.constant dense<0.000000e+00> : vector<256x128xf32>
    %95 = tpu.matmul %92, %94, %cst_104 {dimension_numbers = #tpu.dot_dimension_numbers<[1], [0], [0], [1], [0, 0, 1, 1], [], []>} : vector<256x64xbf16>, vector<64x128xbf16>, vector<256x128xf32> -> vector<256x128xf32>
    %96 = arith.addf %90, %95 : vector<256x128xf32>
    %c0_105 = arith.constant 0 : index
    %c0_106 = arith.constant 0 : index
    %97 = vector.load %arg13[%c0_105, %c0_106] : memref<256x128xf32, #tpu.memory_space<vmem>>, vector<256x128xf32>
    tpu.vector_store %arg13[%c0_105, %c0_106], %96 {strides = array<i32>} : memref<256x128xf32, #tpu.memory_space<vmem>>, vector<256x128xf32>,
    %c1_107 = arith.constant 1 : index
    %c0_108 = arith.constant 0 : index
    %c0_109 = arith.constant 0 : index
    %c1_110 = arith.constant 1 : index
    %c0_111 = arith.constant 0 : index
    %98 = vector.load %arg12[%c1_107, %c0_108, %c0_109, %c1_110, %c0_111] : memref<2x2x17x17x64xf32, #tpu.memory_space<vmem>>, vector<1x1x16x16x64xf32>
    %99 = vector.shape_cast %98 : vector<1x1x16x16x64xf32> to vector<16x16x64xf32>
    %c0_112 = arith.constant 0 : index
    %c0_113 = arith.constant 0 : index
    %100 = vector.load %arg13[%c0_112, %c0_113] : memref<256x128xf32, #tpu.memory_space<vmem>>, vector<256x128xf32>
    %101 = vector.shape_cast %99 : vector<16x16x64xf32> to vector<256x64xf32>
    %102 = arith.truncf %101 : vector<256x64xf32> to vector<256x64xbf16>
    %c3_114 = arith.constant 3 : index
    %c0_115 = arith.constant 0 : index
    %c0_116 = arith.constant 0 : index
    %103 = vector.load %arg4[%c3_114, %c0_115, %c0_116] : memref<16x64x128xbf16, #tpu.memory_space<vmem>>, vector<1x64x128xbf16>
    %104 = vector.shape_cast %103 : vector<1x64x128xbf16> to vector<64x128xbf16>
    %cst_117 = arith.constant dense<0.000000e+00> : vector<256x128xf32>
    %105 = tpu.matmul %102, %104, %cst_117 {dimension_numbers = #tpu.dot_dimension_numbers<[1], [0], [0], [1], [0, 0, 1, 1], [], []>} : vector<256x64xbf16>, vector<64x128xbf16>, vector<256x128xf32> -> vector<256x128xf32>
    %106 = arith.addf %100, %105 : vector<256x128xf32>
    %c0_118 = arith.constant 0 : index
    %c0_119 = arith.constant 0 : index
    %107 = vector.load %arg13[%c0_118, %c0_119] : memref<256x128xf32, #tpu.memory_space<vmem>>, vector<256x128xf32>
    tpu.vector_store %arg13[%c0_118, %c0_119], %106 {strides = array<i32>} : memref<256x128xf32, #tpu.memory_space<vmem>>, vector<256x128xf32>,
    %c0_120 = arith.constant 0 : index
    %c1_121 = arith.constant 1 : index
    %c0_122 = arith.constant 0 : index
    %c0_123 = arith.constant 0 : index
    %c0_124 = arith.constant 0 : index
    %108 = vector.load %arg12[%c0_120, %c1_121, %c0_122, %c0_123, %c0_124] : memref<2x2x17x17x64xf32, #tpu.memory_space<vmem>>, vector<1x1x16x16x64xf32>
    %109 = vector.shape_cast %108 : vector<1x1x16x16x64xf32> to vector<16x16x64xf32>
    %c0_125 = arith.constant 0 : index
    %c0_126 = arith.constant 0 : index
    %110 = vector.load %arg13[%c0_125, %c0_126] : memref<256x128xf32, #tpu.memory_space<vmem>>, vector<256x128xf32>
    %111 = vector.shape_cast %109 : vector<16x16x64xf32> to vector<256x64xf32>
    %112 = arith.truncf %111 : vector<256x64xf32> to vector<256x64xbf16>
    %c4 = arith.constant 4 : index
    %c0_127 = arith.constant 0 : index
    %c0_128 = arith.constant 0 : index
    %113 = vector.load %arg4[%c4, %c0_127, %c0_128] : memref<16x64x128xbf16, #tpu.memory_space<vmem>>, vector<1x64x128xbf16>
    %114 = vector.shape_cast %113 : vector<1x64x128xbf16> to vector<64x128xbf16>
    %cst_129 = arith.constant dense<0.000000e+00> : vector<256x128xf32>
    %115 = tpu.matmul %112, %114, %cst_129 {dimension_numbers = #tpu.dot_dimension_numbers<[1], [0], [0], [1], [0, 0, 1, 1], [], []>} : vector<256x64xbf16>, vector<64x128xbf16>, vector<256x128xf32> -> vector<256x128xf32>
    %116 = arith.addf %110, %115 : vector<256x128xf32>
    %c0_130 = arith.constant 0 : index
    %c0_131 = arith.constant 0 : index
    %117 = vector.load %arg13[%c0_130, %c0_131] : memref<256x128xf32, #tpu.memory_space<vmem>>, vector<256x128xf32>
    tpu.vector_store %arg13[%c0_130, %c0_131], %116 {strides = array<i32>} : memref<256x128xf32, #tpu.memory_space<vmem>>, vector<256x128xf32>,
    %c0_132 = arith.constant 0 : index
    %c0_133 = arith.constant 0 : index
    %c0_134 = arith.constant 0 : index
    %c0_135 = arith.constant 0 : index
    %c0_136 = arith.constant 0 : index
    %118 = vector.load %arg12[%c0_132, %c0_133, %c0_134, %c0_135, %c0_136] : memref<2x2x17x17x64xf32, #tpu.memory_space<vmem>>, vector<1x1x16x16x64xf32>
    %119 = vector.shape_cast %118 : vector<1x1x16x16x64xf32> to vector<16x16x64xf32>
    %c0_137 = arith.constant 0 : index
    %c0_138 = arith.constant 0 : index
    %120 = vector.load %arg13[%c0_137, %c0_138] : memref<256x128xf32, #tpu.memory_space<vmem>>, vector<256x128xf32>
    %121 = vector.shape_cast %119 : vector<16x16x64xf32> to vector<256x64xf32>
    %122 = arith.truncf %121 : vector<256x64xf32> to vector<256x64xbf16>
    %c5 = arith.constant 5 : index
    %c0_139 = arith.constant 0 : index
    %c0_140 = arith.constant 0 : index
    %123 = vector.load %arg4[%c5, %c0_139, %c0_140] : memref<16x64x128xbf16, #tpu.memory_space<vmem>>, vector<1x64x128xbf16>
    %124 = vector.shape_cast %123 : vector<1x64x128xbf16> to vector<64x128xbf16>
    %cst_141 = arith.constant dense<0.000000e+00> : vector<256x128xf32>
    %125 = tpu.matmul %122, %124, %cst_141 {dimension_numbers = #tpu.dot_dimension_numbers<[1], [0], [0], [1], [0, 0, 1, 1], [], []>} : vector<256x64xbf16>, vector<64x128xbf16>, vector<256x128xf32> -> vector<256x128xf32>
    %126 = arith.addf %120, %125 : vector<256x128xf32>
    %c0_142 = arith.constant 0 : index
    %c0_143 = arith.constant 0 : index
    %127 = vector.load %arg13[%c0_142, %c0_143] : memref<256x128xf32, #tpu.memory_space<vmem>>, vector<256x128xf32>
    tpu.vector_store %arg13[%c0_142, %c0_143], %126 {strides = array<i32>} : memref<256x128xf32, #tpu.memory_space<vmem>>, vector<256x128xf32>,
    %c0_144 = arith.constant 0 : index
    %c1_145 = arith.constant 1 : index
    %c0_146 = arith.constant 0 : index
    %c1_147 = arith.constant 1 : index
    %c0_148 = arith.constant 0 : index
    %128 = vector.load %arg12[%c0_144, %c1_145, %c0_146, %c1_147, %c0_148] : memref<2x2x17x17x64xf32, #tpu.memory_space<vmem>>, vector<1x1x16x16x64xf32>
    %129 = vector.shape_cast %128 : vector<1x1x16x16x64xf32> to vector<16x16x64xf32>
    %c0_149 = arith.constant 0 : index
    %c0_150 = arith.constant 0 : index
    %130 = vector.load %arg13[%c0_149, %c0_150] : memref<256x128xf32, #tpu.memory_space<vmem>>, vector<256x128xf32>
    %131 = vector.shape_cast %129 : vector<16x16x64xf32> to vector<256x64xf32>
    %132 = arith.truncf %131 : vector<256x64xf32> to vector<256x64xbf16>
    %c6 = arith.constant 6 : index
    %c0_151 = arith.constant 0 : index
    %c0_152 = arith.constant 0 : index
    %133 = vector.load %arg4[%c6, %c0_151, %c0_152] : memref<16x64x128xbf16, #tpu.memory_space<vmem>>, vector<1x64x128xbf16>
    %134 = vector.shape_cast %133 : vector<1x64x128xbf16> to vector<64x128xbf16>
    %cst_153 = arith.constant dense<0.000000e+00> : vector<256x128xf32>
    %135 = tpu.matmul %132, %134, %cst_153 {dimension_numbers = #tpu.dot_dimension_numbers<[1], [0], [0], [1], [0, 0, 1, 1], [], []>} : vector<256x64xbf16>, vector<64x128xbf16>, vector<256x128xf32> -> vector<256x128xf32>
    %136 = arith.addf %130, %135 : vector<256x128xf32>
    %c0_154 = arith.constant 0 : index
    %c0_155 = arith.constant 0 : index
    %137 = vector.load %arg13[%c0_154, %c0_155] : memref<256x128xf32, #tpu.memory_space<vmem>>, vector<256x128xf32>
    tpu.vector_store %arg13[%c0_154, %c0_155], %136 {strides = array<i32>} : memref<256x128xf32, #tpu.memory_space<vmem>>, vector<256x128xf32>,
    %c0_156 = arith.constant 0 : index
    %c0_157 = arith.constant 0 : index
    %c0_158 = arith.constant 0 : index
    %c1_159 = arith.constant 1 : index
    %c0_160 = arith.constant 0 : index
    %138 = vector.load %arg12[%c0_156, %c0_157, %c0_158, %c1_159, %c0_160] : memref<2x2x17x17x64xf32, #tpu.memory_space<vmem>>, vector<1x1x16x16x64xf32>
    %139 = vector.shape_cast %138 : vector<1x1x16x16x64xf32> to vector<16x16x64xf32>
    %c0_161 = arith.constant 0 : index
    %c0_162 = arith.constant 0 : index
    %140 = vector.load %arg13[%c0_161, %c0_162] : memref<256x128xf32, #tpu.memory_space<vmem>>, vector<256x128xf32>
    %141 = vector.shape_cast %139 : vector<16x16x64xf32> to vector<256x64xf32>
    %142 = arith.truncf %141 : vector<256x64xf32> to vector<256x64xbf16>
    %c7 = arith.constant 7 : index
    %c0_163 = arith.constant 0 : index
    %c0_164 = arith.constant 0 : index
    %143 = vector.load %arg4[%c7, %c0_163, %c0_164] : memref<16x64x128xbf16, #tpu.memory_space<vmem>>, vector<1x64x128xbf16>
    %144 = vector.shape_cast %143 : vector<1x64x128xbf16> to vector<64x128xbf16>
    %cst_165 = arith.constant dense<0.000000e+00> : vector<256x128xf32>
    %145 = tpu.matmul %142, %144, %cst_165 {dimension_numbers = #tpu.dot_dimension_numbers<[1], [0], [0], [1], [0, 0, 1, 1], [], []>} : vector<256x64xbf16>, vector<64x128xbf16>, vector<256x128xf32> -> vector<256x128xf32>
    %146 = arith.addf %140, %145 : vector<256x128xf32>
    %c0_166 = arith.constant 0 : index
    %c0_167 = arith.constant 0 : index
    %147 = vector.load %arg13[%c0_166, %c0_167] : memref<256x128xf32, #tpu.memory_space<vmem>>, vector<256x128xf32>
    tpu.vector_store %arg13[%c0_166, %c0_167], %146 {strides = array<i32>} : memref<256x128xf32, #tpu.memory_space<vmem>>, vector<256x128xf32>,
    %c1_168 = arith.constant 1 : index
    %c1_169 = arith.constant 1 : index
    %c1_170 = arith.constant 1 : index
    %c0_171 = arith.constant 0 : index
    %c0_172 = arith.constant 0 : index
    %148 = vector.load %arg12[%c1_168, %c1_169, %c1_170, %c0_171, %c0_172] : memref<2x2x17x17x64xf32, #tpu.memory_space<vmem>>, vector<1x1x16x16x64xf32>
    %149 = vector.shape_cast %148 : vector<1x1x16x16x64xf32> to vector<16x16x64xf32>
    %c0_173 = arith.constant 0 : index
    %c0_174 = arith.constant 0 : index
    %150 = vector.load %arg13[%c0_173, %c0_174] : memref<256x128xf32, #tpu.memory_space<vmem>>, vector<256x128xf32>
    %151 = vector.shape_cast %149 : vector<16x16x64xf32> to vector<256x64xf32>
    %152 = arith.truncf %151 : vector<256x64xf32> to vector<256x64xbf16>
    %c8 = arith.constant 8 : index
    %c0_175 = arith.constant 0 : index
    %c0_176 = arith.constant 0 : index
    %153 = vector.load %arg4[%c8, %c0_175, %c0_176] : memref<16x64x128xbf16, #tpu.memory_space<vmem>>, vector<1x64x128xbf16>
    %154 = vector.shape_cast %153 : vector<1x64x128xbf16> to vector<64x128xbf16>
    %cst_177 = arith.constant dense<0.000000e+00> : vector<256x128xf32>
    %155 = tpu.matmul %152, %154, %cst_177 {dimension_numbers = #tpu.dot_dimension_numbers<[1], [0], [0], [1], [0, 0, 1, 1], [], []>} : vector<256x64xbf16>, vector<64x128xbf16>, vector<256x128xf32> -> vector<256x128xf32>
    %156 = arith.addf %150, %155 : vector<256x128xf32>
    %c0_178 = arith.constant 0 : index
    %c0_179 = arith.constant 0 : index
    %157 = vector.load %arg13[%c0_178, %c0_179] : memref<256x128xf32, #tpu.memory_space<vmem>>, vector<256x128xf32>
    tpu.vector_store %arg13[%c0_178, %c0_179], %156 {strides = array<i32>} : memref<256x128xf32, #tpu.memory_space<vmem>>, vector<256x128xf32>,
    %c1_180 = arith.constant 1 : index
    %c0_181 = arith.constant 0 : index
    %c1_182 = arith.constant 1 : index
    %c0_183 = arith.constant 0 : index
    %c0_184 = arith.constant 0 : index
    %158 = vector.load %arg12[%c1_180, %c0_181, %c1_182, %c0_183, %c0_184] : memref<2x2x17x17x64xf32, #tpu.memory_space<vmem>>, vector<1x1x16x16x64xf32>
    %159 = vector.shape_cast %158 : vector<1x1x16x16x64xf32> to vector<16x16x64xf32>
    %c0_185 = arith.constant 0 : index
    %c0_186 = arith.constant 0 : index
    %160 = vector.load %arg13[%c0_185, %c0_186] : memref<256x128xf32, #tpu.memory_space<vmem>>, vector<256x128xf32>
    %161 = vector.shape_cast %159 : vector<16x16x64xf32> to vector<256x64xf32>
    %162 = arith.truncf %161 : vector<256x64xf32> to vector<256x64xbf16>
    %c9 = arith.constant 9 : index
    %c0_187 = arith.constant 0 : index
    %c0_188 = arith.constant 0 : index
    %163 = vector.load %arg4[%c9, %c0_187, %c0_188] : memref<16x64x128xbf16, #tpu.memory_space<vmem>>, vector<1x64x128xbf16>
    %164 = vector.shape_cast %163 : vector<1x64x128xbf16> to vector<64x128xbf16>
    %cst_189 = arith.constant dense<0.000000e+00> : vector<256x128xf32>
    %165 = tpu.matmul %162, %164, %cst_189 {dimension_numbers = #tpu.dot_dimension_numbers<[1], [0], [0], [1], [0, 0, 1, 1], [], []>} : vector<256x64xbf16>, vector<64x128xbf16>, vector<256x128xf32> -> vector<256x128xf32>
    %166 = arith.addf %160, %165 : vector<256x128xf32>
    %c0_190 = arith.constant 0 : index
    %c0_191 = arith.constant 0 : index
    %167 = vector.load %arg13[%c0_190, %c0_191] : memref<256x128xf32, #tpu.memory_space<vmem>>, vector<256x128xf32>
    tpu.vector_store %arg13[%c0_190, %c0_191], %166 {strides = array<i32>} : memref<256x128xf32, #tpu.memory_space<vmem>>, vector<256x128xf32>,
    %c1_192 = arith.constant 1 : index
    %c1_193 = arith.constant 1 : index
    %c1_194 = arith.constant 1 : index
    %c1_195 = arith.constant 1 : index
    %c0_196 = arith.constant 0 : index
    %168 = vector.load %arg12[%c1_192, %c1_193, %c1_194, %c1_195, %c0_196] : memref<2x2x17x17x64xf32, #tpu.memory_space<vmem>>, vector<1x1x16x16x64xf32>
    %169 = vector.shape_cast %168 : vector<1x1x16x16x64xf32> to vector<16x16x64xf32>
    %c0_197 = arith.constant 0 : index
    %c0_198 = arith.constant 0 : index
    %170 = vector.load %arg13[%c0_197, %c0_198] : memref<256x128xf32, #tpu.memory_space<vmem>>, vector<256x128xf32>
    %171 = vector.shape_cast %169 : vector<16x16x64xf32> to vector<256x64xf32>
    %172 = arith.truncf %171 : vector<256x64xf32> to vector<256x64xbf16>
    %c10 = arith.constant 10 : index
    %c0_199 = arith.constant 0 : index
    %c0_200 = arith.constant 0 : index
    %173 = vector.load %arg4[%c10, %c0_199, %c0_200] : memref<16x64x128xbf16, #tpu.memory_space<vmem>>, vector<1x64x128xbf16>
    %174 = vector.shape_cast %173 : vector<1x64x128xbf16> to vector<64x128xbf16>
    %cst_201 = arith.constant dense<0.000000e+00> : vector<256x128xf32>
    %175 = tpu.matmul %172, %174, %cst_201 {dimension_numbers = #tpu.dot_dimension_numbers<[1], [0], [0], [1], [0, 0, 1, 1], [], []>} : vector<256x64xbf16>, vector<64x128xbf16>, vector<256x128xf32> -> vector<256x128xf32>
    %176 = arith.addf %170, %175 : vector<256x128xf32>
    %c0_202 = arith.constant 0 : index
    %c0_203 = arith.constant 0 : index
    %177 = vector.load %arg13[%c0_202, %c0_203] : memref<256x128xf32, #tpu.memory_space<vmem>>, vector<256x128xf32>
    tpu.vector_store %arg13[%c0_202, %c0_203], %176 {strides = array<i32>} : memref<256x128xf32, #tpu.memory_space<vmem>>, vector<256x128xf32>,
    %c1_204 = arith.constant 1 : index
    %c0_205 = arith.constant 0 : index
    %c1_206 = arith.constant 1 : index
    %c1_207 = arith.constant 1 : index
    %c0_208 = arith.constant 0 : index
    %178 = vector.load %arg12[%c1_204, %c0_205, %c1_206, %c1_207, %c0_208] : memref<2x2x17x17x64xf32, #tpu.memory_space<vmem>>, vector<1x1x16x16x64xf32>
    %179 = vector.shape_cast %178 : vector<1x1x16x16x64xf32> to vector<16x16x64xf32>
    %c0_209 = arith.constant 0 : index
    %c0_210 = arith.constant 0 : index
    %180 = vector.load %arg13[%c0_209, %c0_210] : memref<256x128xf32, #tpu.memory_space<vmem>>, vector<256x128xf32>
    %181 = vector.shape_cast %179 : vector<16x16x64xf32> to vector<256x64xf32>
    %182 = arith.truncf %181 : vector<256x64xf32> to vector<256x64xbf16>
    %c11 = arith.constant 11 : index
    %c0_211 = arith.constant 0 : index
    %c0_212 = arith.constant 0 : index
    %183 = vector.load %arg4[%c11, %c0_211, %c0_212] : memref<16x64x128xbf16, #tpu.memory_space<vmem>>, vector<1x64x128xbf16>
    %184 = vector.shape_cast %183 : vector<1x64x128xbf16> to vector<64x128xbf16>
    %cst_213 = arith.constant dense<0.000000e+00> : vector<256x128xf32>
    %185 = tpu.matmul %182, %184, %cst_213 {dimension_numbers = #tpu.dot_dimension_numbers<[1], [0], [0], [1], [0, 0, 1, 1], [], []>} : vector<256x64xbf16>, vector<64x128xbf16>, vector<256x128xf32> -> vector<256x128xf32>
    %186 = arith.addf %180, %185 : vector<256x128xf32>
    %c0_214 = arith.constant 0 : index
    %c0_215 = arith.constant 0 : index
    %187 = vector.load %arg13[%c0_214, %c0_215] : memref<256x128xf32, #tpu.memory_space<vmem>>, vector<256x128xf32>
    tpu.vector_store %arg13[%c0_214, %c0_215], %186 {strides = array<i32>} : memref<256x128xf32, #tpu.memory_space<vmem>>, vector<256x128xf32>,
    %c0_216 = arith.constant 0 : index
    %c1_217 = arith.constant 1 : index
    %c1_218 = arith.constant 1 : index
    %c0_219 = arith.constant 0 : index
    %c0_220 = arith.constant 0 : index
    %188 = vector.load %arg12[%c0_216, %c1_217, %c1_218, %c0_219, %c0_220] : memref<2x2x17x17x64xf32, #tpu.memory_space<vmem>>, vector<1x1x16x16x64xf32>
    %189 = vector.shape_cast %188 : vector<1x1x16x16x64xf32> to vector<16x16x64xf32>
    %c0_221 = arith.constant 0 : index
    %c0_222 = arith.constant 0 : index
    %190 = vector.load %arg13[%c0_221, %c0_222] : memref<256x128xf32, #tpu.memory_space<vmem>>, vector<256x128xf32>
    %191 = vector.shape_cast %189 : vector<16x16x64xf32> to vector<256x64xf32>
    %192 = arith.truncf %191 : vector<256x64xf32> to vector<256x64xbf16>
    %c12 = arith.constant 12 : index
    %c0_223 = arith.constant 0 : index
    %c0_224 = arith.constant 0 : index
    %193 = vector.load %arg4[%c12, %c0_223, %c0_224] : memref<16x64x128xbf16, #tpu.memory_space<vmem>>, vector<1x64x128xbf16>
    %194 = vector.shape_cast %193 : vector<1x64x128xbf16> to vector<64x128xbf16>
    %cst_225 = arith.constant dense<0.000000e+00> : vector<256x128xf32>
    %195 = tpu.matmul %192, %194, %cst_225 {dimension_numbers = #tpu.dot_dimension_numbers<[1], [0], [0], [1], [0, 0, 1, 1], [], []>} : vector<256x64xbf16>, vector<64x128xbf16>, vector<256x128xf32> -> vector<256x128xf32>
    %196 = arith.addf %190, %195 : vector<256x128xf32>
    %c0_226 = arith.constant 0 : index
    %c0_227 = arith.constant 0 : index
    %197 = vector.load %arg13[%c0_226, %c0_227] : memref<256x128xf32, #tpu.memory_space<vmem>>, vector<256x128xf32>
    tpu.vector_store %arg13[%c0_226, %c0_227], %196 {strides = array<i32>} : memref<256x128xf32, #tpu.memory_space<vmem>>, vector<256x128xf32>,
    %c0_228 = arith.constant 0 : index
    %c0_229 = arith.constant 0 : index
    %c1_230 = arith.constant 1 : index
    %c0_231 = arith.constant 0 : index
    %c0_232 = arith.constant 0 : index
    %198 = vector.load %arg12[%c0_228, %c0_229, %c1_230, %c0_231, %c0_232] : memref<2x2x17x17x64xf32, #tpu.memory_space<vmem>>, vector<1x1x16x16x64xf32>
    %199 = vector.shape_cast %198 : vector<1x1x16x16x64xf32> to vector<16x16x64xf32>
    %c0_233 = arith.constant 0 : index
    %c0_234 = arith.constant 0 : index
    %200 = vector.load %arg13[%c0_233, %c0_234] : memref<256x128xf32, #tpu.memory_space<vmem>>, vector<256x128xf32>
    %201 = vector.shape_cast %199 : vector<16x16x64xf32> to vector<256x64xf32>
    %202 = arith.truncf %201 : vector<256x64xf32> to vector<256x64xbf16>
    %c13 = arith.constant 13 : index
    %c0_235 = arith.constant 0 : index
    %c0_236 = arith.constant 0 : index
    %203 = vector.load %arg4[%c13, %c0_235, %c0_236] : memref<16x64x128xbf16, #tpu.memory_space<vmem>>, vector<1x64x128xbf16>
    %204 = vector.shape_cast %203 : vector<1x64x128xbf16> to vector<64x128xbf16>
    %cst_237 = arith.constant dense<0.000000e+00> : vector<256x128xf32>
    %205 = tpu.matmul %202, %204, %cst_237 {dimension_numbers = #tpu.dot_dimension_numbers<[1], [0], [0], [1], [0, 0, 1, 1], [], []>} : vector<256x64xbf16>, vector<64x128xbf16>, vector<256x128xf32> -> vector<256x128xf32>
    %206 = arith.addf %200, %205 : vector<256x128xf32>
    %c0_238 = arith.constant 0 : index
    %c0_239 = arith.constant 0 : index
    %207 = vector.load %arg13[%c0_238, %c0_239] : memref<256x128xf32, #tpu.memory_space<vmem>>, vector<256x128xf32>
    tpu.vector_store %arg13[%c0_238, %c0_239], %206 {strides = array<i32>} : memref<256x128xf32, #tpu.memory_space<vmem>>, vector<256x128xf32>,
    %c0_240 = arith.constant 0 : index
    %c1_241 = arith.constant 1 : index
    %c1_242 = arith.constant 1 : index
    %c1_243 = arith.constant 1 : index
    %c0_244 = arith.constant 0 : index
    %208 = vector.load %arg12[%c0_240, %c1_241, %c1_242, %c1_243, %c0_244] : memref<2x2x17x17x64xf32, #tpu.memory_space<vmem>>, vector<1x1x16x16x64xf32>
    %209 = vector.shape_cast %208 : vector<1x1x16x16x64xf32> to vector<16x16x64xf32>
    %c0_245 = arith.constant 0 : index
    %c0_246 = arith.constant 0 : index
    %210 = vector.load %arg13[%c0_245, %c0_246] : memref<256x128xf32, #tpu.memory_space<vmem>>, vector<256x128xf32>
    %211 = vector.shape_cast %209 : vector<16x16x64xf32> to vector<256x64xf32>
    %212 = arith.truncf %211 : vector<256x64xf32> to vector<256x64xbf16>
    %c14 = arith.constant 14 : index
    %c0_247 = arith.constant 0 : index
    %c0_248 = arith.constant 0 : index
    %213 = vector.load %arg4[%c14, %c0_247, %c0_248] : memref<16x64x128xbf16, #tpu.memory_space<vmem>>, vector<1x64x128xbf16>
    %214 = vector.shape_cast %213 : vector<1x64x128xbf16> to vector<64x128xbf16>
    %cst_249 = arith.constant dense<0.000000e+00> : vector<256x128xf32>
    %215 = tpu.matmul %212, %214, %cst_249 {dimension_numbers = #tpu.dot_dimension_numbers<[1], [0], [0], [1], [0, 0, 1, 1], [], []>} : vector<256x64xbf16>, vector<64x128xbf16>, vector<256x128xf32> -> vector<256x128xf32>
    %216 = arith.addf %210, %215 : vector<256x128xf32>
    %c0_250 = arith.constant 0 : index
    %c0_251 = arith.constant 0 : index
    %217 = vector.load %arg13[%c0_250, %c0_251] : memref<256x128xf32, #tpu.memory_space<vmem>>, vector<256x128xf32>
    tpu.vector_store %arg13[%c0_250, %c0_251], %216 {strides = array<i32>} : memref<256x128xf32, #tpu.memory_space<vmem>>, vector<256x128xf32>,
    %c0_252 = arith.constant 0 : index
    %c0_253 = arith.constant 0 : index
    %c1_254 = arith.constant 1 : index
    %c1_255 = arith.constant 1 : index
    %c0_256 = arith.constant 0 : index
    %218 = vector.load %arg12[%c0_252, %c0_253, %c1_254, %c1_255, %c0_256] : memref<2x2x17x17x64xf32, #tpu.memory_space<vmem>>, vector<1x1x16x16x64xf32>
    %219 = vector.shape_cast %218 : vector<1x1x16x16x64xf32> to vector<16x16x64xf32>
    %c0_257 = arith.constant 0 : index
    %c0_258 = arith.constant 0 : index
    %220 = vector.load %arg13[%c0_257, %c0_258] : memref<256x128xf32, #tpu.memory_space<vmem>>, vector<256x128xf32>
    %221 = vector.shape_cast %219 : vector<16x16x64xf32> to vector<256x64xf32>
    %222 = arith.truncf %221 : vector<256x64xf32> to vector<256x64xbf16>
    %c15 = arith.constant 15 : index
    %c0_259 = arith.constant 0 : index
    %c0_260 = arith.constant 0 : index
    %223 = vector.load %arg4[%c15, %c0_259, %c0_260] : memref<16x64x128xbf16, #tpu.memory_space<vmem>>, vector<1x64x128xbf16>
    %224 = vector.shape_cast %223 : vector<1x64x128xbf16> to vector<64x128xbf16>
    %cst_261 = arith.constant dense<0.000000e+00> : vector<256x128xf32>
    %225 = tpu.matmul %222, %224, %cst_261 {dimension_numbers = #tpu.dot_dimension_numbers<[1], [0], [0], [1], [0, 0, 1, 1], [], []>} : vector<256x64xbf16>, vector<64x128xbf16>, vector<256x128xf32> -> vector<256x128xf32>
    %226 = arith.addf %220, %225 : vector<256x128xf32>
    %c0_262 = arith.constant 0 : index
    %c0_263 = arith.constant 0 : index
    %227 = vector.load %arg13[%c0_262, %c0_263] : memref<256x128xf32, #tpu.memory_space<vmem>>, vector<256x128xf32>
    tpu.vector_store %arg13[%c0_262, %c0_263], %226 {strides = array<i32>} : memref<256x128xf32, #tpu.memory_space<vmem>>, vector<256x128xf32>,
    %c0_264 = arith.constant 0 : index
    %c0_265 = arith.constant 0 : index
    %228 = vector.load %arg13[%c0_264, %c0_265] : memref<256x128xf32, #tpu.memory_space<vmem>>, vector<256x128xf32>
    %c0_266 = arith.constant 0 : index
    %c0_267 = arith.constant 0 : index
    %229 = vector.load %arg5[%c0_266, %c0_267] : memref<1x128xf32, #tpu.memory_space<vmem>>, vector<1x128xf32>
    %230 = vector.broadcast %229 : vector<1x128xf32> to vector<256x128xf32>
    %231 = arith.addf %228, %230 : vector<256x128xf32>
    %cst_268 = arith.constant 0.000000e+00 : f32
    %232 = vector.broadcast %cst_268 : f32 to vector<256x128xf32>
    %233 = arith.cmpf oge, %231, %232 : vector<256x128xf32>
    %cst_269 = arith.constant 2.000000e-01 : f32
    %234 = vector.broadcast %cst_269 : f32 to vector<256x128xf32>
    %235 = arith.mulf %234, %231 : vector<256x128xf32>
    %236 = arith.select %233, %231, %235 : vector<256x128xi1>, vector<256x128xf32>
    %c0_270 = arith.constant 0 : index
    %c0_271 = arith.constant 0 : index
    %237 = vector.load %arg6[%c0_270, %c0_271] : memref<1x128xf32, #tpu.memory_space<vmem>>, vector<1x128xf32>
    %238 = vector.broadcast %237 : vector<1x128xf32> to vector<256x128xf32>
    %239 = arith.mulf %236, %238 : vector<256x128xf32>
    %cst_272 = arith.constant dense<0.000000e+00> : vector<256xf32>
    %240 = vector.multi_reduction <add>, %239, %cst_272 [1] : vector<256x128xf32> to vector<256xf32>
    %241 = vector.shape_cast %240 : vector<256xf32> to vector<256x1xf32>
    %c0_273 = arith.constant 0 : index
    %c0_274 = arith.constant 0 : index
    %242 = vector.load %arg7[%c0_273, %c0_274] : memref<256x16xf32, #tpu.memory_space<vmem>>, vector<256x16xf32>
    %243 = vector.broadcast %241 : vector<256x1xf32> to vector<256x16xf32>
    %244 = arith.mulf %243, %242 : vector<256x16xf32>
    %c0_275 = arith.constant 0 : index
    %c0_276 = arith.constant 0 : index
    %245 = vector.load %arg8[%c0_275, %c0_276] : memref<30x256xf32, #tpu.memory_space<vmem>>, vector<30x256xf32>
    %cst_277 = arith.constant dense<0.000000e+00> : vector<30x16xf32>
    %246 = tpu.matmul %245, %244, %cst_277 {dimension_numbers = #tpu.dot_dimension_numbers<[1], [0], [0], [1], [0, 0, 1, 1], [], []>} : vector<30x256xf32>, vector<256x16xf32>, vector<30x16xf32> -> vector<30x16xf32>
    %c0_278 = arith.constant 0 : index
    %c0_279 = arith.constant 0 : index
    %247 = vector.load %arg9[%c0_278, %c0_279] : memref<16x30xf32, #tpu.memory_space<vmem>>, vector<16x30xf32>
    %cst_280 = arith.constant dense<0.000000e+00> : vector<30x30xf32>
    %248 = tpu.matmul %246, %247, %cst_280 {dimension_numbers = #tpu.dot_dimension_numbers<[1], [0], [0], [1], [0, 0, 1, 1], [], []>} : vector<30x16xf32>, vector<16x30xf32>, vector<30x30xf32> -> vector<30x30xf32>
    %c0_281 = arith.constant 0 : index
    %c0_282 = arith.constant 0 : index
    %249 = vector.load %arg10[%c0_281, %c0_282] : memref<1x1xf32, #tpu.memory_space<vmem>>, vector<1x1xf32>
    %250 = vector.broadcast %249 : vector<1x1xf32> to vector<30x30xf32>
    %251 = arith.addf %248, %250 : vector<30x30xf32>
    %c0_283 = arith.constant 0 : index
    %c0_284 = arith.constant 0 : index
    %c0_285 = arith.constant 0 : index
    %252 = vector.load %arg11[%c0_283, %c0_284, %c0_285] : memref<1x30x30xf32, #tpu.memory_space<vmem>>, vector<1x30x30xf32>
    %253 = vector.shape_cast %252 : vector<1x30x30xf32> to vector<30x30xf32>
    %254 = vector.shape_cast %251 : vector<30x30xf32> to vector<1x30x30xf32>
    tpu.vector_store %arg11[%c0_283, %c0_284, %c0_285], %254 {strides = array<i32>} : memref<1x30x30xf32, #tpu.memory_space<vmem>>, vector<1x30x30xf32>,
    return
  }
  func.func @transform_0(%arg0: i32) -> (i32, i32, i32, i32) {
    %c0_i32 = arith.constant 0 : i32
    %c0_i32_0 = arith.constant 0 : i32
    %c0_i32_1 = arith.constant 0 : i32
    %c0_i32_2 = arith.constant 0 : i32
    return %arg0, %c0_i32, %c0_i32_0, %c0_i32_1 : i32, i32, i32, i32
  }
  func.func @transform_1(%arg0: i32) -> (i32, i32) {
    %c0_i32 = arith.constant 0 : i32
    %c0_i32_0 = arith.constant 0 : i32
    %c0_i32_1 = arith.constant 0 : i32
    return %c0_i32, %c0_i32_0 : i32, i32
  }
  func.func @transform_2(%arg0: i32) -> (i32, i32) {
    %c0_i32 = arith.constant 0 : i32
    %c0_i32_0 = arith.constant 0 : i32
    %c0_i32_1 = arith.constant 0 : i32
    return %c0_i32, %c0_i32_0 : i32, i32
  }
  func.func @transform_3(%arg0: i32) -> (i32, i32, i32) {
    %c0_i32 = arith.constant 0 : i32
    %c0_i32_0 = arith.constant 0 : i32
    %c0_i32_1 = arith.constant 0 : i32
    %c0_i32_2 = arith.constant 0 : i32
    return %c0_i32, %c0_i32_0, %c0_i32_1 : i32, i32, i32
  }
  func.func @transform_4(%arg0: i32) -> (i32, i32) {
    %c0_i32 = arith.constant 0 : i32
    %c0_i32_0 = arith.constant 0 : i32
    %c0_i32_1 = arith.constant 0 : i32
    return %c0_i32, %c0_i32_0 : i32, i32
  }
  func.func @transform_5(%arg0: i32) -> (i32, i32) {
    %c0_i32 = arith.constant 0 : i32
    %c0_i32_0 = arith.constant 0 : i32
    %c0_i32_1 = arith.constant 0 : i32
    return %c0_i32, %c0_i32_0 : i32, i32
  }
  func.func @transform_6(%arg0: i32) -> (i32, i32) {
    %c0_i32 = arith.constant 0 : i32
    %c0_i32_0 = arith.constant 0 : i32
    %c0_i32_1 = arith.constant 0 : i32
    return %c0_i32, %c0_i32_0 : i32, i32
  }
  func.func @transform_7(%arg0: i32) -> (i32, i32) {
    %c0_i32 = arith.constant 0 : i32
    %c0_i32_0 = arith.constant 0 : i32
    %c0_i32_1 = arith.constant 0 : i32
    return %c0_i32, %c0_i32_0 : i32, i32
  }
  func.func @transform_8(%arg0: i32) -> (i32, i32) {
    %c0_i32 = arith.constant 0 : i32
    %c0_i32_0 = arith.constant 0 : i32
    %c0_i32_1 = arith.constant 0 : i32
    return %c0_i32, %c0_i32_0 : i32, i32
  }
  func.func @transform_9(%arg0: i32) -> (i32, i32) {
    %c0_i32 = arith.constant 0 : i32
    %c0_i32_0 = arith.constant 0 : i32
    %c0_i32_1 = arith.constant 0 : i32
    return %c0_i32, %c0_i32_0 : i32, i32
  }
  func.func @transform_10(%arg0: i32) -> (i32, i32, i32) {
    %c0_i32 = arith.constant 0 : i32
    %c0_i32_0 = arith.constant 0 : i32
    %c0_i32_1 = arith.constant 0 : i32
    return %arg0, %c0_i32, %c0_i32_0 : i32, i32, i32
  }
}

</mosaic_0001>

<bundles_post_ra>
// kernel: discriminator_forward.1
= control target key start
LH: loop header
LB: loop body
LE: loop exit
PB: predicated region body
PF: predicated region fallthrough
CT: control target
= control target key end

     0   :  { %s11995_s15 = smov 0   ;;  %s13702_s0 = inlined_call_operand.vmem [shape: bf16[2,4,256,48], index: 0, kind: input, shape index: {}]   ;;  %s13703_s1 = inlined_call_operand.vmem [shape: bf16[48,64], index: 1, kind: input, shape index: {}]   ;;  %s13704_s2 = inlined_call_operand.vmem [shape: f32[1,64], index: 2, kind: input, shape index: {}]   ;;  %s13705_s3 = inlined_call_operand.vmem [shape: bf16[16,64,128], index: 3, kind: input, shape index: {}]   ;;  %s13706_s4 = inlined_call_operand.vmem [shape: f32[1,128], index: 4, kind: input, shape index: {}]   ;;  %s13707_s5 = inlined_call_operand.vmem [shape: f32[1,128], index: 5, kind: input, shape index: {}]   ;;  %s13708_s6 = inlined_call_operand.vmem [shape: f32[256,16], index: 6, kind: input, shape index: {}]   ;;  %s13709_s7 = inlined_call_operand.vmem [shape: f32[30,256], index: 7, kind: input, shape index: {}]   ;;  %s13710_s8 = inlined_call_operand.vmem [shape: f32[16,30], index: 8, kind: input, shape index: {}]   ;;  %s13711_s9 = inlined_call_operand.<no memory space> [shape: f32[1,1], index: 9, kind: input, shape index: {}]   ;;  %s13712_s10 = inlined_call_operand.vmem [shape: f32[2,30,30], index: 10, kind: output, shape index: {}]  }
   0x1   :  { %v15_v0 = vstv %s13711_s9 }
   0x2   :  { %16 = vst [vmem:[#allocation4] sm:$0x1] %v15_v0 }
   0x3 LB: > { %s9305_s16 = sadd.s32 4294967295, %s11933_s15   ;;  %p9309_p0 = scmp.ge.s32.totalorder %s11933_s15, 1  ;;  %s11933_s15 = sphi %s11995_s15, %s22_s15  }
   0x4   : > { %p314_p1 = scmp.lt.s32.totalorder %s11933_s15, 3 }
   0x6   : > { %p315_p2 = pnand %p9309_p0, %p314_p1 }
   0x7   : > { %v11786_v1 = vld [vmem:[%s13703_s1] sm:$0xff] (!%p315_p2)   ;;  %p352_p3 = scmp.lt.s32.totalorder (!%p315_p2), %s9305_s16, 1  ;;  %v11787_v2 = vld [vmem:[%s13703_s1 + $0x8] sm:$0xff] (!%p315_p2)   ;;  %v11788_v3 = vld [vmem:[%s13703_s1 + $0x10] sm:$0xff] (!%p315_p2)   ;;  %vm712_vm0 = vcmask (!%p315_p2), 392192   ;;  %vm363_vm1 = vcmask (!%p315_p2), 523264  }
   0x8   : > { %318 = sbr.rel (%p315_p2) target bundleno = 1776 (0x6f0), region = 60  ;;  %10451 = vmatprep.subr.bf16.mxu1 (!%p315_p2), %v11786_v1  ;;  %v11797_v5 = vld [vmem:[%s13703_s1] sm:$0xff] (!%p315_p2)   ;;  %v11804_v8 = vld [vmem:[%s13703_s1 + $0x8] sm:$0xff] (!%p315_p2)   ;;  %v11807_v9 = vld [vmem:[%s13703_s1 + $0x10] sm:$0xff] (!%p315_p2)   ;;  %v11935_v34 = vmov (!%p315_p2), 0.0   ;;  %vm366_vm2 = vcmask (!%p315_p2), 516096  }
   0x9   : > { %10452 = vmatpush3.bf16.msra.mxu1 (!%p315_p2), %v11786_v1  ;;  %v11820_v15 = vld [vmem:[%s13703_s1] sm:$0xff] (!%p315_p2)   ;;  %v11825_v17 = vld [vmem:[%s13703_s1 + $0x8] sm:$0xff] (!%p315_p2)   ;;  %v11826_v18 = vld [vmem:[%s13703_s1 + $0x10] sm:$0xff] (!%p315_p2)   ;;  %368 = vst.msk [vmem:[#allocation2 + $0x18] sm:$0xff] (!%p315_p2), %vm363_vm1, %v11935_v34 }
   0xa   : > { %10453 = vmatprep.subr.bf16.mxu1 (!%p315_p2), %v11787_v2  ;;  %10527 = vmatprep.subr.bf16.mxu0 (!%p315_p2), %v11820_v15  ;;  %v12081_v31 = vld [vmem:[%s13703_s1] sm:$0xff] (!%p315_p2)   ;;  %364 = vst.msk [vmem:[#allocation2] sm:$0xff] (!%p315_p2), %vm363_vm1, %v11935_v34  ;;  %365 = vst.msk [vmem:[#allocation2 + $0x8] sm:$0xff] (!%p315_p2), %vm363_vm1, %v11935_v34  ;;  %v11840_v51 = vld [vmem:[%s13703_s1 + $0x8] sm:$0xff] (!%p315_p2)  }
   0xb   : > { %10528 = vmatpush3.bf16.msra.mxu0 (!%p315_p2), %v11820_v15  ;;  %369 = vst.msk [vmem:[#allocation2 + $0x20] sm:$0xff] (!%p315_p2), %vm363_vm1, %v11935_v34  ;;  %371 = vst.msk [vmem:[#allocation2 + $0x30] sm:$0xff] (!%p315_p2), %vm363_vm1, %v11935_v34  ;;  %v11841_v52 = vld [vmem:[%s13703_s1 + $0x10] sm:$0xff] (!%p315_p2)   ;;  %v11862_v59 = vld [vmem:[%s13705_s3 + $0xc0] sm:$0xff] (!%p315_p2)  }
   0xc   : > { %10529 = vmatprep.subr.bf16.mxu0 (!%p315_p2), %v11825_v17  ;;  %372 = vst.msk [vmem:[#allocation2 + $0x38] sm:$0xff] (!%p315_p2), %vm363_vm1, %v11935_v34  ;;  %374 = vst.msk [vmem:[#allocation2 + $0x48] sm:$0xff] (!%p315_p2), %vm363_vm1, %v11935_v34  ;;  %v11863_v60 = vld [vmem:[%s13705_s3 + $0xc8] sm:$0xff] (!%p315_p2)   ;;  %v11864_v63 = vld [vmem:[%s13705_s3 + $0xd0] sm:$0xff] (!%p315_p2)  }
   0xd   : > { %10454 = vmatpush3.bf16.msra.mxu1 (!%p315_p2), %v11787_v2  ;;  %375 = vst.msk [vmem:[#allocation2 + $0x50] sm:$0xff] (!%p315_p2), %vm363_vm1, %v11935_v34  ;;  %377 = vst.msk [vmem:[#allocation2 + $0x60] sm:$0xff] (!%p315_p2), %vm363_vm1, %v11935_v34  ;;  %v11865_v0 = vld [vmem:[%s13705_s3 + $0xd8] sm:$0xff] (!%p315_p2)  }
   0xe   : > { %10455 = vmatprep.subr.bf16.mxu1 (!%p315_p2), %v11788_v3  ;;  %378 = vst.msk [vmem:[#allocation2 + $0x68] sm:$0xff] (!%p315_p2), %vm363_vm1, %v11935_v34  ;;  %380 = vst.msk [vmem:[#allocation2 + $0x78] sm:$0xff] (!%p315_p2), %vm363_vm1, %v11935_v34 }
   0xf   : > { %s13714_s16 = smov (!%p352_p3, %s9305_s16), 1  ;;  %10530 = vmatpush3.bf16.msra.mxu0 %v11825_v17  ;;  %381 = vst.msk [vmem:[#allocation2 + $0x80] sm:$0xff] %vm363_vm1, %v11935_v34  ;;  %383 = vst.msk [vmem:[#allocation2 + $0x90] sm:$0xff] %vm363_vm1, %v11935_v34 }
  0x10   : > { %s10003_s22 = sshll.u32 %s13714_s16, 9  ;;  %10531 = vmatprep.subr.bf16.mxu0 %v11826_v18  ;;  %384 = vst.msk [vmem:[#allocation2 + $0x98] sm:$0xff] %vm363_vm1, %v11935_v34  ;;  %386 = vst.msk [vmem:[#allocation2 + $0xa8] sm:$0xff] %vm363_vm1, %v11935_v34  ;;  %s10004_s19 = sshll.u32 %s13714_s16, 5 }
  0x11   : > { %s12018_s25 = scalar_lea.vmem %s13702_s0, %s10003_s22  ;;  %10456 = vmatpush3.bf16.msra.mxu1 %v11788_v3  ;;  %387 = vst.msk [vmem:[#allocation2 + $0xb0] sm:$0xff] %vm363_vm1, %v11935_v34  ;;  %389 = vst.msk [vmem:[#allocation2 + $0xc0] sm:$0xff] %vm363_vm1, %v11935_v34  ;;  %s361_s22 = scalar_lea.vmem %s13712_s10, %s10004_s19 }
  0x12   : > { %v11789_v4 = vld [vmem:[%s12018_s25] sm:$0xff]   ;;  %v11790_v6 = vld [vmem:[%s12018_s25 + $0x8] sm:$0xff]   ;;  %v11791_v7 = vld [vmem:[%s12018_s25 + $0x10] sm:$0xff]   ;;  %10489 = vmatprep.subr.bf16.mxu1 %v11797_v5  ;;  %390 = vst.msk [vmem:[#allocation2 + $0xc8] sm:$0xff] %vm363_vm1, %v11935_v34 }
  0x13   : > { %10457 = vmatprep.mubr.msk.bf16.mxu1 %vm712_vm0, %v11789_v4  ;;  %v11792_v10 = vld [vmem:[%s12018_s25 + $0x18] sm:$0xff]   ;;  %v11793_v11 = vld [vmem:[%s12018_s25 + $0x20] sm:$0xff]   ;;  %v11794_v12 = vld [vmem:[%s12018_s25 + $0x28] sm:$0xff]   ;;  %10532 = vmatpush3.bf16.msra.mxu0 %v11826_v18  ;;  %392 = vst.msk [vmem:[#allocation2 + $0xd8] sm:$0xff] %vm363_vm1, %v11935_v34 }
  0x14   : > { %10458 = vmatmul.mubr.msk.bf16.vlgmr.msra.gmra.mrb[0].mxu1 %vm712_vm0, %v11790_v6  ;;  %v11795_v13 = vld [vmem:[%s12018_s25 + $0x30] sm:$0xff]   ;;  %v11796_v14 = vld [vmem:[%s12018_s25 + $0x38] sm:$0xff]   ;;  %v11798_v16 = vld [vmem:[%s12018_s25 + $0x40] sm:$0xff]   ;;  %393 = vst.msk [vmem:[#allocation2 + $0xe0] sm:$0xff] %vm363_vm1, %v11935_v34  ;;  %10843 = vmatprep.subr.bf16.mxu0 %v11862_v59 }
  0x15   : > { %10461 = vmatprep.mubr.msk.bf16.mxu1 %vm712_vm0, %v11791_v7  ;;  %10490 = vmatpush3.bf16.msra.mxu1 %v11797_v5  ;;  %v11799_v19 = vld [vmem:[%s12018_s25 + $0x48] sm:$0xff]   ;;  %v11800_v20 = vld [vmem:[%s12018_s25 + $0x50] sm:$0xff]   ;;  %v11801_v21 = vld [vmem:[%s12018_s25 + $0x58] sm:$0xff]   ;;  %395 = vst.msk [vmem:[#allocation2 + $0xf0] sm:$0xff] %vm363_vm1, %v11935_v34 }
  0x16   : > { %10491 = vmatprep.subr.bf16.mxu1 %v11804_v8  ;;  %v11802_v22 = vld [vmem:[%s12018_s25 + $0x60] sm:$0xff]   ;;  %v11803_v23 = vld [vmem:[%s12018_s25 + $0x68] sm:$0xff]   ;;  %v11805_v24 = vld [vmem:[%s12018_s25 + $0x70] sm:$0xff]   ;;  %396 = vst.msk [vmem:[#allocation2 + $0xf8] sm:$0xff] %vm363_vm1, %v11935_v34 }
  0x17   : > { %v11806_v25 = vld [vmem:[%s12018_s25 + $0x78] sm:$0xff]   ;;  %v11808_v26 = vld [vmem:[%s12018_s25 + $0x80] sm:$0xff]   ;;  %v11809_v27 = vld [vmem:[%s12018_s25 + $0x88] sm:$0xff]   ;;  %398 = vst.msk [vmem:[#allocation2 + $0x108] sm:$0xff] %vm363_vm1, %v11935_v34 }
  0x18   : > { %v11810_v28 = vld [vmem:[%s12018_s25 + $0x90] sm:$0xff]   ;;  %v11811_v29 = vld [vmem:[%s12018_s25 + $0x98] sm:$0xff]   ;;  %v11812_v30 = vld [vmem:[%s12018_s25 + $0xa0] sm:$0xff]   ;;  %399 = vst.msk [vmem:[#allocation2 + $0x110] sm:$0xff] %vm363_vm1, %v11935_v34 }
  0x19   : > { %10492 = vmatpush3.bf16.msra.mxu1 %v11804_v8  ;;  %v11813_v32 = vld [vmem:[%s12018_s25 + $0xa8] sm:$0xff]   ;;  %v11814_v33 = vld [vmem:[%s12018_s25 + $0xb0] sm:$0xff]   ;;  %401 = vst.msk [vmem:[#allocation2 + $0x120] sm:$0xff] %vm363_vm1, %v11935_v34  ;;  %402 = vst.msk [vmem:[#allocation2 + $0x128] sm:$0xff] %vm363_vm1, %v11935_v34 }
  0x1a   : > { %10493 = vmatprep.subr.bf16.mxu1 %v11807_v9  ;;  %404 = vst.msk [vmem:[#allocation2 + $0x138] sm:$0xff] %vm363_vm1, %v11935_v34  ;;  %405 = vst.msk [vmem:[#allocation2 + $0x140] sm:$0xff] %vm363_vm1, %v11935_v34  ;;  %v11815_v35 = vld [vmem:[%s12018_s25 + $0xb8] sm:$0xff]   ;;  %v11816_v36 = vld [vmem:[%s12018_s25 + $0xc0] sm:$0xff]  }
  0x1b   : > { %407 = vst.msk [vmem:[#allocation2 + $0x150] sm:$0xff] %vm363_vm1, %v11935_v34  ;;  %408 = vst.msk [vmem:[#allocation2 + $0x158] sm:$0xff] %vm363_vm1, %v11935_v34  ;;  %v12367_v37 = vld [vmem:[%s12018_s25 + $0xc8] sm:$0xff]   ;;  %v11818_v38 = vld [vmem:[%s12018_s25 + $0xd0] sm:$0xff]  }
  0x1c   : > { %10462 = vmatmul.mubr.msk.bf16.gmra.mrb[4].mxu1 %vm712_vm0, %v11792_v10  ;;  %410 = vst.msk [vmem:[#allocation2 + $0x168] sm:$0xff] %vm363_vm1, %v11935_v34  ;;  %411 = vst.msk [vmem:[#allocation2 + $0x170] sm:$0xff] %vm363_vm1, %v11935_v34  ;;  %v11819_v39 = vld [vmem:[%s12018_s25 + $0xd8] sm:$0xff]   ;;  %v11821_v40 = vld [vmem:[%s12018_s25 + $0xe0] sm:$0xff]  }
  0x1d   : > { %10465 = vmatprep.mubr.msk.bf16.mxu1 %vm712_vm0, %v11793_v11  ;;  %10494 = vmatpush3.bf16.msra.mxu1 %v11807_v9  ;;  %413 = vst.msk [vmem:[#allocation2 + $0x180] sm:$0xff] %vm363_vm1, %v11935_v34  ;;  %414 = vst.msk [vmem:[#allocation2 + $0x188] sm:$0xff] %vm363_vm1, %v11935_v34  ;;  %v11822_v41 = vld [vmem:[%s12018_s25 + $0xe8] sm:$0xff]   ;;  %v11823_v42 = vld [vmem:[%s12018_s25 + $0xf0] sm:$0xff]  }
  0x1e   : > { %11289 = vmatprep.subr.bf16.mxu1 %v11820_v15  ;;  %416 = vst.msk [vmem:[#allocation2 + $0x198] sm:$0xff] %vm363_vm1, %v11935_v34  ;;  %417 = vst.msk [vmem:[#allocation2 + $0x1a0] sm:$0xff] %vm363_vm1, %v11935_v34  ;;  %v11858_v43 = vld [vmem:[%s12018_s25 + $0x100] sm:$0xff]   ;;  %v11859_v44 = vld [vmem:[%s12018_s25 + $0x108] sm:$0xff]  }
  0x1f   : > { %419 = vst.msk [vmem:[#allocation2 + $0x1b0] sm:$0xff] %vm363_vm1, %v11935_v34  ;;  %420 = vst.msk [vmem:[#allocation2 + $0x1b8] sm:$0xff] %vm363_vm1, %v11935_v34  ;;  %10533 = vmatprep.mubr.msk.bf16.mxu0 %vm712_vm0, %v11858_v43  ;;  %v11824_v45 = vld [vmem:[%s12018_s25 + $0xf8] sm:$0xff]   ;;  %v11827_v46 = vld [vmem:[%s12018_s25 + $0x120] sm:$0xff]  }
  0x20   : > { %422 = vst.msk [vmem:[#allocation2 + $0x1c8] sm:$0xff] %vm363_vm1, %v11935_v34  ;;  %423 = vst.msk [vmem:[#allocation2 + $0x1d0] sm:$0xff] %vm363_vm1, %v11935_v34  ;;  %10534 = vmatmul.mubr.msk.bf16.vlgmr.msra.gmra.mrb[0].mxu0 %vm712_vm0, %v11859_v44  ;;  %v11860_v47 = vld [vmem:[%s12018_s25 + $0x110] sm:$0xff]   ;;  %v11861_v48 = vld [vmem:[%s12018_s25 + $0x118] sm:$0xff]  }
  0x21   : > { %425 = vst.msk [vmem:[#allocation2 + $0x1e0] sm:$0xff] %vm363_vm1, %v11935_v34  ;;  %426 = vst.msk [vmem:[#allocation2 + $0x1e8] sm:$0xff] %vm363_vm1, %v11935_v34  ;;  %10537 = vmatprep.mubr.msk.bf16.mxu0 %vm712_vm0, %v11860_v47  ;;  %v11828_v49 = vld [vmem:[%s12018_s25 + $0x128] sm:$0xff]   ;;  %v11829_v50 = vld [vmem:[%s12018_s25 + $0x130] sm:$0xff]   ;;  %10844 = vmatpush3.bf16.msra.mxu0 %v11862_v59 }
  0x22   : > { %428 = vst.msk [vmem:[#allocation2 + $0x1f8] sm:$0xff] %vm363_vm1, %v11935_v34  ;;  %429 = vst.msk [vmem:[#allocation2 + $0x200] sm:$0xff] %vm363_vm1, %v11935_v34  ;;  %v11830_v53 = vld [vmem:[%s12018_s25 + $0x138] sm:$0xff]   ;;  %v11831_v54 = vld [vmem:[%s12018_s25 + $0x140] sm:$0xff]   ;;  %10845 = vmatprep.subr.bf16.mxu0 %v11863_v60 }
  0x23   : > { %431 = vst.msk [vmem:[#allocation2 + $0x210] sm:$0xff] %vm363_vm1, %v11935_v34  ;;  %432 = vst.msk [vmem:[#allocation2 + $0x218] sm:$0xff] %vm363_vm1, %v11935_v34  ;;  %v11832_v55 = vld [vmem:[%s12018_s25 + $0x148] sm:$0xff]   ;;  %v11833_v56 = vld [vmem:[%s12018_s25 + $0x150] sm:$0xff]  }
  0x24   : > { %10466 = vmatmul.mubr.msk.bf16.gmra.mrb[8].mxu1 %vm712_vm0, %v11794_v12  ;;  %434 = vst.msk [vmem:[#allocation2 + $0x228] sm:$0xff] %vm363_vm1, %v11935_v34  ;;  %435 = vst.msk [vmem:[#allocation2 + $0x230] sm:$0xff] %vm363_vm1, %v11935_v34  ;;  %v11834_v57 = vld [vmem:[%s12018_s25 + $0x158] sm:$0xff]   ;;  %v11835_v58 = vld [vmem:[%s12018_s25 + $0x160] sm:$0xff]  }
  0x25   : > { %10469 = vmatprep.mubr.msk.bf16.mxu1 %vm712_vm0, %v11795_v13  ;;  %437 = vst.msk [vmem:[#allocation2 + $0x240] sm:$0xff] %vm363_vm1, %v11935_v34  ;;  %438 = vst.msk [vmem:[#allocation2 + $0x248] sm:$0xff] %vm363_vm1, %v11935_v34  ;;  %v11836_v61 = vld [vmem:[%s12018_s25 + $0x168] sm:$0xff]   ;;  %10846 = vmatpush3.bf16.msra.mxu0 %v11863_v60  ;;  %v11838_v62 = vld [vmem:[%s12018_s25 + $0x170] sm:$0xff]  }
  0x26   : > { %440 = vst.msk [vmem:[#allocation2 + $0x258] sm:$0xff] %vm363_vm1, %v11935_v34  ;;  %441 = vst.msk [vmem:[#allocation2 + $0x260] sm:$0xff] %vm363_vm1, %v11935_v34  ;;  %10847 = vmatprep.subr.bf16.mxu0 %v11864_v63  ;;  %v11839_v1 = vld [vmem:[%s12018_s25 + $0x178] sm:$0xff]   ;;  %v11842_v2 = vld [vmem:[%s12018_s25 + $0x180] sm:$0xff]  }
  0x27   : > { %443 = vst.msk [vmem:[#allocation2 + $0x270] sm:$0xff] %vm363_vm1, %v11935_v34  ;;  %444 = vst.msk [vmem:[#allocation2 + $0x278] sm:$0xff] %vm363_vm1, %v11935_v34  ;;  %v11843_v3 = vld [vmem:[%s12018_s25 + $0x188] sm:$0xff]   ;;  %v11844_v4 = vld [vmem:[%s12018_s25 + $0x190] sm:$0xff]  }
  0x28   : > { %446 = vst.msk [vmem:[#allocation2 + $0x288] sm:$0xff] %vm363_vm1, %v11935_v34  ;;  %447 = vst.msk [vmem:[#allocation2 + $0x290] sm:$0xff] %vm363_vm1, %v11935_v34  ;;  %10538 = vmatmul.mubr.msk.bf16.gmra.mrb[4].mxu0 %vm712_vm0, %v11861_v48  ;;  %v11845_v5 = vld [vmem:[%s12018_s25 + $0x198] sm:$0xff]   ;;  %v11846_v6 = vld [vmem:[%s12018_s25 + $0x1a0] sm:$0xff]  }
  0x29   : > { %449 = vst.msk [vmem:[#allocation2 + $0x2a0] sm:$0xff] %vm363_vm1, %v11935_v34  ;;  %450 = vst.msk [vmem:[#allocation2 + $0x2a8] sm:$0xff] %vm363_vm1, %v11935_v34  ;;  %10848 = vmatpush3.bf16.msra.mxu0 %v11864_v63  ;;  %v11847_v7 = vld [vmem:[%s12018_s25 + $0x1a8] sm:$0xff]   ;;  %v11848_v8 = vld [vmem:[%s12018_s25 + $0x1b0] sm:$0xff]  }
  0x2a   : > { %452 = vst.msk [vmem:[#allocation2 + $0x2b8] sm:$0xff] %vm363_vm1, %v11935_v34  ;;  %453 = vst.msk [vmem:[#allocation2 + $0x2c0] sm:$0xff] %vm363_vm1, %v11935_v34  ;;  %10849 = vmatprep.subr.bf16.mxu0 %v11865_v0  ;;  %v11849_v9 = vld [vmem:[%s12018_s25 + $0x1b8] sm:$0xff]   ;;  %v11850_v10 = vld [vmem:[%s12018_s25 + $0x1c0] sm:$0xff]  }
  0x2b   : > { %455 = vst.msk [vmem:[#allocation2 + $0x2d0] sm:$0xff] %vm363_vm1, %v11935_v34  ;;  %456 = vst.msk [vmem:[#allocation2 + $0x2d8] sm:$0xff] %vm363_vm1, %v11935_v34  ;;  %v12591_v11 = vld [vmem:[%s13705_s3 + $0xe0] sm:$0xff]   ;;  %v11851_v12 = vld [vmem:[%s12018_s25 + $0x1c8] sm:$0xff]  }
  0x2c   : > { %10470 = vmatmul.mubr.msk.bf16.gmra.mrb[12].mxu1 %vm712_vm0, %v11796_v14  ;;  %458 = vst.msk [vmem:[#allocation2 + $0x2e8] sm:$0xff] %vm363_vm1, %v11935_v34  ;;  %459 = vst.msk [vmem:[#allocation2 + $0x2f0] sm:$0xff] %vm363_vm1, %v11935_v34  ;;  %v11852_v13 = vld [vmem:[%s12018_s25 + $0x1d0] sm:$0xff]   ;;  %v12600_v14 = vld [vmem:[%s13704_s2] ss:$0 sm:$0xff] }
  0x2d   : > { %10473 = vmatprep.mubr.msk.bf16.mxu1 %vm712_vm0, %v11798_v16  ;;  %461 = vst.msk [vmem:[#allocation2 + $0x300] sm:$0xff] %vm363_vm1, %v11935_v34  ;;  %462 = vst.msk [vmem:[#allocation2 + $0x308] sm:$0xff] %vm363_vm1, %v11935_v34  ;;  %10850 = vmatpush3.bf16.msra.mxu0 %v11865_v0 }
  0x2e   : > { %464 = vst.msk [vmem:[#allocation2 + $0x318] sm:$0xff] %vm363_vm1, %v11935_v34  ;;  %465 = vst.msk [vmem:[#allocation2 + $0x320] sm:$0xff] %vm363_vm1, %v11935_v34  ;;  %10883 = vmatprep.subr.bf16.mxu0 %v12591_v11 }
  0x2f   : > { %467 = vst.msk [vmem:[#allocation2 + $0x330] sm:$0xff] %vm363_vm1, %v11935_v34  ;;  %468 = vst.msk [vmem:[#allocation2 + $0x338] sm:$0xff] %vm363_vm1, %v11935_v34 }
  0x30   : > { %470 = vst.msk [vmem:[#allocation2 + $0x348] sm:$0xff] %vm363_vm1, %v11935_v34  ;;  %471 = vst.msk [vmem:[#allocation2 + $0x350] sm:$0xff] %vm363_vm1, %v11935_v34 }
  0x31   : > { %473 = vst.msk [vmem:[#allocation2 + $0x360] sm:$0xff] %vm363_vm1, %v11935_v34  ;;  %474 = vst.msk [vmem:[#allocation2 + $0x368] sm:$0xff] %vm363_vm1, %v11935_v34 }
  0x32   : > { %476 = vst.msk [vmem:[#allocation2 + $0x378] sm:$0xff] %vm363_vm1, %v11935_v34  ;;  %477 = vst.msk [vmem:[#allocation2 + $0x380] sm:$0xff] %vm363_vm1, %v11935_v34 }
  0x33   : > { %479 = vst.msk [vmem:[#allocation2 + $0x390] sm:$0xff] %vm363_vm1, %v11935_v34  ;;  %480 = vst.msk [vmem:[#allocation2 + $0x398] sm:$0xff] %vm363_vm1, %v11935_v34 }
  0x34   : > { %10474 = vmatmul.mubr.msk.bf16.gmra.mrb[16].mxu1 %vm712_vm0, %v11799_v19  ;;  %482 = vst.msk [vmem:[#allocation2 + $0x3a8] sm:$0xff] %vm363_vm1, %v11935_v34  ;;  %483 = vst.msk [vmem:[#allocation2 + $0x3b0] sm:$0xff] %vm363_vm1, %v11935_v34 }
  0x35   : > { %10477 = vmatprep.mubr.msk.bf16.mxu1 %vm712_vm0, %v11800_v20  ;;  %485 = vst.msk [vmem:[#allocation2 + $0x3c0] sm:$0xff] %vm363_vm1, %v11935_v34  ;;  %486 = vst.msk [vmem:[#allocation2 + $0x3c8] sm:$0xff] %vm363_vm1, %v11935_v34 }
  0x36   : > { %488 = vst.msk [vmem:[#allocation2 + $0x3d8] sm:$0xff] %vm363_vm1, %v11935_v34  ;;  %489 = vst.msk [vmem:[#allocation2 + $0x3e0] sm:$0xff] %vm363_vm1, %v11935_v34 }
  0x37   : > { %491 = vst.msk [vmem:[#allocation2 + $0x3f0] sm:$0xff] %vm363_vm1, %v11935_v34  ;;  %492 = vst.msk [vmem:[#allocation2 + $0x3f8] sm:$0xff] %vm363_vm1, %v11935_v34 }
  0x38   : > { %494 = vst.msk [vmem:[#allocation2 + $0x408] sm:$0xff] %vm363_vm1, %v11935_v34  ;;  %495 = vst.msk [vmem:[#allocation2 + $0x410] sm:$0xff] %vm363_vm1, %v11935_v34 }
  0x39   : > { %497 = vst.msk [vmem:[#allocation2 + $0x420] sm:$0xff] %vm363_vm1, %v11935_v34  ;;  %498 = vst.msk [vmem:[#allocation2 + $0x428] sm:$0xff] %vm363_vm1, %v11935_v34 }
  0x3a   : > { %500 = vst.msk [vmem:[#allocation2 + $0x438] sm:$0xff] %vm363_vm1, %v11935_v34  ;;  %501 = vst.msk [vmem:[#allocation2 + $0x440] sm:$0xff] %vm363_vm1, %v11935_v34 }
  0x3b   : > { %503 = vst.msk [vmem:[#allocation2 + $0x450] sm:$0xff] %vm363_vm1, %v11935_v34  ;;  %504 = vst.msk [vmem:[#allocation2 + $0x458] sm:$0xff] %vm363_vm1, %v11935_v34 }
  0x3c   : > { %10478 = vmatmul.mubr.msk.bf16.gmra.mrb[20].mxu1 %vm712_vm0, %v11801_v21  ;;  %506 = vst.msk [vmem:[#allocation2 + $0x468] sm:$0xff] %vm363_vm1, %v11935_v34  ;;  %507 = vst.msk [vmem:[#allocation2 + $0x470] sm:$0xff] %vm363_vm1, %v11935_v34  ;;  %v11854_v21 = vld [vmem:[%s12018_s25 + $0x1e0] sm:$0xff]  }
  0x3d   : > { %10481 = vmatprep.mubr.msk.bf16.mxu1 %vm712_vm0, %v11802_v22  ;;  %509 = vst.msk [vmem:[#allocation2 + $0x480] sm:$0xff] %vm363_vm1, %v11935_v34  ;;  %510 = vst.msk [vmem:[#allocation2 + $0x488] sm:$0xff] %vm363_vm1, %v11935_v34 }
  0x3e   : > { %512 = vst.msk [vmem:[#allocation2 + $0x498] sm:$0xff] %vm363_vm1, %v11935_v34  ;;  %513 = vst.msk [vmem:[#allocation2 + $0x4a0] sm:$0xff] %vm363_vm1, %v11935_v34 }
  0x3f   : > { %515 = vst.msk [vmem:[#allocation2 + $0x4b0] sm:$0xff] %vm363_vm1, %v11935_v34  ;;  %516 = vst.msk [vmem:[#allocation2 + $0x4b8] sm:$0xff] %vm363_vm1, %v11935_v34 }
  0x40   : > { %518 = vst.msk [vmem:[#allocation2 + $0x4c8] sm:$0xff] %vm363_vm1, %v11935_v34  ;;  %519 = vst.msk [vmem:[#allocation2 + $0x4d0] sm:$0xff] %vm363_vm1, %v11935_v34 }
  0x41   : > { %521 = vst.msk [vmem:[#allocation2 + $0x4e0] sm:$0xff] %vm363_vm1, %v11935_v34  ;;  %522 = vst.msk [vmem:[#allocation2 + $0x4e8] sm:$0xff] %vm363_vm1, %v11935_v34 }
  0x42   : > { %524 = vst.msk [vmem:[#allocation2 + $0x4f8] sm:$0xff] %vm363_vm1, %v11935_v34  ;;  %525 = vst.msk [vmem:[#allocation2 + $0x500] sm:$0xff] %vm363_vm1, %v11935_v34 }
  0x43   : > { %527 = vst.msk [vmem:[#allocation2 + $0x510] sm:$0xff] %vm363_vm1, %v11935_v34  ;;  %528 = vst.msk [vmem:[#allocation2 + $0x518] sm:$0xff] %vm363_vm1, %v11935_v34 }
  0x44   : > { %10482 = vmatmul.mubr.msk.bf16.gmra.mrb[24].mxu1 %vm712_vm0, %v11803_v23  ;;  %530 = vst.msk [vmem:[#allocation2 + $0x528] sm:$0xff] %vm363_vm1, %v11935_v34  ;;  %531 = vst.msk [vmem:[#allocation2 + $0x530] sm:$0xff] %vm363_vm1, %v11935_v34 }
  0x45   : > { %10485 = vmatprep.mubr.msk.bf16.mxu1 %vm712_vm0, %v11805_v24  ;;  %533 = vst.msk [vmem:[#allocation2 + $0x540] sm:$0xff] %vm363_vm1, %v11935_v34  ;;  %534 = vst.msk [vmem:[#allocation2 + $0x548] sm:$0xff] %vm363_vm1, %v11935_v34 }
  0x46   : > { %536 = vst.msk [vmem:[#allocation2 + $0x558] sm:$0xff] %vm363_vm1, %v11935_v34  ;;  %537 = vst.msk [vmem:[#allocation2 + $0x560] sm:$0xff] %vm363_vm1, %v11935_v34 }
  0x47   : > { %539 = vst.msk [vmem:[#allocation2 + $0x570] sm:$0xff] %vm363_vm1, %v11935_v34  ;;  %540 = vst.msk [vmem:[#allocation2 + $0x578] sm:$0xff] %vm363_vm1, %v11935_v34 }
  0x48   : > { %542 = vst.msk [vmem:[#allocation2 + $0x588] sm:$0xff] %vm363_vm1, %v11935_v34  ;;  %543 = vst.msk [vmem:[#allocation2 + $0x590] sm:$0xff] %vm363_vm1, %v11935_v34 }
  0x49   : > { %545 = vst.msk [vmem:[#allocation2 + $0x5a0] sm:$0xff] %vm363_vm1, %v11935_v34  ;;  %546 = vst.msk [vmem:[#allocation2 + $0x5a8] sm:$0xff] %vm363_vm1, %v11935_v34 }
  0x4a   : > { %548 = vst.msk [vmem:[#allocation2 + $0x5b8] sm:$0xff] %vm363_vm1, %v11935_v34  ;;  %549 = vst.msk [vmem:[#allocation2 + $0x5c0] sm:$0xff] %vm363_vm1, %v11935_v34 }
  0x4b   : > { %551 = vst.msk [vmem:[#allocation2 + $0x5d0] sm:$0xff] %vm363_vm1, %v11935_v34  ;;  %552 = vst.msk [vmem:[#allocation2 + $0x5d8] sm:$0xff] %vm363_vm1, %v11935_v34 }
  0x4c   : > { %10486 = vmatmul.mubr.msk.bf16.gmra.mrb[28].mxu1 %vm712_vm0, %v11806_v25  ;;  %554 = vst.msk [vmem:[#allocation2 + $0x5e8] sm:$0xff] %vm363_vm1, %v11935_v34  ;;  %555 = vst.msk [vmem:[#allocation2 + $0x5f0] sm:$0xff] %vm363_vm1, %v11935_v34 }
  0x4d   : > { %10495 = vmatprep.mubr.msk.bf16.mxu1 %vm712_vm0, %v11808_v26  ;;  %557 = vst.msk [vmem:[#allocation2 + $0x600] sm:$0xff] %vm363_vm1, %v11935_v34  ;;  %558 = vst.msk [vmem:[#allocation2 + $0x608] sm:$0xff] %vm363_vm1, %v11935_v34 }
  0x4e   : > { %560 = vst.msk [vmem:[#allocation2 + $0x618] sm:$0xff] %vm363_vm1, %v11935_v34  ;;  %561 = vst.msk [vmem:[#allocation2 + $0x620] sm:$0xff] %vm363_vm1, %v11935_v34 }
  0x4f   : > { %563 = vst.msk [vmem:[#allocation2 + $0x630] sm:$0xff] %vm363_vm1, %v11935_v34  ;;  %564 = vst.msk [vmem:[#allocation2 + $0x638] sm:$0xff] %vm363_vm1, %v11935_v34 }
  0x50   : > { %566 = vst.msk [vmem:[#allocation2 + $0x648] sm:$0xff] %vm363_vm1, %v11935_v34  ;;  %567 = vst.msk [vmem:[#allocation2 + $0x650] sm:$0xff] %vm363_vm1, %v11935_v34 }
  0x51   : > { %421 = vst.msk [vmem:[#allocation2 + $0x1c0] sm:$0x1] %vm366_vm2, %v11935_v34  ;;  %367 = vst.msk [vmem:[#allocation2 + $0x10] sm:$0x1] %vm366_vm2, %v11935_v34 }
  0x52   : > { %370 = vst.msk [vmem:[#allocation2 + $0x28] sm:$0x1] %vm366_vm2, %v11935_v34  ;;  %373 = vst.msk [vmem:[#allocation2 + $0x40] sm:$0x1] %vm366_vm2, %v11935_v34 }
  0x53   : > { %376 = vst.msk [vmem:[#allocation2 + $0x58] sm:$0x1] %vm366_vm2, %v11935_v34  ;;  %379 = vst.msk [vmem:[#allocation2 + $0x70] sm:$0x1] %vm366_vm2, %v11935_v34 }
  0x54   : > { %10496 = vmatmul.mubr.msk.bf16.vlgmr.msra.gmra.mrb[32].mxu1 %vm712_vm0, %v11809_v27  ;;  %382 = vst.msk [vmem:[#allocation2 + $0x88] sm:$0x1] %vm366_vm2, %v11935_v34  ;;  %385 = vst.msk [vmem:[#allocation2 + $0xa0] sm:$0x1] %vm366_vm2, %v11935_v34 }
  0x55   : > { %10499 = vmatprep.mubr.msk.bf16.mxu1 %vm712_vm0, %v11810_v28  ;;  %11292 = vmatpush3.bf16.msra.mxu1 %v11820_v15  ;;  %388 = vst.msk [vmem:[#allocation2 + $0xb8] sm:$0x1] %vm366_vm2, %v11935_v34  ;;  %391 = vst.msk [vmem:[#allocation2 + $0xd0] sm:$0x1] %vm366_vm2, %v11935_v34 }
  0x56   : > { %11290 = vmatprep.subr.bf16.mxu1 %v11825_v17  ;;  %394 = vst.msk [vmem:[#allocation2 + $0xe8] sm:$0x1] %vm366_vm2, %v11935_v34  ;;  %397 = vst.msk [vmem:[#allocation2 + $0x100] sm:$0x1] %vm366_vm2, %v11935_v34 }
  0x57   : > { %400 = vst.msk [vmem:[#allocation2 + $0x118] sm:$0x1] %vm366_vm2, %v11935_v34  ;;  %403 = vst.msk [vmem:[#allocation2 + $0x130] sm:$0x1] %vm366_vm2, %v11935_v34 }
  0x58   : > { %406 = vst.msk [vmem:[#allocation2 + $0x148] sm:$0x1] %vm366_vm2, %v11935_v34  ;;  %409 = vst.msk [vmem:[#allocation2 + $0x160] sm:$0x1] %vm366_vm2, %v11935_v34 }
  0x59   : > { %11293 = vmatpush3.bf16.msra.mxu1 %v11825_v17  ;;  %412 = vst.msk [vmem:[#allocation2 + $0x178] sm:$0x1] %vm366_vm2, %v11935_v34  ;;  %415 = vst.msk [vmem:[#allocation2 + $0x190] sm:$0x1] %vm366_vm2, %v11935_v34 }
  0x5a   : > { %11291 = vmatprep.subr.bf16.mxu1 %v11826_v18  ;;  %418 = vst.msk [vmem:[#allocation2 + $0x1a8] sm:$0x1] %vm366_vm2, %v11935_v34  ;;  %424 = vst.msk [vmem:[#allocation2 + $0x1d8] sm:$0x1] %vm366_vm2, %v11935_v34 }
  0x5b   : > { %427 = vst.msk [vmem:[#allocation2 + $0x1f0] sm:$0x1] %vm366_vm2, %v11935_v34  ;;  %430 = vst.msk [vmem:[#allocation2 + $0x208] sm:$0x1] %vm366_vm2, %v11935_v34 }
  0x5c   : > { %10500 = vmatmul.mubr.msk.bf16.gmra.mrb[36].mxu1 %vm712_vm0, %v11811_v29  ;;  %433 = vst.msk [vmem:[#allocation2 + $0x220] sm:$0x1] %vm366_vm2, %v11935_v34  ;;  %436 = vst.msk [vmem:[#allocation2 + $0x238] sm:$0x1] %vm366_vm2, %v11935_v34 }
  0x5d   : > { %10503 = vmatprep.mubr.msk.bf16.mxu1 %vm712_vm0, %v11812_v30  ;;  %11294 = vmatpush3.bf16.msra.mxu1 %v11826_v18  ;;  %439 = vst.msk [vmem:[#allocation2 + $0x250] sm:$0x1] %vm366_vm2, %v11935_v34  ;;  %442 = vst.msk [vmem:[#allocation2 + $0x268] sm:$0x1] %vm366_vm2, %v11935_v34  ;;  %v11853_v18 = vld [vmem:[%s12018_s25 + $0x1d8] sm:$0xff]  }
  0x5e   : > { %10565 = vmatprep.subr.bf16.mxu1 %v12081_v31  ;;  %445 = vst.msk [vmem:[#allocation2 + $0x280] sm:$0x1] %vm366_vm2, %v11935_v34  ;;  %448 = vst.msk [vmem:[#allocation2 + $0x298] sm:$0x1] %vm366_vm2, %v11935_v34 }
  0x5f   : > { %451 = vst.msk [vmem:[#allocation2 + $0x2b0] sm:$0x1] %vm366_vm2, %v11935_v34  ;;  %454 = vst.msk [vmem:[#allocation2 + $0x2c8] sm:$0x1] %vm366_vm2, %v11935_v34 }
  0x60   : > { %457 = vst.msk [vmem:[#allocation2 + $0x2e0] sm:$0x1] %vm366_vm2, %v11935_v34  ;;  %460 = vst.msk [vmem:[#allocation2 + $0x2f8] sm:$0x1] %vm366_vm2, %v11935_v34 }
  0x61   : > { %463 = vst.msk [vmem:[#allocation2 + $0x310] sm:$0x1] %vm366_vm2, %v11935_v34  ;;  %466 = vst.msk [vmem:[#allocation2 + $0x328] sm:$0x1] %vm366_vm2, %v11935_v34 }
  0x62   : > { %469 = vst.msk [vmem:[#allocation2 + $0x340] sm:$0x1] %vm366_vm2, %v11935_v34  ;;  %472 = vst.msk [vmem:[#allocation2 + $0x358] sm:$0x1] %vm366_vm2, %v11935_v34 }
  0x63   : > { %475 = vst.msk [vmem:[#allocation2 + $0x370] sm:$0x1] %vm366_vm2, %v11935_v34  ;;  %478 = vst.msk [vmem:[#allocation2 + $0x388] sm:$0x1] %vm366_vm2, %v11935_v34 }
  0x64   : > { %10504 = vmatmul.mubr.msk.bf16.gmra.mrb[40].mxu1 %vm712_vm0, %v11813_v32  ;;  %481 = vst.msk [vmem:[#allocation2 + $0x3a0] sm:$0x1] %vm366_vm2, %v11935_v34  ;;  %484 = vst.msk [vmem:[#allocation2 + $0x3b8] sm:$0x1] %vm366_vm2, %v11935_v34 }
  0x65   : > { %10507 = vmatprep.mubr.msk.bf16.mxu1 %vm712_vm0, %v11814_v33  ;;  %487 = vst.msk [vmem:[#allocation2 + $0x3d0] sm:$0x1] %vm366_vm2, %v11935_v34  ;;  %490 = vst.msk [vmem:[#allocation2 + $0x3e8] sm:$0x1] %vm366_vm2, %v11935_v34 }
  0x66   : > { %493 = vst.msk [vmem:[#allocation2 + $0x400] sm:$0x1] %vm366_vm2, %v11935_v34  ;;  %496 = vst.msk [vmem:[#allocation2 + $0x418] sm:$0x1] %vm366_vm2, %v11935_v34 }
  0x67   : > { %499 = vst.msk [vmem:[#allocation2 + $0x430] sm:$0x1] %vm366_vm2, %v11935_v34  ;;  %502 = vst.msk [vmem:[#allocation2 + $0x448] sm:$0x1] %vm366_vm2, %v11935_v34 }
  0x68   : > { %505 = vst.msk [vmem:[#allocation2 + $0x460] sm:$0x1] %vm366_vm2, %v11935_v34  ;;  %508 = vst.msk [vmem:[#allocation2 + $0x478] sm:$0x1] %vm366_vm2, %v11935_v34 }
  0x69   : > { %511 = vst.msk [vmem:[#allocation2 + $0x490] sm:$0x1] %vm366_vm2, %v11935_v34  ;;  %514 = vst.msk [vmem:[#allocation2 + $0x4a8] sm:$0x1] %vm366_vm2, %v11935_v34 }
  0x6a   : > { %517 = vst.msk [vmem:[#allocation2 + $0x4c0] sm:$0x1] %vm366_vm2, %v11935_v34  ;;  %520 = vst.msk [vmem:[#allocation2 + $0x4d8] sm:$0x1] %vm366_vm2, %v11935_v34 }
  0x6b   : > { %523 = vst.msk [vmem:[#allocation2 + $0x4f0] sm:$0x1] %vm366_vm2, %v11935_v34  ;;  %526 = vst.msk [vmem:[#allocation2 + $0x508] sm:$0x1] %vm366_vm2, %v11935_v34 }
  0x6c   : > { %10508 = vmatmul.mubr.msk.bf16.gmra.mrb[44].mxu1 %vm712_vm0, %v11815_v35  ;;  %529 = vst.msk [vmem:[#allocation2 + $0x520] sm:$0x1] %vm366_vm2, %v11935_v34  ;;  %532 = vst.msk [vmem:[#allocation2 + $0x538] sm:$0x1] %vm366_vm2, %v11935_v34 }
  0x6d   : > { %10511 = vmatprep.mubr.msk.bf16.mxu1 %vm712_vm0, %v11816_v36  ;;  %535 = vst.msk [vmem:[#allocation2 + $0x550] sm:$0x1] %vm366_vm2, %v11935_v34  ;;  %538 = vst.msk [vmem:[#allocation2 + $0x568] sm:$0x1] %vm366_vm2, %v11935_v34  ;;  %v11855_v36 = vld [vmem:[%s12018_s25 + $0x1e8] sm:$0xff]  }
  0x6e   : > { %541 = vst.msk [vmem:[#allocation2 + $0x580] sm:$0x1] %vm366_vm2, %v11935_v34  ;;  %544 = vst.msk [vmem:[#allocation2 + $0x598] sm:$0x1] %vm366_vm2, %v11935_v34 }
  0x6f   : > { %547 = vst.msk [vmem:[#allocation2 + $0x5b0] sm:$0x1] %vm366_vm2, %v11935_v34  ;;  %550 = vst.msk [vmem:[#allocation2 + $0x5c8] sm:$0x1] %vm366_vm2, %v11935_v34 }
  0x70   : > { %553 = vst.msk [vmem:[#allocation2 + $0x5e0] sm:$0x1] %vm366_vm2, %v11935_v34  ;;  %556 = vst.msk [vmem:[#allocation2 + $0x5f8] sm:$0x1] %vm366_vm2, %v11935_v34 }
  0x71   : > { %559 = vst.msk [vmem:[#allocation2 + $0x610] sm:$0x1] %vm366_vm2, %v11935_v34  ;;  %562 = vst.msk [vmem:[#allocation2 + $0x628] sm:$0x1] %vm366_vm2, %v11935_v34 }
  0x72   : > { %565 = vst.msk [vmem:[#allocation2 + $0x640] sm:$0x1] %vm366_vm2, %v11935_v34  ;;  %568 = vst.msk [vmem:[#allocation2 + $0x658] sm:$0x1] %vm366_vm2, %v11935_v34 }
  0x74   : > { %10512 = vmatmul.mubr.msk.bf16.gmra.mrb[48].mxu1 %vm712_vm0, %v12367_v37 }
  0x75   : > { %10515 = vmatprep.mubr.msk.bf16.mxu1 %vm712_vm0, %v11818_v38 }
  0x7c   : > { %10516 = vmatmul.mubr.msk.bf16.gmra.mrb[52].mxu1 %vm712_vm0, %v11819_v39  ;;  %v11856_v39 = vld [vmem:[%s12018_s25 + $0x1f0] sm:$0xff]  }
  0x7d   : > { %10519 = vmatprep.mubr.msk.bf16.mxu1 %vm712_vm0, %v11821_v40 }
  0x84   : > { %10520 = vmatmul.mubr.msk.bf16.gmra.mrb[56].mxu1 %vm712_vm0, %v11822_v41 }
  0x85   : > { %10523 = vmatprep.mubr.msk.bf16.mxu1 %vm712_vm0, %v11823_v42 }
  0x8c   : > { %10524 = vmatmul.mubr.msk.bf16.gmra.mrb[60].mxu1 %vm712_vm0, %v11824_v45 }
  0x8d   : > { %10541 = vmatprep.mubr.msk.bf16.mxu1 %vm712_vm0, %v11827_v46 }
  0x94   : > { %10542 = vmatmul.mubr.msk.bf16.vlgmr.msra.gmra.mrb[64].mxu1 %vm712_vm0, %v11828_v49 }
  0x95   : > { %10545 = vmatprep.mubr.msk.bf16.mxu1 %vm712_vm0, %v11829_v50  ;;  %10566 = vmatpush3.bf16.msra.mxu1 %v12081_v31 }
  0x96   : > { %10567 = vmatprep.subr.bf16.mxu1 %v11840_v51 }
  0x99   : > { %10568 = vmatpush3.bf16.msra.mxu1 %v11840_v51 }
  0x9a   : > { %10569 = vmatprep.subr.bf16.mxu1 %v11841_v52 }
  0x9c   : > { %10546 = vmatmul.mubr.msk.bf16.gmra.mrb[68].mxu1 %vm712_vm0, %v11830_v53 }
  0x9d   : > { %10549 = vmatprep.mubr.msk.bf16.mxu1 %vm712_vm0, %v11831_v54  ;;  %10570 = vmatpush3.bf16.msra.mxu1 %v11841_v52  ;;  %v11857_v54 = vld [vmem:[%s12018_s25 + $0x1f8] sm:$0xff]  }
  0xa4   : > { %10550 = vmatmul.mubr.msk.bf16.gmra.mrb[72].mxu1 %vm712_vm0, %v11832_v55 }
  0xa5   : > { %10553 = vmatprep.mubr.msk.bf16.mxu1 %vm712_vm0, %v11833_v56 }
  0xac   : > { %10554 = vmatmul.mubr.msk.bf16.gmra.mrb[76].mxu1 %vm712_vm0, %v11834_v57 }
  0xad   : > { %10557 = vmatprep.mubr.msk.bf16.mxu1 %vm712_vm0, %v11835_v58 }
  0xb4   : > { %10558 = vmatmul.mubr.msk.bf16.gmra.mrb[80].mxu1 %vm712_vm0, %v11836_v61 }
  0xb5   : > { %10561 = vmatprep.mubr.msk.bf16.mxu1 %vm712_vm0, %v11838_v62 }
  0xbc   : > { %10562 = vmatmul.mubr.msk.bf16.gmra.mrb[84].mxu1 %vm712_vm0, %v11839_v1 }
  0xbd   : > { %10571 = vmatprep.mubr.msk.bf16.mxu1 %vm712_vm0, %v11842_v2 }
  0xc4   : > { %10572 = vmatmul.mubr.msk.bf16.vlgmr.msra.gmra.mrb[88].mxu1 %vm712_vm0, %v11843_v3 }
  0xc5   : > { %10575 = vmatprep.mubr.msk.bf16.mxu1 %vm712_vm0, %v11844_v4 }
  0xcc   : > { %10576 = vmatmul.mubr.msk.bf16.gmra.mrb[92].mxu1 %vm712_vm0, %v11845_v5 }
  0xcd   : > { %10579 = vmatprep.mubr.msk.bf16.mxu1 %vm712_vm0, %v11846_v6 }
  0xd4   : > { %10580 = vmatmul.mubr.msk.bf16.gmra.mrb[96].mxu1 %vm712_vm0, %v11847_v7 }
  0xd5   : > { %10583 = vmatprep.mubr.msk.bf16.mxu1 %vm712_vm0, %v11848_v8 }
  0xdc   : > { %10584 = vmatmul.mubr.msk.bf16.gmra.mrb[100].mxu1 %vm712_vm0, %v11849_v9 }
  0xdd   : > { %10587 = vmatprep.mubr.msk.bf16.mxu1 %vm712_vm0, %v11850_v10 }
  0xe4   : > { %10588 = vmatmul.mubr.msk.bf16.gmra.mrb[104].mxu1 %vm712_vm0, %v11851_v12 }
  0xe5   : > { %10591 = vmatprep.mubr.msk.bf16.mxu1 %vm712_vm0, %v11852_v13 }
  0xe7   : > { %v10459_v15 = vpop.f32.mrb[0].mxu1 }
  0xe8   : > { %v804_v16 = vadd.f32 %v10459_v15, %v12600_v14  ;;  %v795_v17 = vpop.f32.mrb[1].mxu1 }
  0xe9   : > { %v796_v19 = vadd.f32 %v12600_v14, %v795_v17  ;;  %v10460_v20 = vpop.f32.mrb[2].mxu1 }
  0xea   : > { %vm924_vm3 = vcmp.ge.f32.partialorder %v804_v16, 0.0  ;;  %v956_v22 = vmul.f32 0.2, %v804_v16  ;;  %v807_v23 = vadd.f32 %v10460_v20, %v12600_v14  ;;  %v798_v24 = vpop.f32.mrb[3].mxu1 }
  0xeb   : > { %vm922_vm4 = vcmp.ge.f32.partialorder %v796_v19, 0.0  ;;  %v954_v25 = vmul.f32 0.2, %v796_v19  ;;  %v799_v26 = vadd.f32 %v12600_v14, %v798_v24 }
  0xec   : > { %v988_v27 = vsel %vm924_vm3, %v804_v16, %v956_v22  ;;  %vm925_vm5 = vcmp.ge.f32.partialorder %v807_v23, 0.0  ;;  %v957_v28 = vmul.f32 0.2, %v807_v23  ;;  %10592 = vmatmul.mubr.msk.bf16.gmra.mrb[108].mxu1 %vm712_vm0, %v11853_v18 }
  0xed   : > { %1020 = vst.msk [vmem:[#allocation2 + $0x18] sm:$0xff] %vm363_vm1, %v988_v27  ;;  %v986_v29 = vsel %vm922_vm4, %v796_v19, %v954_v25  ;;  %vm923_vm6 = vcmp.ge.f32.partialorder %v799_v26, 0.0  ;;  %v955_v30 = vmul.f32 0.2, %v799_v26  ;;  %10595 = vmatprep.mubr.msk.bf16.mxu1 %vm712_vm0, %v11854_v21 }
  0xee   : > { %1018 = vst.msk [vmem:[#allocation2] sm:$0xff] %vm363_vm1, %v986_v29  ;;  %v989_v31 = vsel %vm925_vm5, %v807_v23, %v957_v28 }
  0xef   : > { %1021 = vst.msk [vmem:[#allocation2 + $0x20] sm:$0xff] %vm363_vm1, %v989_v31  ;;  %v987_v32 = vsel %vm923_vm6, %v799_v26, %v955_v30  ;;  %v10463_v33 = vpop.f32.mrb[4].mxu1 }
  0xf0   : > { %1019 = vst.msk [vmem:[#allocation2 + $0x8] sm:$0xff] %vm363_vm1, %v987_v32  ;;  %v820_v34 = vadd.f32 %v10463_v33, %v12600_v14  ;;  %v811_v35 = vpop.f32.mrb[5].mxu1 }
  0xf1   : > { %v812_v37 = vadd.f32 %v12600_v14, %v811_v35  ;;  %v10464_v38 = vpop.f32.mrb[6].mxu1 }
  0xf2   : > { %vm928_vm7 = vcmp.ge.f32.partialorder %v820_v34, 0.0  ;;  %v960_v40 = vmul.f32 0.2, %v820_v34  ;;  %v823_v41 = vadd.f32 %v10464_v38, %v12600_v14  ;;  %v814_v42 = vpop.f32.mrb[7].mxu1 }
  0xf3   : > { %vm926_vm8 = vcmp.ge.f32.partialorder %v812_v37, 0.0  ;;  %v958_v43 = vmul.f32 0.2, %v812_v37  ;;  %v815_v44 = vadd.f32 %v12600_v14, %v814_v42 }
  0xf4   : > { %v992_v45 = vsel %vm928_vm7, %v820_v34, %v960_v40  ;;  %vm929_vm9 = vcmp.ge.f32.partialorder %v823_v41, 0.0  ;;  %v961_v46 = vmul.f32 0.2, %v823_v41  ;;  %10596 = vmatmul.mubr.msk.bf16.gmra.mrb[112].mxu1 %vm712_vm0, %v11855_v36 }
  0xf5   : > { %1024 = vst.msk [vmem:[#allocation2 + $0x48] sm:$0xff] %vm363_vm1, %v992_v45  ;;  %v990_v47 = vsel %vm926_vm8, %v812_v37, %v958_v43  ;;  %vm927_vm10 = vcmp.ge.f32.partialorder %v815_v44, 0.0  ;;  %v959_v48 = vmul.f32 0.2, %v815_v44  ;;  %10599 = vmatprep.mubr.msk.bf16.mxu1 %vm712_vm0, %v11856_v39 }
  0xf6   : > { %1022 = vst.msk [vmem:[#allocation2 + $0x30] sm:$0xff] %vm363_vm1, %v990_v47  ;;  %v993_v49 = vsel %vm929_vm9, %v823_v41, %v961_v46 }
  0xf7   : > { %1025 = vst.msk [vmem:[#allocation2 + $0x50] sm:$0xff] %vm363_vm1, %v993_v49  ;;  %v991_v50 = vsel %vm927_vm10, %v815_v44, %v959_v48  ;;  %v10467_v51 = vpop.f32.mrb[8].mxu1 }
  0xf8   : > { %1023 = vst.msk [vmem:[#allocation2 + $0x38] sm:$0xff] %vm363_vm1, %v991_v50  ;;  %v836_v52 = vadd.f32 %v10467_v51, %v12600_v14  ;;  %v827_v53 = vpop.f32.mrb[9].mxu1 }
  0xf9   : > { %v828_v55 = vadd.f32 %v12600_v14, %v827_v53  ;;  %v10468_v56 = vpop.f32.mrb[10].mxu1 }
  0xfa   : > { %vm932_vm11 = vcmp.ge.f32.partialorder %v836_v52, 0.0  ;;  %v964_v57 = vmul.f32 0.2, %v836_v52  ;;  %v839_v58 = vadd.f32 %v10468_v56, %v12600_v14  ;;  %v830_v59 = vpop.f32.mrb[11].mxu1 }
  0xfb   : > { %vm930_vm12 = vcmp.ge.f32.partialorder %v828_v55, 0.0  ;;  %v962_v60 = vmul.f32 0.2, %v828_v55  ;;  %v831_v61 = vadd.f32 %v12600_v14, %v830_v59 }
  0xfc   : > { %v996_v62 = vsel %vm932_vm11, %v836_v52, %v964_v57  ;;  %vm933_vm13 = vcmp.ge.f32.partialorder %v839_v58, 0.0  ;;  %v965_v63 = vmul.f32 0.2, %v839_v58  ;;  %10600 = vmatmul.mubr.msk.bf16.gmra.mrb[116].mxu1 %vm712_vm0, %v11857_v54  ;;  %v11871_v57 = vld [vmem:[%s13705_s3] sm:$0xff]  }
  0xfd   : > { %1028 = vst.msk [vmem:[#allocation2 + $0x78] sm:$0xff] %vm363_vm1, %v996_v62  ;;  %v994_v0 = vsel %vm930_vm12, %v828_v55, %v962_v60  ;;  %vm931_vm14 = vcmp.ge.f32.partialorder %v831_v61, 0.0  ;;  %v963_v1 = vmul.f32 0.2, %v831_v61  ;;  %10603 = vmatprep.subr.bf16.mxu1 %v11871_v57 }
  0xfe   : > { %1026 = vst.msk [vmem:[#allocation2 + $0x60] sm:$0xff] %vm363_vm1, %v994_v0  ;;  %v997_v2 = vsel %vm933_vm13, %v839_v58, %v965_v63  ;;  %10604 = vmatpush3.bf16.msra.mxu1 %v11871_v57 }
  0xff   : > { %1029 = vst.msk [vmem:[#allocation2 + $0x80] sm:$0xff] %vm363_vm1, %v997_v2  ;;  %v995_v3 = vsel %vm931_vm14, %v831_v61, %v963_v1  ;;  %v10471_v4 = vpop.f32.mrb[12].mxu1 }
 0x100   : > { %1027 = vst.msk [vmem:[#allocation2 + $0x68] sm:$0xff] %vm363_vm1, %v995_v3  ;;  %v852_v5 = vadd.f32 %v10471_v4, %v12600_v14  ;;  %v843_v6 = vpop.f32.mrb[13].mxu1  ;;  %v11872_v3 = vld [vmem:[%s13705_s3 + $0x8] sm:$0xff]  }
 0x101   : > { %v844_v7 = vadd.f32 %v12600_v14, %v843_v6  ;;  %v10472_v8 = vpop.f32.mrb[14].mxu1  ;;  %10605 = vmatprep.subr.bf16.mxu1 %v11872_v3 }
 0x102   : > { %vm936_vm15 = vcmp.ge.f32.partialorder %v852_v5, 0.0  ;;  %v968_v9 = vmul.f32 0.2, %v852_v5  ;;  %v855_v10 = vadd.f32 %v10472_v8, %v12600_v14  ;;  %v846_v12 = vpop.f32.mrb[15].mxu1  ;;  %10606 = vmatpush3.bf16.msra.mxu1 %v11872_v3 }
 0x103   : > { %vm934_vm0 = vcmp.ge.f32.partialorder %v844_v7, 0.0  ;;  %v966_v13 = vmul.f32 0.2, %v844_v7  ;;  %v847_v15 = vadd.f32 %v12600_v14, %v846_v12  ;;  %v11873_v12 = vld [vmem:[%s13705_s3 + $0x10] sm:$0xff]  }
 0x104   : > { %v1000_v16 = vsel %vm936_vm15, %v852_v5, %v968_v9  ;;  %vm937_vm2 = vcmp.ge.f32.partialorder %v855_v10, 0.0  ;;  %v969_v17 = vmul.f32 0.2, %v855_v10  ;;  %10607 = vmatprep.subr.bf16.mxu1 %v11873_v12 }
 0x105   : > { %1032 = vst.msk [vmem:[#allocation2 + $0xa8] sm:$0xff] %vm363_vm1, %v1000_v16  ;;  %v998_v18 = vsel %vm934_vm0, %v844_v7, %v966_v13  ;;  %vm935_vm3 = vcmp.ge.f32.partialorder %v847_v15, 0.0  ;;  %v967_v19 = vmul.f32 0.2, %v847_v15 }
 0x106   : > { %1030 = vst.msk [vmem:[#allocation2 + $0x90] sm:$0xff] %vm363_vm1, %v998_v18  ;;  %v1001_v20 = vsel %vm937_vm2, %v855_v10, %v969_v17  ;;  %10608 = vmatpush3.bf16.msra.mxu1 %v11873_v12 }
 0x107   : > { %1033 = vst.msk [vmem:[#allocation2 + $0xb0] sm:$0xff] %vm363_vm1, %v1001_v20  ;;  %v999_v21 = vsel %vm935_vm3, %v847_v15, %v967_v19  ;;  %v10475_v22 = vpop.f32.mrb[16].mxu1 }
 0x108   : > { %1031 = vst.msk [vmem:[#allocation2 + $0x98] sm:$0xff] %vm363_vm1, %v999_v21  ;;  %v868_v23 = vadd.f32 %v10475_v22, %v12600_v14  ;;  %v859_v24 = vpop.f32.mrb[17].mxu1 }
 0x109   : > { %v860_v25 = vadd.f32 %v12600_v14, %v859_v24  ;;  %v10476_v26 = vpop.f32.mrb[18].mxu1 }
 0x10a   : > { %vm940_vm4 = vcmp.ge.f32.partialorder %v868_v23, 0.0  ;;  %v972_v27 = vmul.f32 0.2, %v868_v23  ;;  %v871_v28 = vadd.f32 %v10476_v26, %v12600_v14  ;;  %v862_v29 = vpop.f32.mrb[19].mxu1 }
 0x10b   : > { %vm938_vm5 = vcmp.ge.f32.partialorder %v860_v25, 0.0  ;;  %v970_v30 = vmul.f32 0.2, %v860_v25  ;;  %v863_v31 = vadd.f32 %v12600_v14, %v862_v29 }
 0x10c   : > { %v1004_v32 = vsel %vm940_vm4, %v868_v23, %v972_v27  ;;  %vm941_vm6 = vcmp.ge.f32.partialorder %v871_v28, 0.0  ;;  %v973_v33 = vmul.f32 0.2, %v871_v28  ;;  %v11874_v23 = vld [vmem:[%s13705_s3 + $0x18] sm:$0xff]   ;;  %v2529_v27 = vld [vmem:[#allocation2 + $0x4c8] sm:$0xff] }
 0x10d   : > { %1036 = vst.msk [vmem:[#allocation2 + $0xd8] sm:$0xff] %vm363_vm1, %v1004_v32  ;;  %v1002_v34 = vsel %vm938_vm5, %v860_v25, %v970_v30  ;;  %vm939_vm7 = vcmp.ge.f32.partialorder %v863_v31, 0.0  ;;  %v971_v35 = vmul.f32 0.2, %v863_v31  ;;  %10609 = vmatprep.subr.bf16.mxu1 %v11874_v23 }
 0x10e   : > { %1034 = vst.msk [vmem:[#allocation2 + $0xc0] sm:$0xff] %vm363_vm1, %v1002_v34  ;;  %v1005_v36 = vsel %vm941_vm6, %v871_v28, %v973_v33  ;;  %v2530_v28 = vld [vmem:[#allocation2 + $0x4d0] sm:$0xff]  ;;  %10610 = vmatpush3.bf16.msra.mxu1 %v11874_v23 }
 0x10f   : > { %1037 = vst.msk [vmem:[#allocation2 + $0xe0] sm:$0xff] %vm363_vm1, %v1005_v36  ;;  %v1003_v37 = vsel %vm939_vm7, %v863_v31, %v971_v35  ;;  %v10479_v38 = vpop.f32.mrb[20].mxu1  ;;  %v2593_v31 = vpack.c.bf16 %v2530_v28, %v2529_v27 }
 0x110   : > { %1035 = vst.msk [vmem:[#allocation2 + $0xc8] sm:$0xff] %vm363_vm1, %v1003_v37  ;;  %v884_v39 = vadd.f32 %v10479_v38, %v12600_v14  ;;  %v875_v40 = vpop.f32.mrb[21].mxu1 }
 0x111   : > { %v876_v41 = vadd.f32 %v12600_v14, %v875_v40  ;;  %v10480_v42 = vpop.f32.mrb[22].mxu1  ;;  %10611 = vmatprep.mubr.msk.bf16.mxu1 %vm363_vm1, %v2593_v31 }
 0x112   : > { %vm944_vm8 = vcmp.ge.f32.partialorder %v884_v39, 0.0  ;;  %v976_v43 = vmul.f32 0.2, %v884_v39  ;;  %v887_v44 = vadd.f32 %v10480_v42, %v12600_v14  ;;  %v878_v45 = vpop.f32.mrb[23].mxu1 }
 0x113   : > { %vm942_vm9 = vcmp.ge.f32.partialorder %v876_v41, 0.0  ;;  %v974_v46 = vmul.f32 0.2, %v876_v41  ;;  %v879_v47 = vadd.f32 %v12600_v14, %v878_v45 }
 0x114   : > { %v1008_v48 = vsel %vm944_vm8, %v884_v39, %v976_v43  ;;  %vm945_vm10 = vcmp.ge.f32.partialorder %v887_v44, 0.0  ;;  %v977_v49 = vmul.f32 0.2, %v887_v44 }
 0x115   : > { %1040 = vst.msk [vmem:[#allocation2 + $0x108] sm:$0xff] %vm363_vm1, %v1008_v48  ;;  %v1006_v50 = vsel %vm942_vm9, %v876_v41, %v974_v46  ;;  %vm943_vm11 = vcmp.ge.f32.partialorder %v879_v47, 0.0  ;;  %v975_v51 = vmul.f32 0.2, %v879_v47 }
 0x116   : > { %1038 = vst.msk [vmem:[#allocation2 + $0xf0] sm:$0xff] %vm363_vm1, %v1006_v50  ;;  %v1009_v52 = vsel %vm945_vm10, %v887_v44, %v977_v49 }
 0x117   : > { %1041 = vst.msk [vmem:[#allocation2 + $0x110] sm:$0xff] %vm363_vm1, %v1009_v52  ;;  %v1007_v53 = vsel %vm943_vm11, %v879_v47, %v975_v51  ;;  %v10483_v54 = vpop.f32.mrb[24].mxu1 }
 0x118   : > { %1039 = vst.msk [vmem:[#allocation2 + $0xf8] sm:$0xff] %vm363_vm1, %v1007_v53  ;;  %v900_v55 = vadd.f32 %v10483_v54, %v12600_v14  ;;  %v891_v56 = vpop.f32.mrb[25].mxu1 }
 0x119   : > { %v892_v58 = vadd.f32 %v12600_v14, %v891_v56  ;;  %v10484_v59 = vpop.f32.mrb[26].mxu1 }
 0x11a   : > { %vm948_vm12 = vcmp.ge.f32.partialorder %v900_v55, 0.0  ;;  %v980_v60 = vmul.f32 0.2, %v900_v55  ;;  %v903_v61 = vadd.f32 %v10484_v59, %v12600_v14  ;;  %v894_v62 = vpop.f32.mrb[27].mxu1 }
 0x11b   : > { %vm946_vm13 = vcmp.ge.f32.partialorder %v892_v58, 0.0  ;;  %v978_v63 = vmul.f32 0.2, %v892_v58  ;;  %v895_v0 = vadd.f32 %v12600_v14, %v894_v62 }
 0x11c   : > { %v1012_v1 = vsel %vm948_vm12, %v900_v55, %v980_v60  ;;  %vm949_vm14 = vcmp.ge.f32.partialorder %v903_v61, 0.0  ;;  %v981_v2 = vmul.f32 0.2, %v903_v61 }
 0x11d   : > { %1044 = vst.msk [vmem:[#allocation2 + $0x138] sm:$0xff] %vm363_vm1, %v1012_v1  ;;  %v1010_v4 = vsel %vm946_vm13, %v892_v58, %v978_v63  ;;  %vm947_vm15 = vcmp.ge.f32.partialorder %v895_v0, 0.0  ;;  %v979_v5 = vmul.f32 0.2, %v895_v0 }
 0x11e   : > { %1042 = vst.msk [vmem:[#allocation2 + $0x120] sm:$0xff] %vm363_vm1, %v1010_v4  ;;  %v1013_v6 = vsel %vm949_vm14, %v903_v61, %v981_v2 }
 0x11f   : > { %1045 = vst.msk [vmem:[#allocation2 + $0x140] sm:$0xff] %vm363_vm1, %v1013_v6  ;;  %v1011_v7 = vsel %vm947_vm15, %v895_v0, %v979_v5  ;;  %v10487_v8 = vpop.f32.mrb[28].mxu1 }
 0x120   : > { %1043 = vst.msk [vmem:[#allocation2 + $0x128] sm:$0xff] %vm363_vm1, %v1011_v7  ;;  %v916_v9 = vadd.f32 %v10487_v8, %v12600_v14  ;;  %v907_v10 = vpop.f32.mrb[29].mxu1 }
 0x121   : > { %v908_v13 = vadd.f32 %v12600_v14, %v907_v10  ;;  %v10488_v15 = vpop.f32.mrb[30].mxu1  ;;  %v11867_v10 = vld [vmem:[%s13705_s3 + $0xe8] sm:$0xff]  }
 0x122   : > { %vm952_vm0 = vcmp.ge.f32.partialorder %v916_v9, 0.0  ;;  %v984_v16 = vmul.f32 0.2, %v916_v9  ;;  %v919_v17 = vadd.f32 %v10488_v15, %v12600_v14  ;;  %v910_v18 = vpop.f32.mrb[31].mxu1 }
 0x123   : > { %vm950_vm2 = vcmp.ge.f32.partialorder %v908_v13, 0.0  ;;  %v982_v19 = vmul.f32 0.2, %v908_v13  ;;  %v911_v20 = vadd.f32 %v12600_v14, %v910_v18 }
 0x124   : > { %v1016_v21 = vsel %vm952_vm0, %v916_v9, %v984_v16  ;;  %vm953_vm3 = vcmp.ge.f32.partialorder %v919_v17, 0.0  ;;  %v985_v22 = vmul.f32 0.2, %v919_v17 }
 0x125   : > { %1048 = vst.msk [vmem:[#allocation2 + $0x168] sm:$0xff] %vm363_vm1, %v1016_v21  ;;  %v1014_v24 = vsel %vm950_vm2, %v908_v13, %v982_v19  ;;  %vm951_vm4 = vcmp.ge.f32.partialorder %v911_v20, 0.0  ;;  %v983_v25 = vmul.f32 0.2, %v911_v20 }
 0x126   : > { %1046 = vst.msk [vmem:[#allocation2 + $0x150] sm:$0xff] %vm363_vm1, %v1014_v24  ;;  %v1017_v26 = vsel %vm953_vm3, %v919_v17, %v985_v22  ;;  %v11868_v22 = vld [vmem:[%s13705_s3 + $0xf0] sm:$0xff]  }
 0x127   : > { %1049 = vst.msk [vmem:[#allocation2 + $0x170] sm:$0xff] %vm363_vm1, %v1017_v26  ;;  %v1015_v29 = vsel %vm951_vm4, %v911_v20, %v983_v25  ;;  %v10497_v30 = vpop.f32.mrb[32].mxu1 }
 0x128   : > { %1047 = vst.msk [vmem:[#allocation2 + $0x158] sm:$0xff] %vm363_vm1, %v1015_v29  ;;  %v1285_v32 = vadd.f32 %v10497_v30, %v12600_v14  ;;  %v1276_v33 = vpop.f32.mrb[33].mxu1 }
 0x129   : > { %v1277_v34 = vadd.f32 %v12600_v14, %v1276_v33  ;;  %v10498_v35 = vpop.f32.mrb[34].mxu1 }
 0x12a   : > { %vm1405_vm5 = vcmp.ge.f32.partialorder %v1285_v32, 0.0  ;;  %v1437_v36 = vmul.f32 0.2, %v1285_v32  ;;  %v1288_v37 = vadd.f32 %v10498_v35, %v12600_v14  ;;  %v1279_v38 = vpop.f32.mrb[35].mxu1  ;;  %v11869_v35 = vld [vmem:[%s13705_s3 + $0xf8] sm:$0xff]  }
 0x12b   : > { %vm1403_vm6 = vcmp.ge.f32.partialorder %v1277_v34, 0.0  ;;  %v1435_v39 = vmul.f32 0.2, %v1277_v34  ;;  %v1280_v40 = vadd.f32 %v12600_v14, %v1279_v38 }
 0x12c   : > { %v1469_v41 = vsel %vm1405_vm5, %v1285_v32, %v1437_v36  ;;  %vm1406_vm7 = vcmp.ge.f32.partialorder %v1288_v37, 0.0  ;;  %v1438_v42 = vmul.f32 0.2, %v1288_v37 }
 0x12d   : > { %1502 = vst.msk [vmem:[#allocation2 + $0x1b1] sm:$0xff] %vm363_vm1, %v1469_v41  ;;  %v1467_v43 = vsel %vm1403_vm6, %v1277_v34, %v1435_v39  ;;  %vm1404_vm8 = vcmp.ge.f32.partialorder %v1280_v40, 0.0  ;;  %v1436_v44 = vmul.f32 0.2, %v1280_v40 }
 0x12e   : > { %1500 = vst.msk [vmem:[#allocation2 + $0x199] sm:$0xff] %vm363_vm1, %v1467_v43  ;;  %v1470_v45 = vsel %vm1406_vm7, %v1288_v37, %v1438_v42 }
 0x12f   : > { %1503 = vst.msk [vmem:[#allocation2 + $0x1b9] sm:$0xff] %vm363_vm1, %v1470_v45  ;;  %v1468_v46 = vsel %vm1404_vm8, %v1280_v40, %v1436_v44  ;;  %v10501_v47 = vpop.f32.mrb[36].mxu1  ;;  %v12736_v45 = vld [vmem:[%s13705_s3 + $0x100] sm:$0xff]  }
 0x130   : > { %1501 = vst.msk [vmem:[#allocation2 + $0x1a1] sm:$0xff] %vm363_vm1, %v1468_v46  ;;  %v1301_v48 = vadd.f32 %v10501_v47, %v12600_v14  ;;  %v1292_v49 = vpop.f32.mrb[37].mxu1 }
 0x131   : > { %v1293_v50 = vadd.f32 %v12600_v14, %v1292_v49  ;;  %v10502_v51 = vpop.f32.mrb[38].mxu1 }
 0x132   : > { %vm1409_vm9 = vcmp.ge.f32.partialorder %v1301_v48, 0.0  ;;  %v1441_v52 = vmul.f32 0.2, %v1301_v48  ;;  %v1304_v53 = vadd.f32 %v10502_v51, %v12600_v14  ;;  %v1295_v54 = vpop.f32.mrb[39].mxu1 }
 0x133   : > { %vm1407_vm10 = vcmp.ge.f32.partialorder %v1293_v50, 0.0  ;;  %v1439_v55 = vmul.f32 0.2, %v1293_v50  ;;  %v1296_v56 = vadd.f32 %v12600_v14, %v1295_v54 }
 0x134   : > { %v1473_v57 = vsel %vm1409_vm9, %v1301_v48, %v1441_v52  ;;  %vm1410_vm11 = vcmp.ge.f32.partialorder %v1304_v53, 0.0  ;;  %v1442_v58 = vmul.f32 0.2, %v1304_v53  ;;  %v4847_v6 = vld [vmem:[#allocation2 + $0x1b1] sm:$0xff] }
 0x135   : > { %1506 = vst.msk [vmem:[#allocation2 + $0x1e1] sm:$0xff] %vm363_vm1, %v1473_v57  ;;  %v1471_v59 = vsel %vm1407_vm10, %v1293_v50, %v1439_v55  ;;  %vm1408_vm12 = vcmp.ge.f32.partialorder %v1296_v56, 0.0  ;;  %v1440_v60 = vmul.f32 0.2, %v1296_v56  ;;  %v4845_v1 = vld [vmem:[#allocation2 + $0x199] sm:$0xff] }
 0x136   : > { %1504 = vst.msk [vmem:[#allocation2 + $0x1c9] sm:$0xff] %vm363_vm1, %v1471_v59  ;;  %v1474_v61 = vsel %vm1410_vm11, %v1304_v53, %v1442_v58  ;;  %v4848_v62 = vld [vmem:[#allocation2 + $0x1b9] sm:$0xff] }
 0x137   : > { %1507 = vst.msk [vmem:[#allocation2 + $0x1e9] sm:$0xff] %vm363_vm1, %v1474_v61  ;;  %v1472_v63 = vsel %vm1408_vm12, %v1296_v56, %v1440_v60  ;;  %v10505_v0 = vpop.f32.mrb[40].mxu1  ;;  %v4846_v2 = vld [vmem:[#allocation2 + $0x1a1] sm:$0xff]  ;;  %v4910_v9 = vpack.c.bf16 %v4848_v62, %v4847_v6 }
 0x138   : > { %1505 = vst.msk [vmem:[#allocation2 + $0x1d1] sm:$0xff] %vm363_vm1, %v1472_v63  ;;  %v1317_v3 = vadd.f32 %v10505_v0, %v12600_v14  ;;  %v1308_v4 = vpop.f32.mrb[41].mxu1  ;;  %v4909_v5 = vpack.c.bf16 %v4846_v2, %v4845_v1 }
 0x139   : > { %v1309_v7 = vadd.f32 %v12600_v14, %v1308_v4  ;;  %v10506_v8 = vpop.f32.mrb[42].mxu1 }
 0x13a   : > { %vm1413_vm13 = vcmp.ge.f32.partialorder %v1317_v3, 0.0  ;;  %v1445_v12 = vmul.f32 0.2, %v1317_v3  ;;  %v1320_v13 = vadd.f32 %v10506_v8, %v12600_v14  ;;  %v1311_v15 = vpop.f32.mrb[43].mxu1  ;;  %10851 = vmatprep.mubr.msk.bf16.mxu0 %vm363_vm1, %v4909_v5 }
 0x13b   : > { %vm1411_vm14 = vcmp.ge.f32.partialorder %v1309_v7, 0.0  ;;  %v1443_v16 = vmul.f32 0.2, %v1309_v7  ;;  %v1312_v17 = vadd.f32 %v12600_v14, %v1311_v15  ;;  %10852 = vmatmul.mubr.msk.bf16.vlgmr.msra.gmra.mrb[8].mxu0 %vm363_vm1, %v4910_v9 }
 0x13c   : > { %v1477_v18 = vsel %vm1413_vm13, %v1317_v3, %v1445_v12  ;;  %vm1414_vm15 = vcmp.ge.f32.partialorder %v1320_v13, 0.0  ;;  %v1446_v19 = vmul.f32 0.2, %v1320_v13  ;;  %10884 = vmatpush3.bf16.msra.mxu0 %v12591_v11  ;;  %v4851_v31 = vld [vmem:[#allocation2 + $0x1e1] sm:$0xff] }
 0x13d   : > { %1510 = vst.msk [vmem:[#allocation2 + $0x211] sm:$0xff] %vm363_vm1, %v1477_v18  ;;  %v1475_v20 = vsel %vm1411_vm14, %v1309_v7, %v1443_v16  ;;  %vm1412_vm0 = vcmp.ge.f32.partialorder %v1312_v17, 0.0  ;;  %v1444_v21 = vmul.f32 0.2, %v1312_v17  ;;  %10885 = vmatprep.subr.bf16.mxu0 %v11867_v10  ;;  %v4849_v27 = vld [vmem:[#allocation2 + $0x1c9] sm:$0xff] }
 0x13e   : > { %1508 = vst.msk [vmem:[#allocation2 + $0x1f9] sm:$0xff] %vm363_vm1, %v1475_v20  ;;  %v1478_v23 = vsel %vm1414_vm15, %v1320_v13, %v1446_v19  ;;  %v4852_v24 = vld [vmem:[#allocation2 + $0x1e9] sm:$0xff] }
 0x13f   : > { %1511 = vst.msk [vmem:[#allocation2 + $0x219] sm:$0xff] %vm363_vm1, %v1478_v23  ;;  %v1476_v25 = vsel %vm1412_vm0, %v1312_v17, %v1444_v21  ;;  %v10509_v26 = vpop.f32.mrb[44].mxu1  ;;  %v4850_v11 = vld [vmem:[#allocation2 + $0x1d1] sm:$0xff]  ;;  %v4912_v34 = vpack.c.bf16 %v4852_v24, %v4851_v31 }
 0x140   : > { %1509 = vst.msk [vmem:[#allocation2 + $0x201] sm:$0xff] %vm363_vm1, %v1476_v25  ;;  %v1333_v28 = vadd.f32 %v10509_v26, %v12600_v14  ;;  %v1324_v29 = vpop.f32.mrb[45].mxu1  ;;  %v4911_v30 = vpack.c.bf16 %v4850_v11, %v4849_v27  ;;  %10886 = vmatpush3.bf16.msra.mxu0 %v11867_v10 }
 0x141   : > { %v1325_v32 = vadd.f32 %v12600_v14, %v1324_v29  ;;  %v10510_v33 = vpop.f32.mrb[46].mxu1  ;;  %10887 = vmatprep.subr.bf16.mxu0 %v11868_v22 }
 0x142   : > { %vm1417_vm2 = vcmp.ge.f32.partialorder %v1333_v28, 0.0  ;;  %v1449_v36 = vmul.f32 0.2, %v1333_v28  ;;  %v1336_v37 = vadd.f32 %v10510_v33, %v12600_v14  ;;  %v1327_v38 = vpop.f32.mrb[47].mxu1  ;;  %10855 = vmatprep.mubr.msk.bf16.mxu0 %vm363_vm1, %v4911_v30 }
 0x143   : > { %vm1415_vm3 = vcmp.ge.f32.partialorder %v1325_v32, 0.0  ;;  %v1447_v39 = vmul.f32 0.2, %v1325_v32  ;;  %v1328_v40 = vadd.f32 %v12600_v14, %v1327_v38  ;;  %10856 = vmatmul.mubr.msk.bf16.gmra.mrb[12].mxu0 %vm363_vm1, %v4912_v34  ;;  %v10535_v38 = vpop.f32.mrb[0].mxu0 }
 0x144   : > { %v1481_v41 = vsel %vm1417_vm2, %v1333_v28, %v1449_v36  ;;  %vm1418_vm4 = vcmp.ge.f32.partialorder %v1336_v37, 0.0  ;;  %v1450_v42 = vmul.f32 0.2, %v1336_v37  ;;  %10888 = vmatpush3.bf16.msra.mxu0 %v11868_v22  ;;  %v4855_v55 = vld [vmem:[#allocation2 + $0x211] sm:$0xff] }
 0x145   : > { %1514 = vst.msk [vmem:[#allocation2 + $0x241] sm:$0xff] %vm363_vm1, %v1481_v41  ;;  %v1479_v43 = vsel %vm1415_vm3, %v1325_v32, %v1447_v39  ;;  %vm1416_vm5 = vcmp.ge.f32.partialorder %v1328_v40, 0.0  ;;  %v1448_v44 = vmul.f32 0.2, %v1328_v40  ;;  %10889 = vmatprep.subr.bf16.mxu0 %v11869_v35  ;;  %v4853_v50 = vld [vmem:[#allocation2 + $0x1f9] sm:$0xff] }
 0x146   : > { %1512 = vst.msk [vmem:[#allocation2 + $0x229] sm:$0xff] %vm363_vm1, %v1479_v43  ;;  %v1482_v46 = vsel %vm1418_vm4, %v1336_v37, %v1450_v42  ;;  %v4856_v47 = vld [vmem:[#allocation2 + $0x219] sm:$0xff]  ;;  %v1758_v43 = vpop.f32.mrb[1].mxu0 }
 0x147   : > { %1515 = vst.msk [vmem:[#allocation2 + $0x249] sm:$0xff] %vm363_vm1, %v1482_v46  ;;  %v1480_v48 = vsel %vm1416_vm5, %v1328_v40, %v1448_v44  ;;  %v10513_v49 = vpop.f32.mrb[48].mxu1  ;;  %v4854_v51 = vld [vmem:[#allocation2 + $0x201] sm:$0xff]  ;;  %v4914_v58 = vpack.c.bf16 %v4856_v47, %v4855_v55  ;;  %v12766_v37 = vld [vmem:[%s13704_s2] ss:$0 sm:$0xff] }
 0x148   : > { %1513 = vst.msk [vmem:[#allocation2 + $0x231] sm:$0xff] %vm363_vm1, %v1480_v48  ;;  %v1349_v52 = vadd.f32 %v10513_v49, %v12600_v14  ;;  %v1340_v53 = vpop.f32.mrb[49].mxu1  ;;  %v4913_v54 = vpack.c.bf16 %v4854_v51, %v4853_v50  ;;  %10890 = vmatpush3.bf16.msra.mxu0 %v11869_v35  ;;  %v1767_v42 = vadd.f32 %v10535_v38, %v12766_v37  ;;  %v12773_v44 = vld [vmem:[%s13705_s3 + $0x20] sm:$0xff]   ;;  %v10536_v50 = vpop.f32.mrb[2].mxu0 }
 0x149   : > { %v1341_v56 = vadd.f32 %v12600_v14, %v1340_v53  ;;  %v10514_v57 = vpop.f32.mrb[50].mxu1  ;;  %10923 = vmatprep.subr.bf16.mxu0 %v12736_v45  ;;  %v1759_v49 = vadd.f32 %v12766_v37, %v1758_v43  ;;  %v1761_v53 = vpop.f32.mrb[3].mxu0  ;;  %10643 = vmatprep.subr.bf16.mxu1 %v12773_v44 }
 0x14a   : > { %vm1421_vm6 = vcmp.ge.f32.partialorder %v1349_v52, 0.0  ;;  %v1453_v59 = vmul.f32 0.2, %v1349_v52  ;;  %v1352_v60 = vadd.f32 %v10514_v57, %v12600_v14  ;;  %v1343_v61 = vpop.f32.mrb[51].mxu1  ;;  %10859 = vmatprep.mubr.msk.bf16.mxu0 %vm363_vm1, %v4913_v54  ;;  %vm1887_vm0 = vcmp.ge.f32.partialorder %v1767_v42, 0.0 }
 0x14b   : > { %vm1419_vm7 = vcmp.ge.f32.partialorder %v1341_v56, 0.0  ;;  %v1451_v62 = vmul.f32 0.2, %v1341_v56  ;;  %v1344_v63 = vadd.f32 %v12600_v14, %v1343_v61  ;;  %10860 = vmatmul.mubr.msk.bf16.gmra.mrb[16].mxu0 %vm363_vm1, %v4914_v58  ;;  %vm1885_vm4 = vcmp.ge.f32.partialorder %v1759_v49, 0.0 }
 0x14c   : > { %v1485_v0 = vsel %vm1421_vm6, %v1349_v52, %v1453_v59  ;;  %vm1422_vm8 = vcmp.ge.f32.partialorder %v1352_v60, 0.0  ;;  %v1454_v1 = vmul.f32 0.2, %v1352_v60  ;;  %v4859_v15 = vld [vmem:[#allocation2 + $0x241] sm:$0xff] }
 0x14d   : > { %1518 = vst.msk [vmem:[#allocation2 + $0x271] sm:$0xff] %vm363_vm1, %v1485_v0  ;;  %v1483_v2 = vsel %vm1419_vm7, %v1341_v56, %v1451_v62  ;;  %vm1420_vm9 = vcmp.ge.f32.partialorder %v1344_v63, 0.0  ;;  %v1452_v3 = vmul.f32 0.2, %v1344_v63  ;;  %v4857_v8 = vld [vmem:[#allocation2 + $0x229] sm:$0xff]  ;;  %v1770_v0 = vadd.f32 %v10536_v50, %v12766_v37 }
 0x14e   : > { %1516 = vst.msk [vmem:[#allocation2 + $0x259] sm:$0xff] %vm363_vm1, %v1483_v2  ;;  %v1486_v4 = vsel %vm1422_vm8, %v1352_v60, %v1454_v1  ;;  %v4860_v5 = vld [vmem:[#allocation2 + $0x249] sm:$0xff]  ;;  %v1919_v56 = vmul.f32 0.2, %v1767_v42 }
 0x14f   : > { %1519 = vst.msk [vmem:[#allocation2 + $0x279] sm:$0xff] %vm363_vm1, %v1486_v4  ;;  %v1484_v6 = vsel %vm1420_vm9, %v1344_v63, %v1452_v3  ;;  %v10517_v7 = vpop.f32.mrb[52].mxu1  ;;  %v4858_v9 = vld [vmem:[#allocation2 + $0x231] sm:$0xff]  ;;  %v4916_v18 = vpack.c.bf16 %v4860_v5, %v4859_v15  ;;  %v1917_v63 = vmul.f32 0.2, %v1759_v49  ;;  %vm1888_vm5 = vcmp.ge.f32.partialorder %v1770_v0, 0.0 }
 0x150   : > { %1517 = vst.msk [vmem:[#allocation2 + $0x261] sm:$0xff] %vm363_vm1, %v1484_v6  ;;  %v1365_v10 = vadd.f32 %v10517_v7, %v12600_v14  ;;  %v1356_v12 = vpop.f32.mrb[53].mxu1  ;;  %v4915_v13 = vpack.c.bf16 %v4858_v9, %v4857_v8  ;;  %v1951_v62 = vsel %vm1887_vm0, %v1767_v42, %v1919_v56  ;;  %v1762_v6 = vadd.f32 %v12766_v37, %v1761_v53  ;;  %v10539_v7 = vpop.f32.mrb[4].mxu0 }
 0x151   : > { %v1357_v16 = vadd.f32 %v12600_v14, %v1356_v12  ;;  %v10518_v17 = vpop.f32.mrb[54].mxu1  ;;  %1984 = vst.msk [vmem:[#allocation2 + $0x360] sm:$0xff] %vm363_vm1, %v1951_v62  ;;  %v1949_v12 = vsel %vm1885_vm4, %v1759_v49, %v1917_v63 }
 0x152   : > { %vm1425_vm10 = vcmp.ge.f32.partialorder %v1365_v10, 0.0  ;;  %v1457_v19 = vmul.f32 0.2, %v1365_v10  ;;  %v1368_v20 = vadd.f32 %v10518_v17, %v12600_v14  ;;  %v1359_v21 = vpop.f32.mrb[55].mxu1  ;;  %10863 = vmatprep.mubr.msk.bf16.mxu0 %vm363_vm1, %v4915_v13  ;;  %v1774_v13 = vpop.f32.mrb[5].mxu0  ;;  %1982 = vst.msk [vmem:[#allocation2 + $0x348] sm:$0xff] %vm363_vm1, %v1949_v12 }
 0x153   : > { %vm1423_vm11 = vcmp.ge.f32.partialorder %v1357_v16, 0.0  ;;  %v1455_v22 = vmul.f32 0.2, %v1357_v16  ;;  %v1360_v23 = vadd.f32 %v12600_v14, %v1359_v21  ;;  %10864 = vmatmul.mubr.msk.bf16.gmra.mrb[20].mxu0 %vm363_vm1, %v4916_v18  ;;  %v1920_v17 = vmul.f32 0.2, %v1770_v0 }
 0x154   : > { %v1489_v24 = vsel %vm1425_vm10, %v1365_v10, %v1457_v19  ;;  %vm1426_vm12 = vcmp.ge.f32.partialorder %v1368_v20, 0.0  ;;  %v1458_v25 = vmul.f32 0.2, %v1368_v20  ;;  %v4863_v36 = vld [vmem:[#allocation2 + $0x271] sm:$0xff]  ;;  %vm1886_vm6 = vcmp.ge.f32.partialorder %v1762_v6, 0.0 }
 0x155   : > { %1522 = vst.msk [vmem:[#allocation2 + $0x2a1] sm:$0xff] %vm363_vm1, %v1489_v24  ;;  %v1487_v26 = vsel %vm1423_vm11, %v1357_v16, %v1455_v22  ;;  %vm1424_vm13 = vcmp.ge.f32.partialorder %v1360_v23, 0.0  ;;  %v1456_v27 = vmul.f32 0.2, %v1360_v23  ;;  %v4861_v31 = vld [vmem:[#allocation2 + $0x259] sm:$0xff]  ;;  %v1783_v22 = vadd.f32 %v10539_v7, %v12766_v37  ;;  %v5232_v7 = vld [vmem:[#allocation2 + $0x9] sm:$0xff] }
 0x156   : > { %1520 = vst.msk [vmem:[#allocation2 + $0x289] sm:$0xff] %vm363_vm1, %v1487_v26  ;;  %v1490_v11 = vsel %vm1426_vm12, %v1368_v20, %v1458_v25  ;;  %v4864_v28 = vld [vmem:[#allocation2 + $0x279] sm:$0xff]  ;;  %v1918_v18 = vmul.f32 0.2, %v1762_v6  ;;  %v1952_v26 = vsel %vm1888_vm5, %v1770_v0, %v1920_v17 }
 0x157   : > { %1523 = vst.msk [vmem:[#allocation2 + $0x2a9] sm:$0xff] %vm363_vm1, %v1490_v11  ;;  %v1488_v29 = vsel %vm1424_vm13, %v1360_v23, %v1456_v27  ;;  %v10521_v30 = vpop.f32.mrb[56].mxu1  ;;  %v4862_v32 = vld [vmem:[#allocation2 + $0x261] sm:$0xff]  ;;  %v4918_v41 = vpack.c.bf16 %v4864_v28, %v4863_v36  ;;  %v10540_v23 = vpop.f32.mrb[6].mxu0  ;;  %1985 = vst.msk [vmem:[#allocation2 + $0x368] sm:$0xff] %vm363_vm1, %v1952_v26  ;;  %vm1891_vm11 = vcmp.ge.f32.partialorder %v1783_v22, 0.0 }
 0x158   : > { %1521 = vst.msk [vmem:[#allocation2 + $0x291] sm:$0xff] %vm363_vm1, %v1488_v29  ;;  %v1381_v33 = vadd.f32 %v10521_v30, %v12600_v14  ;;  %v1372_v34 = vpop.f32.mrb[57].mxu1  ;;  %v4917_v35 = vpack.c.bf16 %v4862_v32, %v4861_v31  ;;  %v1777_v27 = vpop.f32.mrb[7].mxu0  ;;  %v1950_v29 = vsel %vm1886_vm6, %v1762_v6, %v1918_v18  ;;  %v1786_v36 = vadd.f32 %v10540_v23, %v12766_v37 }
 0x159   : > { %v1373_v39 = vadd.f32 %v12600_v14, %v1372_v34  ;;  %v10522_v40 = vpop.f32.mrb[58].mxu1  ;;  %1983 = vst.msk [vmem:[#allocation2 + $0x350] sm:$0xff] %vm363_vm1, %v1950_v29  ;;  %v1923_v34 = vmul.f32 0.2, %v1783_v22  ;;  %v1778_v43 = vadd.f32 %v12766_v37, %v1777_v27  ;;  %v5233_v29 = vld [vmem:[#allocation2 + $0x19] sm:$0xff] }
 0x15a   : > { %vm1429_vm14 = vcmp.ge.f32.partialorder %v1381_v33, 0.0  ;;  %v1461_v46 = vmul.f32 0.2, %v1381_v33  ;;  %v1384_v47 = vadd.f32 %v10522_v40, %v12600_v14  ;;  %v1375_v48 = vpop.f32.mrb[59].mxu1  ;;  %10867 = vmatprep.mubr.msk.bf16.mxu0 %vm363_vm1, %v4917_v35  ;;  %v1775_v35 = vadd.f32 %v12766_v37, %v1774_v13 }
 0x15b   : > { %vm1427_vm15 = vcmp.ge.f32.partialorder %v1373_v39, 0.0  ;;  %v1459_v51 = vmul.f32 0.2, %v1373_v39  ;;  %v1376_v52 = vadd.f32 %v12600_v14, %v1375_v48  ;;  %10868 = vmatmul.mubr.msk.bf16.gmra.mrb[24].mxu0 %vm363_vm1, %v4918_v41  ;;  %v1955_v49 = vsel %vm1891_vm11, %v1783_v22, %v1923_v34 }
 0x15c   : > { %v1493_v54 = vsel %vm1429_vm14, %v1381_v33, %v1461_v46  ;;  %vm1430_vm2 = vcmp.ge.f32.partialorder %v1384_v47, 0.0  ;;  %v1462_v55 = vmul.f32 0.2, %v1384_v47  ;;  %v4867_v60 = vld [vmem:[#allocation2 + $0x2a1] sm:$0xff]  ;;  %vm1889_vm12 = vcmp.ge.f32.partialorder %v1775_v35, 0.0  ;;  %1988 = vst.msk [vmem:[#allocation2 + $0x390] sm:$0xff] %vm363_vm1, %v1955_v49 }
 0x15d   : > { %1526 = vst.msk [vmem:[#allocation2 + $0x2d1] sm:$0xff] %vm363_vm1, %v1493_v54  ;;  %v1491_v57 = vsel %vm1427_vm15, %v1373_v39, %v1459_v51  ;;  %vm1428_vm3 = vcmp.ge.f32.partialorder %v1376_v52, 0.0  ;;  %v1460_v58 = vmul.f32 0.2, %v1376_v52  ;;  %v4865_v3 = vld [vmem:[#allocation2 + $0x289] sm:$0xff]  ;;  %vm1892_vm13 = vcmp.ge.f32.partialorder %v1786_v36, 0.0 }
 0x15e   : > { %1524 = vst.msk [vmem:[#allocation2 + $0x2b9] sm:$0xff] %vm363_vm1, %v1491_v57  ;;  %v1494_v59 = vsel %vm1430_vm2, %v1384_v47, %v1462_v55  ;;  %v4868_v61 = vld [vmem:[#allocation2 + $0x2a9] sm:$0xff]  ;;  %v1924_v53 = vmul.f32 0.2, %v1786_v36  ;;  %vm1890_vm15 = vcmp.ge.f32.partialorder %v1778_v43, 0.0 }
 0x15f   : > { %1527 = vst.msk [vmem:[#allocation2 + $0x2d9] sm:$0xff] %vm363_vm1, %v1494_v59  ;;  %v1492_v1 = vsel %vm1428_vm3, %v1376_v52, %v1460_v58  ;;  %v10525_v2 = vpop.f32.mrb[60].mxu1  ;;  %v4866_v4 = vld [vmem:[#allocation2 + $0x291] sm:$0xff]  ;;  %v4920_v5 = vpack.c.bf16 %v4868_v61, %v4867_v60  ;;  %v1921_v52 = vmul.f32 0.2, %v1775_v35 }
 0x160   : > { %1525 = vst.msk [vmem:[#allocation2 + $0x2c1] sm:$0xff] %vm363_vm1, %v1492_v1  ;;  %v1397_v8 = vadd.f32 %v10525_v2, %v12600_v14  ;;  %v1388_v9 = vpop.f32.mrb[61].mxu1  ;;  %v4919_v10 = vpack.c.bf16 %v4866_v4, %v4865_v3  ;;  %v1956_v62 = vsel %vm1892_vm13, %v1786_v36, %v1924_v53  ;;  %v1922_v1 = vmul.f32 0.2, %v1778_v43  ;;  %v5231_v4 = vld [vmem:[#allocation2 + $0x1] sm:$0xff] }
 0x161   : > { %v1389_v15 = vadd.f32 %v12600_v14, %v1388_v9  ;;  %v10526_v16 = vpop.f32.mrb[62].mxu1  ;;  %v1953_v59 = vsel %vm1889_vm12, %v1775_v35, %v1921_v52  ;;  %1989 = vst.msk [vmem:[#allocation2 + $0x398] sm:$0xff] %vm363_vm1, %v1956_v62 }
 0x162   : > { %vm1433_vm7 = vcmp.ge.f32.partialorder %v1397_v8, 0.0  ;;  %v1465_v19 = vmul.f32 0.2, %v1397_v8  ;;  %v1400_v20 = vadd.f32 %v10526_v16, %v12600_v14  ;;  %v1391_v21 = vpop.f32.mrb[63].mxu1  ;;  %10871 = vmatprep.mubr.msk.bf16.mxu0 %vm363_vm1, %v4919_v10  ;;  %1986 = vst.msk [vmem:[#allocation2 + $0x378] sm:$0xff] %vm363_vm1, %v1953_v59  ;;  %v1954_v10 = vsel %vm1890_vm15, %v1778_v43, %v1922_v1  ;;  %v5240_v59 = vld [vmem:[#allocation2 + $0x69] sm:$0xff] }
 0x163   : > { %vm1431_vm8 = vcmp.ge.f32.partialorder %v1389_v15, 0.0  ;;  %v1463_v24 = vmul.f32 0.2, %v1389_v15  ;;  %v1392_v25 = vadd.f32 %v12600_v14, %v1391_v21  ;;  %10872 = vmatmul.mubr.msk.bf16.gmra.mrb[28].mxu0 %vm363_vm1, %v4920_v5  ;;  %1987 = vst.msk [vmem:[#allocation2 + $0x380] sm:$0xff] %vm363_vm1, %v1954_v10 }
 0x164   : > { %v1497_v11 = vsel %vm1433_vm7, %v1397_v8, %v1465_v19  ;;  %vm1434_vm9 = vcmp.ge.f32.partialorder %v1400_v20, 0.0  ;;  %v1466_v28 = vmul.f32 0.2, %v1400_v20  ;;  %v4871_v32 = vld [vmem:[#allocation2 + $0x2d1] sm:$0xff] }
 0x165   : > { %1530 = vst.msk [vmem:[#allocation2 + $0x301] sm:$0xff] %vm363_vm1, %v1497_v11  ;;  %v1495_v30 = vsel %vm1431_vm8, %v1389_v15, %v1463_v24  ;;  %vm1432_vm10 = vcmp.ge.f32.partialorder %v1392_v25, 0.0  ;;  %v1464_v31 = vmul.f32 0.2, %v1392_v25  ;;  %v4869_v39 = vld [vmem:[#allocation2 + $0x2b9] sm:$0xff] }
 0x166   : > { %1528 = vst.msk [vmem:[#allocation2 + $0x2e9] sm:$0xff] %vm363_vm1, %v1495_v30  ;;  %v1498_v14 = vsel %vm1434_vm9, %v1400_v20, %v1466_v28  ;;  %v4872_v33 = vld [vmem:[#allocation2 + $0x2d9] sm:$0xff]  ;;  %v5295_v20 = vpack.c.bf16 %v5232_v7, %v5231_v4  ;;  %v5234_v30 = vld [vmem:[#allocation2 + $0x21] sm:$0xff] }
 0x167   : > { %1531 = vst.msk [vmem:[#allocation2 + $0x309] sm:$0xff] %vm363_vm1, %v1498_v14  ;;  %v1496_v38 = vsel %vm1432_vm10, %v1392_v25, %v1464_v31  ;;  %v4870_v40 = vld [vmem:[#allocation2 + $0x2c1] sm:$0xff]  ;;  %v4922_v41 = vpack.c.bf16 %v4872_v33, %v4871_v32  ;;  %v10543_v42 = vpop.f32.mrb[64].mxu1  ;;  %v5235_v14 = vld [vmem:[#allocation2 + $0x31] sm:$0xff]  ;;  %v5236_v32 = vld [vmem:[#allocation2 + $0x39] sm:$0xff] }
 0x168   : > { %1529 = vst.msk [vmem:[#allocation2 + $0x2f1] sm:$0xff] %vm363_vm1, %v1496_v38  ;;  %v4921_v46 = vpack.c.bf16 %v4870_v40, %v4869_v39  ;;  %v1799_v47 = vadd.f32 %v10543_v42, %v12766_v37  ;;  %v1790_v48 = vpop.f32.mrb[65].mxu1  ;;  %v5296_v38 = vpack.c.bf16 %v5234_v30, %v5233_v29  ;;  %v5297_v42 = vpack.c.bf16 %v5236_v32, %v5235_v14 }
 0x169   : > { %v1791_v50 = vadd.f32 %v12766_v37, %v1790_v48  ;;  %v10544_v51 = vpop.f32.mrb[66].mxu1 }
 0x16a   : > { %10875 = vmatprep.mubr.msk.bf16.mxu0 %vm363_vm1, %v4921_v46  ;;  %vm1895_vm14 = vcmp.ge.f32.partialorder %v1799_v47, 0.0  ;;  %v1927_v54 = vmul.f32 0.2, %v1799_v47  ;;  %v1802_v55 = vadd.f32 %v10544_v51, %v12766_v37  ;;  %v1793_v56 = vpop.f32.mrb[67].mxu1 }
 0x16b   : > { %10876 = vmatmul.mubr.msk.bf16.gmra.mrb[32].mxu0 %vm363_vm1, %v4922_v41  ;;  %vm1893_vm0 = vcmp.ge.f32.partialorder %v1791_v50, 0.0  ;;  %v1925_v57 = vmul.f32 0.2, %v1791_v50  ;;  %v1794_v58 = vadd.f32 %v12766_v37, %v1793_v56  ;;  %v11875_v41 = vld [vmem:[%s13705_s3 + $0x108] sm:$0xff]   ;;  %v5238_v56 = vld [vmem:[#allocation2 + $0x51] sm:$0xff] }
 0x16c   : > { %v1959_v60 = vsel %vm1895_vm14, %v1799_v47, %v1927_v54  ;;  %vm1896_vm2 = vcmp.ge.f32.partialorder %v1802_v55, 0.0  ;;  %v1928_v61 = vmul.f32 0.2, %v1802_v55  ;;  %v4875_v13 = vld [vmem:[#allocation2 + $0x301] sm:$0xff]  ;;  %v11876_v54 = vld [vmem:[%s13705_s3 + $0x110] sm:$0xff]  }
 0x16d   : > { %1992 = vst.msk [vmem:[#allocation2 + $0x3c0] sm:$0xff] %vm363_vm1, %v1959_v60  ;;  %v1957_v63 = vsel %vm1893_vm0, %v1791_v50, %v1925_v57  ;;  %vm1894_vm3 = vcmp.ge.f32.partialorder %v1794_v58, 0.0  ;;  %v1926_v0 = vmul.f32 0.2, %v1794_v58  ;;  %v4873_v5 = vld [vmem:[#allocation2 + $0x2e9] sm:$0xff] }
 0x16e   : > { %1990 = vst.msk [vmem:[#allocation2 + $0x3a8] sm:$0xff] %vm363_vm1, %v1957_v63  ;;  %v4876_v2 = vld [vmem:[#allocation2 + $0x309] sm:$0xff]  ;;  %v1960_v3 = vsel %vm1896_vm2, %v1802_v55, %v1928_v61 }
 0x16f   : > { %v4874_v6 = vld [vmem:[#allocation2 + $0x2f1] sm:$0xff]  ;;  %1993 = vst.msk [vmem:[#allocation2 + $0x3c8] sm:$0xff] %vm363_vm1, %v1960_v3  ;;  %v1958_v8 = vsel %vm1894_vm3, %v1794_v58, %v1926_v0  ;;  %v10547_v9 = vpop.f32.mrb[68].mxu1  ;;  %v4924_v17 = vpack.c.bf16 %v4876_v2, %v4875_v13  ;;  %v5237_v55 = vld [vmem:[#allocation2 + $0x49] sm:$0xff]  ;;  %v5239_v58 = vld [vmem:[#allocation2 + $0x61] sm:$0xff] }
 0x170   : > { %v4923_v12 = vpack.c.bf16 %v4874_v6, %v4873_v5  ;;  %1991 = vst.msk [vmem:[#allocation2 + $0x3b0] sm:$0xff] %vm363_vm1, %v1958_v8  ;;  %v1815_v15 = vadd.f32 %v10547_v9, %v12766_v37  ;;  %v1806_v16 = vpop.f32.mrb[69].mxu1  ;;  %v5298_v63 = vpack.c.bf16 %v5238_v56, %v5237_v55  ;;  %v11877_v2 = vld [vmem:[%s13705_s3 + $0x118] sm:$0xff]   ;;  %v5299_v3 = vpack.c.bf16 %v5240_v59, %v5239_v58 }
 0x171   : > { %v1807_v18 = vadd.f32 %v12766_v37, %v1806_v16  ;;  %v10548_v19 = vpop.f32.mrb[70].mxu1  ;;  %v5241_v16 = vld [vmem:[#allocation2 + $0x79] sm:$0xff] }
 0x172   : > { %10879 = vmatprep.mubr.msk.bf16.mxu0 %vm363_vm1, %v4923_v12  ;;  %vm1899_vm4 = vcmp.ge.f32.partialorder %v1815_v15, 0.0  ;;  %v1931_v21 = vmul.f32 0.2, %v1815_v15  ;;  %v1818_v22 = vadd.f32 %v10548_v19, %v12766_v37  ;;  %v1809_v23 = vpop.f32.mrb[71].mxu1  ;;  %v5243_v19 = vld [vmem:[#allocation2 + $0x91] sm:$0xff] }
 0x173   : > { %10880 = vmatmul.mubr.msk.bf16.gmra.mrb[36].mxu0 %vm363_vm1, %v4924_v17  ;;  %vm1897_vm5 = vcmp.ge.f32.partialorder %v1807_v18, 0.0  ;;  %v1929_v24 = vmul.f32 0.2, %v1807_v18  ;;  %v1810_v25 = vadd.f32 %v12766_v37, %v1809_v23  ;;  %v5242_v17 = vld [vmem:[#allocation2 + $0x81] sm:$0xff] }
 0x174   : > { %10891 = vmatprep.mubr.msk.bf16.mxu0 %vm363_vm1, %v5295_v20  ;;  %v1963_v26 = vsel %vm1899_vm4, %v1815_v15, %v1931_v21  ;;  %vm1900_vm6 = vcmp.ge.f32.partialorder %v1818_v22, 0.0  ;;  %v1932_v27 = vmul.f32 0.2, %v1818_v22  ;;  %v12868_v15 = vld [vmem:[%s13705_s3 + $0x120] sm:$0xff]  }
 0x175   : > { %1996 = vst.msk [vmem:[#allocation2 + $0x3f0] sm:$0xff] %vm363_vm1, %v1963_v26  ;;  %v1961_v11 = vsel %vm1897_vm5, %v1807_v18, %v1929_v24  ;;  %vm1898_vm7 = vcmp.ge.f32.partialorder %v1810_v25, 0.0  ;;  %v1930_v28 = vmul.f32 0.2, %v1810_v25  ;;  %v5244_v20 = vld [vmem:[#allocation2 + $0x99] sm:$0xff] }
 0x176   : > { %1994 = vst.msk [vmem:[#allocation2 + $0x3d8] sm:$0xff] %vm363_vm1, %v1961_v11  ;;  %v1964_v31 = vsel %vm1900_vm6, %v1818_v22, %v1932_v27  ;;  %v5301_v11 = vpack.c.bf16 %v5244_v20, %v5243_v19 }
 0x177   : > { %1997 = vst.msk [vmem:[#allocation2 + $0x3f8] sm:$0xff] %vm363_vm1, %v1964_v31  ;;  %v1962_v33 = vsel %vm1898_vm7, %v1810_v25, %v1930_v28  ;;  %v10551_v34 = vpop.f32.mrb[72].mxu1  ;;  %v5300_v25 = vpack.c.bf16 %v5242_v17, %v5241_v16 }
 0x178   : > { %1995 = vst.msk [vmem:[#allocation2 + $0x3e0] sm:$0xff] %vm363_vm1, %v1962_v33  ;;  %v1831_v35 = vadd.f32 %v10551_v34, %v12766_v37  ;;  %v1822_v36 = vpop.f32.mrb[73].mxu1 }
 0x179   : > { %v1823_v39 = vadd.f32 %v12766_v37, %v1822_v36  ;;  %v10552_v40 = vpop.f32.mrb[74].mxu1 }
 0x17a   : > { %vm1903_vm8 = vcmp.ge.f32.partialorder %v1831_v35, 0.0  ;;  %v1935_v43 = vmul.f32 0.2, %v1831_v35  ;;  %v1834_v46 = vadd.f32 %v10552_v40, %v12766_v37  ;;  %v1825_v47 = vpop.f32.mrb[75].mxu1 }
 0x17b   : > { %10892 = vmatmul.mubr.msk.bf16.vlgmr.msra.gmra.mrb[8].mxu0 %vm363_vm1, %v5296_v38  ;;  %vm1901_vm9 = vcmp.ge.f32.partialorder %v1823_v39, 0.0  ;;  %v1933_v48 = vmul.f32 0.2, %v1823_v39  ;;  %v1826_v49 = vadd.f32 %v12766_v37, %v1825_v47  ;;  %v5245_v38 = vld [vmem:[#allocation2 + $0xa9] sm:$0xff] }
 0x17c   : > { %10895 = vmatprep.mubr.msk.bf16.mxu0 %vm363_vm1, %v5297_v42  ;;  %v1967_v50 = vsel %vm1903_vm8, %v1831_v35, %v1935_v43  ;;  %vm1904_vm10 = vcmp.ge.f32.partialorder %v1834_v46, 0.0  ;;  %v1936_v51 = vmul.f32 0.2, %v1834_v46  ;;  %10924 = vmatpush3.bf16.msra.mxu0 %v12736_v45  ;;  %v5247_v42 = vld [vmem:[#allocation2 + $0xc1] sm:$0xff]  ;;  %v5248_v43 = vld [vmem:[#allocation2 + $0xc9] sm:$0xff] }
 0x17d   : > { %2000 = vst.msk [vmem:[#allocation2 + $0x420] sm:$0xff] %vm363_vm1, %v1967_v50  ;;  %v1965_v52 = vsel %vm1901_vm9, %v1823_v39, %v1933_v48  ;;  %vm1902_vm11 = vcmp.ge.f32.partialorder %v1826_v49, 0.0  ;;  %v1934_v53 = vmul.f32 0.2, %v1826_v49  ;;  %10925 = vmatprep.subr.bf16.mxu0 %v11875_v41  ;;  %v5246_v39 = vld [vmem:[#allocation2 + $0xb1] sm:$0xff] }
 0x17e   : > { %1998 = vst.msk [vmem:[#allocation2 + $0x408] sm:$0xff] %vm363_vm1, %v1965_v52  ;;  %v1968_v57 = vsel %vm1904_vm10, %v1834_v46, %v1936_v51  ;;  %v5302_v48 = vpack.c.bf16 %v5246_v39, %v5245_v38  ;;  %v5303_v52 = vpack.c.bf16 %v5248_v43, %v5247_v42 }
 0x17f   : > { %2001 = vst.msk [vmem:[#allocation2 + $0x428] sm:$0xff] %vm363_vm1, %v1968_v57  ;;  %v1966_v45 = vsel %vm1902_vm11, %v1826_v49, %v1934_v53  ;;  %v10555_v60 = vpop.f32.mrb[76].mxu1 }
 0x180   : > { %1999 = vst.msk [vmem:[#allocation2 + $0x410] sm:$0xff] %vm363_vm1, %v1966_v45  ;;  %v1847_v61 = vadd.f32 %v10555_v60, %v12766_v37  ;;  %v1838_v62 = vpop.f32.mrb[77].mxu1  ;;  %10926 = vmatpush3.bf16.msra.mxu0 %v11875_v41 }
 0x181   : > { %v1839_v0 = vadd.f32 %v12766_v37, %v1838_v62  ;;  %v10556_v1 = vpop.f32.mrb[78].mxu1  ;;  %10927 = vmatprep.subr.bf16.mxu0 %v11876_v54  ;;  %v5250_v62 = vld [vmem:[#allocation2 + $0xe1] sm:$0xff] }
 0x182   : > { %vm1907_vm12 = vcmp.ge.f32.partialorder %v1847_v61, 0.0  ;;  %v1939_v4 = vmul.f32 0.2, %v1847_v61  ;;  %v1850_v5 = vadd.f32 %v10556_v1, %v12766_v37  ;;  %v1841_v6 = vpop.f32.mrb[79].mxu1  ;;  %v5251_v1 = vld [vmem:[#allocation2 + $0xf1] sm:$0xff] }
 0x183   : > { %10896 = vmatmul.mubr.msk.bf16.gmra.mrb[12].mxu0 %vm363_vm1, %v5298_v63  ;;  %vm1905_vm13 = vcmp.ge.f32.partialorder %v1839_v0, 0.0  ;;  %v1937_v7 = vmul.f32 0.2, %v1839_v0  ;;  %v1842_v8 = vadd.f32 %v12766_v37, %v1841_v6 }
 0x184   : > { %10899 = vmatprep.mubr.msk.bf16.mxu0 %vm363_vm1, %v5299_v3  ;;  %v1971_v9 = vsel %vm1907_vm12, %v1847_v61, %v1939_v4  ;;  %vm1908_vm14 = vcmp.ge.f32.partialorder %v1850_v5, 0.0  ;;  %v1940_v10 = vmul.f32 0.2, %v1850_v5  ;;  %10928 = vmatpush3.bf16.msra.mxu0 %v11876_v54  ;;  %v5249_v61 = vld [vmem:[#allocation2 + $0xd9] sm:$0xff] }
 0x185   : > { %2004 = vst.msk [vmem:[#allocation2 + $0x450] sm:$0xff] %vm363_vm1, %v1971_v9  ;;  %v1969_v12 = vsel %vm1905_vm13, %v1839_v0, %v1937_v7  ;;  %vm1906_vm15 = vcmp.ge.f32.partialorder %v1842_v8, 0.0  ;;  %v1938_v13 = vmul.f32 0.2, %v1842_v8  ;;  %10929 = vmatprep.subr.bf16.mxu0 %v11877_v2  ;;  %v5304_v7 = vpack.c.bf16 %v5250_v62, %v5249_v61  ;;  %v11880_v61 = vld [vmem:[%s13705_s3 + $0x28] sm:$0xff]  }
 0x186   : > { %2002 = vst.msk [vmem:[#allocation2 + $0x438] sm:$0xff] %vm363_vm1, %v1969_v12  ;;  %v1972_v18 = vsel %vm1908_vm14, %v1850_v5, %v1940_v10 }
 0x187   : > { %2005 = vst.msk [vmem:[#allocation2 + $0x458] sm:$0xff] %vm363_vm1, %v1972_v18  ;;  %v1970_v21 = vsel %vm1906_vm15, %v1842_v8, %v1938_v13  ;;  %v10559_v22 = vpop.f32.mrb[80].mxu1 }
 0x188   : > { %2003 = vst.msk [vmem:[#allocation2 + $0x440] sm:$0xff] %vm363_vm1, %v1970_v21  ;;  %v1863_v23 = vadd.f32 %v10559_v22, %v12766_v37  ;;  %v1854_v24 = vpop.f32.mrb[81].mxu1  ;;  %10930 = vmatpush3.bf16.msra.mxu0 %v11877_v2  ;;  %v5252_v2 = vld [vmem:[#allocation2 + $0xf9] sm:$0xff]  ;;  %v5253_v22 = vld [vmem:[#allocation2 + $0x109] sm:$0xff] }
 0x189   : > { %v1855_v26 = vadd.f32 %v12766_v37, %v1854_v24  ;;  %v10560_v27 = vpop.f32.mrb[82].mxu1  ;;  %10963 = vmatprep.subr.bf16.mxu0 %v12868_v15  ;;  %v5305_v12 = vpack.c.bf16 %v5252_v2, %v5251_v1 }
 0x18a   : > { %vm1911_vm0 = vcmp.ge.f32.partialorder %v1863_v23, 0.0  ;;  %v1943_v28 = vmul.f32 0.2, %v1863_v23  ;;  %v1866_v29 = vadd.f32 %v10560_v27, %v12766_v37  ;;  %v1857_v30 = vpop.f32.mrb[83].mxu1  ;;  %v5256_v27 = vld [vmem:[#allocation2 + $0x129] sm:$0xff] }
 0x18b   : > { %10900 = vmatmul.mubr.msk.bf16.gmra.mrb[16].mxu0 %vm363_vm1, %v5300_v25  ;;  %vm1909_vm2 = vcmp.ge.f32.partialorder %v1855_v26, 0.0  ;;  %v1941_v31 = vmul.f32 0.2, %v1855_v26  ;;  %v1858_v14 = vadd.f32 %v12766_v37, %v1857_v30 }
 0x18c   : > { %10903 = vmatprep.mubr.msk.bf16.mxu0 %vm363_vm1, %v5301_v11  ;;  %v1975_v32 = vsel %vm1911_vm0, %v1863_v23, %v1943_v28  ;;  %vm1912_vm3 = vcmp.ge.f32.partialorder %v1866_v29, 0.0  ;;  %v1944_v33 = vmul.f32 0.2, %v1866_v29  ;;  %v5254_v23 = vld [vmem:[#allocation2 + $0x111] sm:$0xff] }
 0x18d   : > { %2008 = vst.msk [vmem:[#allocation2 + $0x480] sm:$0xff] %vm363_vm1, %v1975_v32  ;;  %v1973_v34 = vsel %vm1909_vm2, %v1855_v26, %v1941_v31  ;;  %vm1910_vm4 = vcmp.ge.f32.partialorder %v1858_v14, 0.0  ;;  %v1942_v35 = vmul.f32 0.2, %v1858_v14  ;;  %v5255_v26 = vld [vmem:[#allocation2 + $0x121] sm:$0xff]  ;;  %v5306_v31 = vpack.c.bf16 %v5254_v23, %v5253_v22 }
 0x18e   : > { %2006 = vst.msk [vmem:[#allocation2 + $0x468] sm:$0xff] %vm363_vm1, %v1973_v34  ;;  %v1976_v36 = vsel %vm1912_vm3, %v1866_v29, %v1944_v33  ;;  %v5307_v34 = vpack.c.bf16 %v5256_v27, %v5255_v26  ;;  %v11882_v27 = vld [vmem:[%s13705_s3 + $0x38] sm:$0xff]  }
 0x18f   : > { %2009 = vst.msk [vmem:[#allocation2 + $0x488] sm:$0xff] %vm363_vm1, %v1976_v36  ;;  %v1974_v40 = vsel %vm1910_vm4, %v1858_v14, %v1942_v35  ;;  %v10563_v41 = vpop.f32.mrb[84].mxu1 }
 0x190   : > { %2007 = vst.msk [vmem:[#allocation2 + $0x470] sm:$0xff] %vm363_vm1, %v1974_v40  ;;  %v1879_v46 = vadd.f32 %v10563_v41, %v12766_v37  ;;  %v1870_v47 = vpop.f32.mrb[85].mxu1 }
 0x191   : > { %v1871_v49 = vadd.f32 %v12766_v37, %v1870_v47  ;;  %v10564_v50 = vpop.f32.mrb[86].mxu1  ;;  %v5257_v47 = vld [vmem:[#allocation2 + $0x139] sm:$0xff] }
 0x192   : > { %vm1915_vm5 = vcmp.ge.f32.partialorder %v1879_v46, 0.0  ;;  %v1947_v51 = vmul.f32 0.2, %v1879_v46  ;;  %v1882_v53 = vadd.f32 %v10564_v50, %v12766_v37  ;;  %v1873_v54 = vpop.f32.mrb[87].mxu1 }
 0x193   : > { %10904 = vmatmul.mubr.msk.bf16.gmra.mrb[20].mxu0 %vm363_vm1, %v5302_v48  ;;  %vm1913_vm6 = vcmp.ge.f32.partialorder %v1871_v49, 0.0  ;;  %v1945_v55 = vmul.f32 0.2, %v1871_v49  ;;  %v1874_v56 = vadd.f32 %v12766_v37, %v1873_v54  ;;  %v5258_v48 = vld [vmem:[#allocation2 + $0x141] sm:$0xff]  ;;  %v5260_v54 = vld [vmem:[#allocation2 + $0x159] sm:$0xff] }
 0x194   : > { %v1979_v57 = vsel %vm1915_vm5, %v1879_v46, %v1947_v51  ;;  %10907 = vmatprep.mubr.msk.bf16.mxu0 %vm363_vm1, %v5303_v52  ;;  %vm1916_vm7 = vcmp.ge.f32.partialorder %v1882_v53, 0.0  ;;  %v1948_v58 = vmul.f32 0.2, %v1882_v53 }
 0x195   : > { %2012 = vst.msk [vmem:[#allocation2 + $0x4b0] sm:$0xff] %vm363_vm1, %v1979_v57  ;;  %v1977_v59 = vsel %vm1913_vm6, %v1871_v49, %v1945_v55  ;;  %vm1914_vm8 = vcmp.ge.f32.partialorder %v1874_v56, 0.0  ;;  %v1946_v45 = vmul.f32 0.2, %v1874_v56 }
 0x196   : > { %2010 = vst.msk [vmem:[#allocation2 + $0x498] sm:$0xff] %vm363_vm1, %v1977_v59  ;;  %v1980_v60 = vsel %vm1916_vm7, %v1882_v53, %v1948_v58  ;;  %v5259_v53 = vld [vmem:[#allocation2 + $0x151] sm:$0xff] }
 0x197   : > { %2013 = vst.msk [vmem:[#allocation2 + $0x4b8] sm:$0xff] %vm363_vm1, %v1980_v60  ;;  %v1978_v63 = vsel %vm1914_vm8, %v1874_v56, %v1946_v45  ;;  %v10573_v0 = vpop.f32.mrb[88].mxu1  ;;  %v5308_v60 = vpack.c.bf16 %v5258_v48, %v5257_v47  ;;  %v5309_v1 = vpack.c.bf16 %v5260_v54, %v5259_v53 }
 0x198   : > { %2011 = vst.msk [vmem:[#allocation2 + $0x4a0] sm:$0xff] %vm363_vm1, %v1978_v63  ;;  %v2249_v3 = vadd.f32 %v10573_v0, %v12766_v37  ;;  %v2240_v4 = vpop.f32.mrb[89].mxu1 }
 0x199   : > { %v2241_v5 = vadd.f32 %v12766_v37, %v2240_v4  ;;  %v10574_v6 = vpop.f32.mrb[90].mxu1 }
 0x19a   : > { %vm2369_vm9 = vcmp.ge.f32.partialorder %v2249_v3, 0.0  ;;  %v2401_v8 = vmul.f32 0.2, %v2249_v3  ;;  %v2252_v9 = vadd.f32 %v10574_v6, %v12766_v37  ;;  %v2243_v10 = vpop.f32.mrb[91].mxu1 }
 0x19b   : > { %vm2367_vm10 = vcmp.ge.f32.partialorder %v2241_v5, 0.0  ;;  %v2399_v13 = vmul.f32 0.2, %v2241_v5  ;;  %v2244_v16 = vadd.f32 %v12766_v37, %v2243_v10  ;;  %10908 = vmatmul.mubr.msk.bf16.gmra.mrb[24].mxu0 %vm363_vm1, %v5304_v7  ;;  %v11881_v10 = vld [vmem:[%s13705_s3 + $0x30] sm:$0xff]  }
 0x19c   : > { %v2433_v17 = vsel %vm2369_vm9, %v2249_v3, %v2401_v8  ;;  %vm2370_vm11 = vcmp.ge.f32.partialorder %v2252_v9, 0.0  ;;  %v2402_v18 = vmul.f32 0.2, %v2252_v9  ;;  %10911 = vmatprep.mubr.msk.bf16.mxu0 %vm363_vm1, %v5305_v12 }
 0x19d   : > { %2466 = vst.msk [vmem:[#allocation2 + $0x4f9] sm:$0xff] %vm363_vm1, %v2433_v17  ;;  %v2431_v19 = vsel %vm2367_vm10, %v2241_v5, %v2399_v13  ;;  %vm2368_vm12 = vcmp.ge.f32.partialorder %v2244_v16, 0.0  ;;  %v2400_v20 = vmul.f32 0.2, %v2244_v16  ;;  %v5261_v13 = vld [vmem:[#allocation2 + $0x169] sm:$0xff] }
 0x19e   : > { %2464 = vst.msk [vmem:[#allocation2 + $0x4e1] sm:$0xff] %vm363_vm1, %v2431_v19  ;;  %v2434_v21 = vsel %vm2370_vm11, %v2252_v9, %v2402_v18 }
 0x19f   : > { %2467 = vst.msk [vmem:[#allocation2 + $0x501] sm:$0xff] %vm363_vm1, %v2434_v21  ;;  %v2432_v24 = vsel %vm2368_vm12, %v2244_v16, %v2400_v20  ;;  %v10577_v25 = vpop.f32.mrb[92].mxu1  ;;  %v5262_v16 = vld [vmem:[#allocation2 + $0x171] sm:$0xff] }
 0x1a0   : > { %2465 = vst.msk [vmem:[#allocation2 + $0x4e9] sm:$0xff] %vm363_vm1, %v2432_v24  ;;  %v2265_v11 = vadd.f32 %v10577_v25, %v12766_v37  ;;  %v2256_v28 = vpop.f32.mrb[93].mxu1  ;;  %v5310_v26 = vpack.c.bf16 %v5262_v16, %v5261_v13 }
 0x1a1   : > { %v2257_v29 = vadd.f32 %v12766_v37, %v2256_v28  ;;  %v10578_v30 = vpop.f32.mrb[94].mxu1 }
 0x1a2   : > { %vm2373_vm13 = vcmp.ge.f32.partialorder %v2265_v11, 0.0  ;;  %v2405_v14 = vmul.f32 0.2, %v2265_v11  ;;  %v2268_v32 = vadd.f32 %v10578_v30, %v12766_v37  ;;  %v2259_v33 = vpop.f32.mrb[95].mxu1 }
 0x1a3   : > { %vm2371_vm14 = vcmp.ge.f32.partialorder %v2257_v29, 0.0  ;;  %v2403_v35 = vmul.f32 0.2, %v2257_v29  ;;  %v2260_v36 = vadd.f32 %v12766_v37, %v2259_v33  ;;  %10912 = vmatmul.mubr.msk.bf16.gmra.mrb[28].mxu0 %vm363_vm1, %v5306_v31 }
 0x1a4   : > { %v2437_v38 = vsel %vm2373_vm13, %v2265_v11, %v2405_v14  ;;  %vm2374_vm15 = vcmp.ge.f32.partialorder %v2268_v32, 0.0  ;;  %v2406_v39 = vmul.f32 0.2, %v2268_v32  ;;  %10915 = vmatprep.mubr.msk.bf16.mxu0 %vm363_vm1, %v5307_v34  ;;  %v2533_v40 = vld [vmem:[#allocation2 + $0x4f8] sm:$0xff] }
 0x1a5   : > { %2470 = vst.msk [vmem:[#allocation2 + $0x529] sm:$0xff] %vm363_vm1, %v2437_v38  ;;  %v2435_v41 = vsel %vm2371_vm14, %v2257_v29, %v2403_v35  ;;  %vm2372_vm0 = vcmp.ge.f32.partialorder %v2260_v36, 0.0  ;;  %v2404_v42 = vmul.f32 0.2, %v2260_v36  ;;  %v2531_v43 = vld [vmem:[#allocation2 + $0x4e0] sm:$0xff] }
 0x1a6   : > { %2468 = vst.msk [vmem:[#allocation2 + $0x511] sm:$0xff] %vm363_vm1, %v2435_v41  ;;  %v2438_v46 = vsel %vm2374_vm15, %v2268_v32, %v2406_v39  ;;  %v2534_v49 = vld [vmem:[#allocation2 + $0x500] sm:$0xff] }
 0x1a7   : > { %2471 = vst.msk [vmem:[#allocation2 + $0x531] sm:$0xff] %vm363_vm1, %v2438_v46  ;;  %v2436_v50 = vsel %vm2372_vm0, %v2260_v36, %v2404_v42  ;;  %v10581_v51 = vpop.f32.mrb[96].mxu1  ;;  %v2532_v52 = vld [vmem:[#allocation2 + $0x4e8] sm:$0xff]  ;;  %v12913_v55 = vpack.c.bf16 %v2534_v49, %v2533_v40  ;;  %v12954_v38 = vld [vmem:[%s13705_s3 + $0x40] sm:$0xff]  }
 0x1a8   : > { %2469 = vst.msk [vmem:[#allocation2 + $0x519] sm:$0xff] %vm363_vm1, %v2436_v50  ;;  %v2281_v56 = vadd.f32 %v10581_v51, %v12766_v37  ;;  %v2272_v57 = vpop.f32.mrb[97].mxu1  ;;  %v2594_v58 = vpack.c.bf16 %v2532_v52, %v2531_v43  ;;  %v11883_v52 = vld [vmem:[%s13705_s3 + $0x128] sm:$0xff]  }
 0x1a9   : > { %v2273_v59 = vadd.f32 %v12766_v37, %v2272_v57  ;;  %v10582_v45 = vpop.f32.mrb[98].mxu1 }
 0x1aa   : > { %vm2377_vm2 = vcmp.ge.f32.partialorder %v2281_v56, 0.0  ;;  %v2409_v62 = vmul.f32 0.2, %v2281_v56  ;;  %v2284_v63 = vadd.f32 %v10582_v45, %v12766_v37  ;;  %v2275_v0 = vpop.f32.mrb[99].mxu1  ;;  %10612 = vmatmul.mubr.msk.bf16.vlgmr.msra.gmra.mrb[120].mxu1 %vm363_vm1, %v2594_v58 }
 0x1ab   : > { %vm2375_vm3 = vcmp.ge.f32.partialorder %v2273_v59, 0.0  ;;  %v2407_v2 = vmul.f32 0.2, %v2273_v59  ;;  %v2276_v3 = vadd.f32 %v12766_v37, %v2275_v0  ;;  %10916 = vmatmul.mubr.msk.bf16.gmra.mrb[32].mxu0 %vm363_vm1, %v5308_v60  ;;  %10615 = vmatprep.mubr.msk.bf16.mxu1 %vm363_vm1, %v12913_v55 }
 0x1ac   : > { %v2441_v4 = vsel %vm2377_vm2, %v2281_v56, %v2409_v62  ;;  %vm2378_vm4 = vcmp.ge.f32.partialorder %v2284_v63, 0.0  ;;  %v2410_v5 = vmul.f32 0.2, %v2284_v63  ;;  %10919 = vmatprep.mubr.msk.bf16.mxu0 %vm363_vm1, %v5309_v1  ;;  %v2537_v6 = vld [vmem:[#allocation2 + $0x528] sm:$0xff]  ;;  %10644 = vmatpush3.bf16.msra.mxu1 %v12773_v44 }
 0x1ad   : > { %2474 = vst.msk [vmem:[#allocation2 + $0x559] sm:$0xff] %vm363_vm1, %v2441_v4  ;;  %v2439_v7 = vsel %vm2375_vm3, %v2273_v59, %v2407_v2  ;;  %vm2376_vm5 = vcmp.ge.f32.partialorder %v2276_v3, 0.0  ;;  %v2408_v8 = vmul.f32 0.2, %v2276_v3  ;;  %v2535_v9 = vld [vmem:[#allocation2 + $0x510] sm:$0xff]  ;;  %10645 = vmatprep.subr.bf16.mxu1 %v11880_v61 }
 0x1ae   : > { %2472 = vst.msk [vmem:[#allocation2 + $0x541] sm:$0xff] %vm363_vm1, %v2439_v7  ;;  %v2442_v12 = vsel %vm2378_vm4, %v2284_v63, %v2410_v5  ;;  %v2538_v17 = vld [vmem:[#allocation2 + $0x530] sm:$0xff]  ;;  %v12988_v4 = vld [vmem:[%s13704_s2] ss:$0 sm:$0xff] }
 0x1af   : > { %2475 = vst.msk [vmem:[#allocation2 + $0x561] sm:$0xff] %vm363_vm1, %v2442_v12  ;;  %v2440_v44 = vsel %vm2376_vm5, %v2276_v3, %v2408_v8  ;;  %v10585_v18 = vpop.f32.mrb[100].mxu1  ;;  %v2536_v19 = vld [vmem:[#allocation2 + $0x518] sm:$0xff]  ;;  %v12935_v20 = vpack.c.bf16 %v2538_v17, %v2537_v6 }
 0x1b0   : > { %2473 = vst.msk [vmem:[#allocation2 + $0x549] sm:$0xff] %vm363_vm1, %v2440_v44  ;;  %v2297_v21 = vadd.f32 %v10585_v18, %v12766_v37  ;;  %v2288_v22 = vpop.f32.mrb[101].mxu1  ;;  %v2596_v23 = vpack.c.bf16 %v2536_v19, %v2535_v9  ;;  %10646 = vmatpush3.bf16.msra.mxu1 %v11880_v61 }
 0x1b1   : > { %v2289_v24 = vadd.f32 %v12766_v37, %v2288_v22  ;;  %v10586_v25 = vpop.f32.mrb[102].mxu1  ;;  %10647 = vmatprep.subr.bf16.mxu1 %v11881_v10 }
 0x1b2   : > { %vm2381_vm6 = vcmp.ge.f32.partialorder %v2297_v21, 0.0  ;;  %v2413_v11 = vmul.f32 0.2, %v2297_v21  ;;  %v2300_v28 = vadd.f32 %v10586_v25, %v12766_v37  ;;  %v2291_v29 = vpop.f32.mrb[103].mxu1  ;;  %10616 = vmatmul.mubr.msk.bf16.gmra.mrb[124].mxu1 %vm363_vm1, %v2596_v23 }
 0x1b3   : > { %vm2379_vm7 = vcmp.ge.f32.partialorder %v2289_v24, 0.0  ;;  %v2411_v30 = vmul.f32 0.2, %v2289_v24  ;;  %v2292_v31 = vadd.f32 %v12766_v37, %v2291_v29  ;;  %10920 = vmatmul.mubr.msk.bf16.gmra.mrb[36].mxu0 %vm363_vm1, %v5310_v26  ;;  %10619 = vmatprep.mubr.msk.bf16.mxu1 %vm363_vm1, %v12935_v20 }
 0x1b4   : > { %v2445_v14 = vsel %vm2381_vm6, %v2297_v21, %v2413_v11  ;;  %vm2382_vm8 = vcmp.ge.f32.partialorder %v2300_v28, 0.0  ;;  %v2414_v32 = vmul.f32 0.2, %v2300_v28  ;;  %10931 = vmatprep.mubr.msk.bf16.mxu0 %vm363_vm1, %v2594_v58  ;;  %v2541_v33 = vld [vmem:[#allocation2 + $0x558] sm:$0xff]  ;;  %10648 = vmatpush3.bf16.msra.mxu1 %v11881_v10 }
 0x1b5   : > { %2478 = vst.msk [vmem:[#allocation2 + $0x589] sm:$0xff] %vm363_vm1, %v2445_v14  ;;  %v2443_v34 = vsel %vm2379_vm7, %v2289_v24, %v2411_v30  ;;  %vm2380_vm9 = vcmp.ge.f32.partialorder %v2292_v31, 0.0  ;;  %v2412_v35 = vmul.f32 0.2, %v2292_v31  ;;  %v2539_v36 = vld [vmem:[#allocation2 + $0x540] sm:$0xff]  ;;  %10649 = vmatprep.subr.bf16.mxu1 %v11882_v27  ;;  %v11885_v10 = vld [vmem:[%s13705_s3 + $0x138] sm:$0xff]  }
 0x1b6   : > { %2476 = vst.msk [vmem:[#allocation2 + $0x571] sm:$0xff] %vm363_vm1, %v2443_v34  ;;  %v2446_v39 = vsel %vm2382_vm8, %v2300_v28, %v2414_v32  ;;  %v2542_v40 = vld [vmem:[#allocation2 + $0x560] sm:$0xff] }
 0x1b7   : > { %2479 = vst.msk [vmem:[#allocation2 + $0x591] sm:$0xff] %vm363_vm1, %v2446_v39  ;;  %v2444_v41 = vsel %vm2380_vm9, %v2292_v31, %v2412_v35  ;;  %v10589_v42 = vpop.f32.mrb[104].mxu1  ;;  %v2540_v43 = vld [vmem:[#allocation2 + $0x548] sm:$0xff]  ;;  %v12958_v46 = vpack.c.bf16 %v2542_v40, %v2541_v33 }
 0x1b8   : > { %2477 = vst.msk [vmem:[#allocation2 + $0x579] sm:$0xff] %vm363_vm1, %v2444_v41  ;;  %v2313_v47 = vadd.f32 %v10589_v42, %v12766_v37  ;;  %v2304_v48 = vpop.f32.mrb[105].mxu1  ;;  %v2598_v49 = vpack.c.bf16 %v2540_v43, %v2539_v36  ;;  %10650 = vmatpush3.bf16.msra.mxu1 %v11882_v27 }
 0x1b9   : > { %v2305_v50 = vadd.f32 %v12766_v37, %v2304_v48  ;;  %v10590_v51 = vpop.f32.mrb[106].mxu1  ;;  %10683 = vmatprep.subr.bf16.mxu1 %v12954_v38 }
 0x1ba   : > { %vm2385_vm10 = vcmp.ge.f32.partialorder %v2313_v47, 0.0  ;;  %v2417_v53 = vmul.f32 0.2, %v2313_v47  ;;  %v2316_v54 = vadd.f32 %v10590_v51, %v12766_v37  ;;  %v2307_v56 = vpop.f32.mrb[107].mxu1  ;;  %10620 = vmatmul.mubr.msk.bf16.gmra.mrb[128].mxu1 %vm363_vm1, %v2598_v49 }
 0x1bb   : > { %vm2383_vm11 = vcmp.ge.f32.partialorder %v2305_v50, 0.0  ;;  %v2415_v57 = vmul.f32 0.2, %v2305_v50  ;;  %v2308_v58 = vadd.f32 %v12766_v37, %v2307_v56  ;;  %10932 = vmatmul.mubr.msk.bf16.vlgmr.msra.gmra.mrb[8].mxu0 %vm363_vm1, %v12913_v55  ;;  %10623 = vmatprep.mubr.msk.bf16.mxu1 %vm363_vm1, %v12958_v46  ;;  %v11884_v55 = vld [vmem:[%s13705_s3 + $0x130] sm:$0xff]  }
 0x1bc   : > { %v2449_v59 = vsel %vm2385_vm10, %v2313_v47, %v2417_v53  ;;  %vm2386_vm12 = vcmp.ge.f32.partialorder %v2316_v54, 0.0  ;;  %v2418_v45 = vmul.f32 0.2, %v2316_v54  ;;  %10935 = vmatprep.mubr.msk.bf16.mxu0 %vm363_vm1, %v2596_v23  ;;  %v2545_v60 = vld [vmem:[#allocation2 + $0x588] sm:$0xff]  ;;  %10964 = vmatpush3.bf16.msra.mxu0 %v12868_v15 }
 0x1bd   : > { %2482 = vst.msk [vmem:[#allocation2 + $0x5b9] sm:$0xff] %vm363_vm1, %v2449_v59  ;;  %v2447_v61 = vsel %vm2383_vm11, %v2305_v50, %v2415_v57  ;;  %vm2384_vm13 = vcmp.ge.f32.partialorder %v2308_v58, 0.0  ;;  %v2416_v62 = vmul.f32 0.2, %v2308_v58  ;;  %v2543_v37 = vld [vmem:[#allocation2 + $0x570] sm:$0xff]  ;;  %10965 = vmatprep.subr.bf16.mxu0 %v11883_v52 }
 0x1be   : > { %2480 = vst.msk [vmem:[#allocation2 + $0x5a1] sm:$0xff] %vm363_vm1, %v2447_v61  ;;  %v2450_v63 = vsel %vm2386_vm12, %v2316_v54, %v2418_v45  ;;  %v2546_v0 = vld [vmem:[#allocation2 + $0x590] sm:$0xff] }
 0x1bf   : > { %2483 = vst.msk [vmem:[#allocation2 + $0x5c1] sm:$0xff] %vm363_vm1, %v2450_v63  ;;  %v2448_v1 = vsel %vm2384_vm13, %v2308_v58, %v2416_v62  ;;  %v10593_v2 = vpop.f32.mrb[108].mxu1  ;;  %v2544_v15 = vld [vmem:[#allocation2 + $0x578] sm:$0xff]  ;;  %v12982_v3 = vpack.c.bf16 %v2546_v0, %v2545_v60 }
 0x1c0   : > { %2481 = vst.msk [vmem:[#allocation2 + $0x5a9] sm:$0xff] %vm363_vm1, %v2448_v1  ;;  %v2329_v5 = vadd.f32 %v12988_v4, %v10593_v2  ;;  %v2320_v6 = vpop.f32.mrb[109].mxu1  ;;  %v2600_v7 = vpack.c.bf16 %v2544_v15, %v2543_v37  ;;  %10966 = vmatpush3.bf16.msra.mxu0 %v11883_v52 }
 0x1c1   : > { %v2321_v8 = vadd.f32 %v12988_v4, %v2320_v6  ;;  %v10594_v9 = vpop.f32.mrb[110].mxu1  ;;  %10967 = vmatprep.subr.bf16.mxu0 %v11884_v55 }
 0x1c2   : > { %vm2389_vm14 = vcmp.ge.f32.partialorder %v2329_v5, 0.0  ;;  %v2421_v12 = vmul.f32 0.2, %v2329_v5  ;;  %v2332_v13 = vadd.f32 %v12988_v4, %v10594_v9  ;;  %v2323_v16 = vpop.f32.mrb[111].mxu1  ;;  %10624 = vmatmul.mubr.msk.bf16.gmra.mrb[132].mxu1 %vm363_vm1, %v2600_v7 }
 0x1c3   : > { %vm2387_vm15 = vcmp.ge.f32.partialorder %v2321_v8, 0.0  ;;  %v2419_v17 = vmul.f32 0.2, %v2321_v8  ;;  %v2324_v44 = vadd.f32 %v12988_v4, %v2323_v16  ;;  %10936 = vmatmul.mubr.msk.bf16.gmra.mrb[12].mxu0 %vm363_vm1, %v12935_v20  ;;  %10627 = vmatprep.mubr.msk.bf16.mxu1 %vm363_vm1, %v12982_v3  ;;  %v13007_v20 = vld [vmem:[%s13705_s3 + $0x140] sm:$0xff]  }
 0x1c4   : > { %v2453_v18 = vsel %vm2389_vm14, %v2329_v5, %v2421_v12  ;;  %vm2390_vm0 = vcmp.ge.f32.partialorder %v2332_v13, 0.0  ;;  %v2422_v19 = vmul.f32 0.2, %v2332_v13  ;;  %10939 = vmatprep.mubr.msk.bf16.mxu0 %vm363_vm1, %v2598_v49  ;;  %v2549_v21 = vld [vmem:[#allocation2 + $0x5b8] sm:$0xff]  ;;  %10968 = vmatpush3.bf16.msra.mxu0 %v11884_v55 }
 0x1c5   : > { %2486 = vst.msk [vmem:[#allocation2 + $0x5e9] sm:$0xff] %vm363_vm1, %v2453_v18  ;;  %v2451_v22 = vsel %vm2387_vm15, %v2321_v8, %v2419_v17  ;;  %vm2388_vm2 = vcmp.ge.f32.partialorder %v2324_v44, 0.0  ;;  %v2420_v23 = vmul.f32 0.2, %v2324_v44  ;;  %v2547_v24 = vld [vmem:[#allocation2 + $0x5a0] sm:$0xff]  ;;  %10969 = vmatprep.subr.bf16.mxu0 %v11885_v10  ;;  %v2916_v12 = vld [vmem:[#allocation2 + $0x338] sm:$0xff] }
 0x1c6   : > { %2484 = vst.msk [vmem:[#allocation2 + $0x5d1] sm:$0xff] %vm363_vm1, %v2451_v22  ;;  %v2454_v25 = vsel %vm2390_vm0, %v2332_v13, %v2422_v19  ;;  %v2550_v26 = vld [vmem:[#allocation2 + $0x5c0] sm:$0xff]  ;;  %v2917_v18 = vld [vmem:[#allocation2 + $0x348] sm:$0xff]  ;;  %v2918_v19 = vld [vmem:[#allocation2 + $0x350] sm:$0xff] }
 0x1c7   : > { %2487 = vst.msk [vmem:[#allocation2 + $0x5f1] sm:$0xff] %vm363_vm1, %v2454_v25  ;;  %v2452_v27 = vsel %vm2388_vm2, %v2324_v44, %v2420_v23  ;;  %v10597_v11 = vpop.f32.mrb[112].mxu1  ;;  %v2548_v28 = vld [vmem:[#allocation2 + $0x5a8] sm:$0xff]  ;;  %v13011_v29 = vpack.c.bf16 %v2550_v26, %v2549_v21  ;;  %v2919_v21 = vld [vmem:[#allocation2 + $0x360] sm:$0xff]  ;;  %v2980_v23 = vpack.c.bf16 %v2918_v19, %v2917_v18  ;;  %v2921_v26 = vld [vmem:[#allocation2 + $0x378] sm:$0xff] }
 0x1c8   : > { %2485 = vst.msk [vmem:[#allocation2 + $0x5d9] sm:$0xff] %vm363_vm1, %v2452_v27  ;;  %v2345_v30 = vadd.f32 %v12988_v4, %v10597_v11  ;;  %v2336_v31 = vpop.f32.mrb[113].mxu1  ;;  %v2602_v14 = vpack.c.bf16 %v2548_v28, %v2547_v24  ;;  %10970 = vmatpush3.bf16.msra.mxu0 %v11885_v10  ;;  %v2915_v10 = vld [vmem:[#allocation2 + $0x330] sm:$0xff]  ;;  %v2920_v22 = vld [vmem:[#allocation2 + $0x368] sm:$0xff]  ;;  %v2922_v27 = vld [vmem:[#allocation2 + $0x380] sm:$0xff] }
 0x1c9   : > { %v2337_v32 = vadd.f32 %v12988_v4, %v2336_v31  ;;  %v10598_v33 = vpop.f32.mrb[114].mxu1  ;;  %11003 = vmatprep.subr.bf16.mxu0 %v13007_v20  ;;  %v2979_v17 = vpack.c.bf16 %v2916_v12, %v2915_v10  ;;  %v2981_v24 = vpack.c.bf16 %v2920_v22, %v2919_v21  ;;  %v11888_v25 = vld [vmem:[%s13705_s3 + $0x48] sm:$0xff]   ;;  %v2923_v11 = vld [vmem:[#allocation2 + $0x390] sm:$0xff]  ;;  %v2924_v28 = vld [vmem:[#allocation2 + $0x398] sm:$0xff] }
 0x1ca   : > { %vm2393_vm3 = vcmp.ge.f32.partialorder %v2345_v30, 0.0  ;;  %v2425_v34 = vmul.f32 0.2, %v2345_v30  ;;  %v2348_v35 = vadd.f32 %v12988_v4, %v10598_v33  ;;  %v2339_v36 = vpop.f32.mrb[115].mxu1  ;;  %10628 = vmatmul.mubr.msk.bf16.gmra.mrb[136].mxu1 %vm363_vm1, %v2602_v14  ;;  %v3303_v12 = vld [vmem:[#allocation2 + $0x4e1] sm:$0xff]  ;;  %v6033_v21 = vld [vmem:[#allocation2 + $0x4b0] sm:$0xff] }
 0x1cb   : > { %vm2391_vm4 = vcmp.ge.f32.partialorder %v2337_v32, 0.0  ;;  %v2423_v39 = vmul.f32 0.2, %v2337_v32  ;;  %v2340_v40 = vadd.f32 %v12988_v4, %v2339_v36  ;;  %10940 = vmatmul.mubr.msk.bf16.gmra.mrb[16].mxu0 %vm363_vm1, %v12958_v46  ;;  %10631 = vmatprep.mubr.msk.bf16.mxu1 %vm363_vm1, %v13011_v29  ;;  %v13072_v36 = vld [vmem:[%s13705_s3 + $0x60] sm:$0xff]   ;;  %v11896_v19 = vld [vmem:[%s13705_s3 + $0x68] sm:$0xff]   ;;  %v3307_v22 = vld [vmem:[#allocation2 + $0x511] sm:$0xff] }
 0x1cc   : > { %v2457_v41 = vsel %vm2393_vm3, %v2345_v30, %v2425_v34  ;;  %vm2394_vm5 = vcmp.ge.f32.partialorder %v2348_v35, 0.0  ;;  %v2426_v42 = vmul.f32 0.2, %v2348_v35  ;;  %10943 = vmatprep.mubr.msk.bf16.mxu0 %vm363_vm1, %v2600_v7  ;;  %v2553_v43 = vld [vmem:[#allocation2 + $0x5e8] sm:$0xff]  ;;  %v2982_v30 = vpack.c.bf16 %v2922_v27, %v2921_v26  ;;  %v11890_v34 = vld [vmem:[%s13705_s3 + $0x58] sm:$0xff]  }
 0x1cd   : > { %2490 = vst.msk [vmem:[#allocation2 + $0x619] sm:$0xff] %vm363_vm1, %v2457_v41  ;;  %v2455_v47 = vsel %vm2391_vm4, %v2337_v32, %v2423_v39  ;;  %vm2392_vm6 = vcmp.ge.f32.partialorder %v2340_v40, 0.0  ;;  %v2424_v48 = vmul.f32 0.2, %v2340_v40  ;;  %v2551_v49 = vld [vmem:[#allocation2 + $0x5d0] sm:$0xff]  ;;  %v2983_v32 = vpack.c.bf16 %v2924_v28, %v2923_v11  ;;  %v2927_v39 = vld [vmem:[#allocation2 + $0x3c0] sm:$0xff] }
 0x1ce   : > { %2488 = vst.msk [vmem:[#allocation2 + $0x601] sm:$0xff] %vm363_vm1, %v2455_v47  ;;  %v2458_v50 = vsel %vm2394_vm5, %v2348_v35, %v2426_v42  ;;  %v2554_v51 = vld [vmem:[#allocation2 + $0x5f0] sm:$0xff]  ;;  %v2929_v47 = vld [vmem:[#allocation2 + $0x3d8] sm:$0xff] }
 0x1cf   : > { %2491 = vst.msk [vmem:[#allocation2 + $0x621] sm:$0xff] %vm363_vm1, %v2458_v50  ;;  %v2456_v46 = vsel %vm2392_vm6, %v2340_v40, %v2424_v48  ;;  %v10601_v52 = vpop.f32.mrb[116].mxu1  ;;  %v2552_v53 = vld [vmem:[#allocation2 + $0x5d8] sm:$0xff]  ;;  %v2605_v54 = vpack.c.bf16 %v2554_v51, %v2553_v43  ;;  %v2926_v35 = vld [vmem:[#allocation2 + $0x3b0] sm:$0xff]  ;;  %v2928_v40 = vld [vmem:[#allocation2 + $0x3c8] sm:$0xff] }
 0x1d0   : > { %2489 = vst.msk [vmem:[#allocation2 + $0x609] sm:$0xff] %vm363_vm1, %v2456_v46  ;;  %v2361_v56 = vadd.f32 %v12988_v4, %v10601_v52  ;;  %v2352_v57 = vpop.f32.mrb[117].mxu1  ;;  %v2604_v58 = vpack.c.bf16 %v2552_v53, %v2551_v49  ;;  %v2985_v42 = vpack.c.bf16 %v2928_v40, %v2927_v39  ;;  %v11891_v43 = vld [vmem:[%s13705_s3 + $0x148] sm:$0xff]   ;;  %v2930_v48 = vld [vmem:[#allocation2 + $0x3e0] sm:$0xff]  ;;  %v11892_v49 = vld [vmem:[%s13705_s3 + $0x150] sm:$0xff]  }
 0x1d1   : > { %v2353_v59 = vadd.f32 %v12988_v4, %v2352_v57  ;;  %v10602_v45 = vpop.f32.mrb[118].mxu1  ;;  %v2931_v50 = vld [vmem:[#allocation2 + $0x3f0] sm:$0xff]  ;;  %v2932_v51 = vld [vmem:[#allocation2 + $0x3f8] sm:$0xff]  ;;  %v2986_v46 = vpack.c.bf16 %v2930_v48, %v2929_v47  ;;  %v2935_v57 = vld [vmem:[#allocation2 + $0x420] sm:$0xff] }
 0x1d2   : > { %vm2397_vm7 = vcmp.ge.f32.partialorder %v2361_v56, 0.0  ;;  %v2429_v60 = vmul.f32 0.2, %v2361_v56  ;;  %v2364_v61 = vadd.f32 %v12988_v4, %v10602_v45  ;;  %v2355_v62 = vpop.f32.mrb[119].mxu1  ;;  %10632 = vmatmul.mubr.msk.bf16.gmra.mrb[140].mxu1 %vm363_vm1, %v2604_v58  ;;  %v2987_v52 = vpack.c.bf16 %v2932_v51, %v2931_v50  ;;  %v11893_v53 = vld [vmem:[%s13705_s3 + $0x158] sm:$0xff]   ;;  %v3319_v50 = vld [vmem:[#allocation2 + $0x5a1] sm:$0xff] }
 0x1d3   : > { %vm2395_vm8 = vcmp.ge.f32.partialorder %v2353_v59, 0.0  ;;  %v2427_v37 = vmul.f32 0.2, %v2353_v59  ;;  %v2356_v55 = vadd.f32 %v12988_v4, %v2355_v62  ;;  %10944 = vmatmul.mubr.msk.bf16.gmra.mrb[20].mxu0 %vm363_vm1, %v12982_v3  ;;  %10635 = vmatprep.mubr.msk.bf16.mxu1 %vm363_vm1, %v2605_v54  ;;  %v2939_v62 = vld [vmem:[#allocation2 + $0x450] sm:$0xff]  ;;  %v6034_v27 = vld [vmem:[#allocation2 + $0x4b8] sm:$0xff] }
 0x1d4   : > { %v2461_v63 = vsel %vm2397_vm7, %v2361_v56, %v2429_v60  ;;  %vm2398_vm9 = vcmp.ge.f32.partialorder %v2364_v61, 0.0  ;;  %v2430_v0 = vmul.f32 0.2, %v2364_v61  ;;  %10947 = vmatprep.mubr.msk.bf16.mxu0 %vm363_vm1, %v2602_v14  ;;  %v2557_v1 = vld [vmem:[#allocation2 + $0x618] sm:$0xff]  ;;  %v13096_v56 = vld [vmem:[%s13705_s3 + $0x160] sm:$0xff]   ;;  %v3320_v51 = vld [vmem:[#allocation2 + $0x5a9] sm:$0xff] }
 0x1d5   : > { %2494 = vst.msk [vmem:[#allocation2 + $0x649] sm:$0xff] %vm363_vm1, %v2461_v63  ;;  %v2459_v2 = vsel %vm2395_vm8, %v2353_v59, %v2427_v37  ;;  %vm2396_vm10 = vcmp.ge.f32.partialorder %v2356_v55, 0.0  ;;  %v2428_v15 = vmul.f32 0.2, %v2356_v55  ;;  %v2555_v5 = vld [vmem:[#allocation2 + $0x600] sm:$0xff]  ;;  %v2937_v60 = vld [vmem:[#allocation2 + $0x438] sm:$0xff] }
 0x1d6   : > { %2492 = vst.msk [vmem:[#allocation2 + $0x631] sm:$0xff] %vm363_vm1, %v2459_v2  ;;  %v2462_v4 = vsel %vm2398_vm9, %v2364_v61, %v2430_v0  ;;  %v2558_v6 = vld [vmem:[#allocation2 + $0x620] sm:$0xff]  ;;  %v2940_v37 = vld [vmem:[#allocation2 + $0x458] sm:$0xff]  ;;  %v2941_v0 = vld [vmem:[#allocation2 + $0x468] sm:$0xff] }
 0x1d7   : > { %2495 = vst.msk [vmem:[#allocation2 + $0x651] sm:$0xff] %vm363_vm1, %v2462_v4  ;;  %v2460_v3 = vsel %vm2396_vm10, %v2356_v55, %v2428_v15  ;;  %v2556_v7 = vld [vmem:[#allocation2 + $0x608] sm:$0xff]  ;;  %v2607_v8 = vpack.c.bf16 %v2558_v6, %v2557_v1  ;;  %v2938_v61 = vld [vmem:[#allocation2 + $0x440] sm:$0xff]  ;;  %v2991_v63 = vpack.c.bf16 %v2940_v37, %v2939_v62  ;;  %v2942_v1 = vld [vmem:[#allocation2 + $0x470] sm:$0xff] }
 0x1d8   : > { %2493 = vst.msk [vmem:[#allocation2 + $0x639] sm:$0xff] %vm363_vm1, %v2460_v3  ;;  %v2606_v9 = vpack.c.bf16 %v2556_v7, %v2555_v5  ;;  %v2990_v55 = vpack.c.bf16 %v2938_v61, %v2937_v60  ;;  %v2943_v2 = vld [vmem:[#allocation2 + $0x480] sm:$0xff]  ;;  %v2944_v15 = vld [vmem:[#allocation2 + $0x488] sm:$0xff]  ;;  %v2992_v5 = vpack.c.bf16 %v2942_v1, %v2941_v0  ;;  %v3302_v3 = vld [vmem:[#allocation2 + $0x4d1] sm:$0xff] }
 0x1d9   : > { %v2993_v4 = vpack.c.bf16 %v2944_v15, %v2943_v2  ;;  %v3301_v6 = vld [vmem:[#allocation2 + $0x4c9] sm:$0xff]  ;;  %v2945_v7 = vld [vmem:[#allocation2 + $0x498] sm:$0xff]  ;;  %v3327_v61 = vld [vmem:[#allocation2 + $0x601] sm:$0xff] }
 0x1da   : > { %10636 = vmatmul.mubr.msk.bf16.gmra.mrb[144].mxu1 %vm363_vm1, %v2606_v9  ;;  %v3310_v26 = vld [vmem:[#allocation2 + $0x531] sm:$0xff]  ;;  %v3316_v40 = vld [vmem:[#allocation2 + $0x579] sm:$0xff]  ;;  %v3328_v62 = vld [vmem:[#allocation2 + $0x609] sm:$0xff] }
 0x1db   : > { %10948 = vmatmul.mubr.msk.bf16.gmra.mrb[24].mxu0 %vm363_vm1, %v13011_v29  ;;  %10639 = vmatprep.mubr.msk.bf16.mxu1 %vm363_vm1, %v2607_v8  ;;  %v11889_v29 = vld [vmem:[%s13705_s3 + $0x50] sm:$0xff]   ;;  %v3329_v37 = vld [vmem:[#allocation2 + $0x619] sm:$0xff] }
 0x1dc   : > { %10951 = vmatprep.mubr.msk.bf16.mxu0 %vm363_vm1, %v2604_v58  ;;  %v5647_v31 = vld [vmem:[#allocation2 + $0x648] sm:$0xff]  ;;  %v3315_v39 = vld [vmem:[#allocation2 + $0x571] sm:$0xff]  ;;  %v3688_v2 = vld [vmem:[#allocation2 + $0x339] sm:$0xff] }
 0x1dd   : > { %v2559_v13 = vld [vmem:[#allocation2 + $0x630] sm:$0xff]  ;;  %v2936_v58 = vld [vmem:[#allocation2 + $0x428] sm:$0xff]  ;;  %v3372_v47 = vpack.c.bf16 %v3316_v40, %v3315_v39 }
 0x1de   : > { %v5648_v14 = vld [vmem:[#allocation2 + $0x650] sm:$0xff]  ;;  %v2989_v45 = vpack.c.bf16 %v2936_v58, %v2935_v57  ;;  %v3324_v57 = vld [vmem:[#allocation2 + $0x5d9] sm:$0xff] }
 0x1df   : > { %v2560_v16 = vld [vmem:[#allocation2 + $0x638] sm:$0xff]  ;;  %v5696_v33 = vpack.c.bf16 %v5648_v14, %v5647_v31  ;;  %v3311_v31 = vld [vmem:[#allocation2 + $0x541] sm:$0xff]  ;;  %v3312_v14 = vld [vmem:[#allocation2 + $0x549] sm:$0xff] }
 0x1e0   : > { %v2608_v44 = vpack.c.bf16 %v2560_v16, %v2559_v13  ;;  %v3304_v13 = vld [vmem:[#allocation2 + $0x4e9] sm:$0xff]  ;;  %v3305_v16 = vld [vmem:[#allocation2 + $0x4f9] sm:$0xff]  ;;  %v3687_v1 = vld [vmem:[#allocation2 + $0x331] sm:$0xff] }
 0x1e1   : > { %v3325_v58 = vld [vmem:[#allocation2 + $0x5e9] sm:$0xff]  ;;  %v3331_v15 = vld [vmem:[#allocation2 + $0x631] sm:$0xff] }
 0x1e2   : > { %10640 = vmatmul.mubr.msk.bf16.gmra.mrb[148].mxu1 %vm363_vm1, %v2608_v44 }
 0x1e3   : > { %10952 = vmatmul.mubr.msk.bf16.gmra.mrb[28].mxu0 %vm363_vm1, %v2605_v54  ;;  %10651 = vmatprep.mubr.msk.bf16.mxu1 %vm363_vm1, %v2979_v17  ;;  %v2934_v54 = vld [vmem:[#allocation2 + $0x410] sm:$0xff]  ;;  %v3306_v17 = vld [vmem:[#allocation2 + $0x501] sm:$0xff] }
 0x1e4   : > { %10955 = vmatprep.mubr.msk.bf16.mxu0 %vm363_vm1, %v2606_v9  ;;  %v3365_v9 = vpack.c.bf16 %v3302_v3, %v3301_v6  ;;  %v3367_v18 = vpack.c.bf16 %v3306_v17, %v3305_v16  ;;  %v3689_v3 = vld [vmem:[#allocation2 + $0x349] sm:$0xff]  ;;  %v3693_v16 = vld [vmem:[#allocation2 + $0x379] sm:$0xff]  ;;  %v3694_v17 = vld [vmem:[#allocation2 + $0x381] sm:$0xff] }
 0x1ea   : > { %10652 = vmatmul.mubr.msk.bf16.vlgmr.msra.gmra.mrb[120].mxu1 %vm363_vm1, %v2980_v23 }
 0x1eb   : > { %10956 = vmatmul.mubr.msk.bf16.gmra.mrb[32].mxu0 %vm363_vm1, %v2607_v8  ;;  %10655 = vmatprep.mubr.msk.bf16.mxu1 %vm363_vm1, %v2981_v24  ;;  %v2946_v8 = vld [vmem:[#allocation2 + $0x4a0] sm:$0xff] }
 0x1ec   : > { %10959 = vmatprep.mubr.msk.bf16.mxu0 %vm363_vm1, %v2608_v44  ;;  %10684 = vmatpush3.bf16.msra.mxu1 %v12954_v38  ;;  %v2925_v38 = vld [vmem:[#allocation2 + $0x3a8] sm:$0xff]  ;;  %v2994_v10 = vpack.c.bf16 %v2946_v8, %v2945_v7  ;;  %v3366_v44 = vpack.c.bf16 %v3304_v13, %v3303_v12  ;;  %v3690_v7 = vld [vmem:[#allocation2 + $0x351] sm:$0xff] }
 0x1ed   : > { %10685 = vmatprep.subr.bf16.mxu1 %v11888_v25  ;;  %v2984_v41 = vpack.c.bf16 %v2926_v35, %v2925_v38  ;;  %v3370_v38 = vpack.c.bf16 %v3312_v14, %v3311_v31  ;;  %v3691_v8 = vld [vmem:[#allocation2 + $0x361] sm:$0xff] }
 0x1ee   : > { %v11904_v13 = vld [vmem:[%s13705_s3 + $0x88] sm:$0xff]  }
 0x1f0   : > { %10686 = vmatpush3.bf16.msra.mxu1 %v11888_v25  ;;  %v3309_v25 = vld [vmem:[#allocation2 + $0x529] sm:$0xff] }
 0x1f1   : > { %10687 = vmatprep.subr.bf16.mxu1 %v11889_v29  ;;  %v3369_v28 = vpack.c.bf16 %v3310_v26, %v3309_v25  ;;  %v11906_v26 = vld [vmem:[%s13705_s3 + $0x98] sm:$0xff]  }
 0x1f2   : > { %10656 = vmatmul.mubr.msk.bf16.gmra.mrb[124].mxu1 %vm363_vm1, %v2982_v30 }
 0x1f3   : > { %10960 = vmatmul.mubr.msk.bf16.gmra.mrb[36].mxu0 %vm363_vm1, %v5696_v33  ;;  %10659 = vmatprep.mubr.msk.bf16.mxu1 %vm363_vm1, %v2983_v32  ;;  %v3313_v33 = vld [vmem:[#allocation2 + $0x559] sm:$0xff] }
 0x1f4   : > { %10971 = vmatprep.mubr.msk.bf16.mxu0 %vm363_vm1, %v2980_v23  ;;  %10688 = vmatpush3.bf16.msra.mxu1 %v11889_v29  ;;  %v3308_v23 = vld [vmem:[#allocation2 + $0x519] sm:$0xff]  ;;  %v6082_v29 = vpack.c.bf16 %v6034_v27, %v6033_v21  ;;  %v6419_v21 = vld [vmem:[#allocation2 + $0x649] sm:$0xff] }
 0x1f5   : > { %10689 = vmatprep.subr.bf16.mxu1 %v11890_v34  ;;  %v3368_v11 = vpack.c.bf16 %v3308_v23, %v3307_v22  ;;  %v6420_v22 = vld [vmem:[#allocation2 + $0x651] sm:$0xff]  ;;  %v3754_v23 = vpack.c.bf16 %v3694_v17, %v3693_v16  ;;  %v3697_v27 = vld [vmem:[#allocation2 + $0x3a9] sm:$0xff]  ;;  %v4079_v16 = vld [vmem:[#allocation2 + $0x1e0] sm:$0xff] }
 0x1f6   : > { %v6468_v25 = vpack.c.bf16 %v6420_v22, %v6419_v21  ;;  %v11914_v21 = vld [vmem:[%s13705_s3 + $0xb8] sm:$0xff]  }
 0x1f7   : > { %v4084_v22 = vld [vmem:[#allocation2 + $0x218] sm:$0xff] }
 0x1f8   : > { %10690 = vmatpush3.bf16.msra.mxu1 %v11890_v34  ;;  %v3314_v34 = vld [vmem:[#allocation2 + $0x561] sm:$0xff] }
 0x1f9   : > { %10723 = vmatprep.subr.bf16.mxu1 %v13072_v36  ;;  %v3371_v35 = vpack.c.bf16 %v3314_v34, %v3313_v33  ;;  %v3701_v33 = vld [vmem:[#allocation2 + $0x3d9] sm:$0xff]  ;;  %v3702_v34 = vld [vmem:[#allocation2 + $0x3e1] sm:$0xff] }
 0x1fa   : > { %10660 = vmatmul.mubr.msk.bf16.gmra.mrb[128].mxu1 %vm363_vm1, %v2984_v41  ;;  %v3758_v39 = vpack.c.bf16 %v3702_v34, %v3701_v33  ;;  %v11917_v34 = vld [vmem:[%s13705_s3 + $0x1b8] sm:$0xff]  }
 0x1fb   : > { %10663 = vmatprep.mubr.msk.bf16.mxu1 %vm363_vm1, %v2985_v42  ;;  %10972 = vmatmul.mubr.msk.bf16.vlgmr.msra.gmra.mrb[8].mxu0 %vm363_vm1, %v2981_v24  ;;  %v11897_v24 = vld [vmem:[%s13705_s3 + $0x70] sm:$0xff]  }
 0x1fc   : > { %10975 = vmatprep.mubr.msk.bf16.mxu0 %vm363_vm1, %v2982_v30  ;;  %11004 = vmatpush3.bf16.msra.mxu0 %v13007_v20  ;;  %v2933_v20 = vld [vmem:[#allocation2 + $0x408] sm:$0xff]  ;;  %v11898_v30 = vld [vmem:[%s13705_s3 + $0x78] sm:$0xff]  }
 0x1fd   : > { %11005 = vmatprep.subr.bf16.mxu0 %v11891_v43  ;;  %v2988_v59 = vpack.c.bf16 %v2934_v54, %v2933_v20  ;;  %v3374_v20 = vpack.c.bf16 %v3320_v51, %v3319_v50 }
 0x200   : > { %11006 = vmatpush3.bf16.msra.mxu0 %v11891_v43  ;;  %v3318_v43 = vld [vmem:[#allocation2 + $0x591] sm:$0xff] }
 0x201   : > { %11007 = vmatprep.subr.bf16.mxu0 %v11892_v49 }
 0x202   : > { %10664 = vmatmul.mubr.msk.bf16.gmra.mrb[132].mxu1 %vm363_vm1, %v2986_v46 }
 0x203   : > { %10667 = vmatprep.mubr.msk.bf16.mxu1 %vm363_vm1, %v2987_v52  ;;  %10976 = vmatmul.mubr.msk.bf16.gmra.mrb[12].mxu0 %vm363_vm1, %v2983_v32  ;;  %v13136_v32 = vld [vmem:[%s13705_s3 + $0x80] sm:$0xff]  }
 0x204   : > { %10979 = vmatprep.mubr.msk.bf16.mxu0 %vm363_vm1, %v2984_v41  ;;  %11008 = vmatpush3.bf16.msra.mxu0 %v11892_v49  ;;  %v11900_v41 = vld [vmem:[%s13705_s3 + $0x170] sm:$0xff]   ;;  %v11901_v49 = vld [vmem:[%s13705_s3 + $0x178] sm:$0xff]  }
 0x205   : > { %11009 = vmatprep.subr.bf16.mxu0 %v11893_v53 }
 0x208   : > { %11010 = vmatpush3.bf16.msra.mxu0 %v11893_v53  ;;  %v3322_v53 = vld [vmem:[#allocation2 + $0x5c1] sm:$0xff] }
 0x209   : > { %11043 = vmatprep.subr.bf16.mxu0 %v13096_v56 }
 0x20a   : > { %10668 = vmatmul.mubr.msk.bf16.gmra.mrb[136].mxu1 %vm363_vm1, %v2988_v59 }
 0x20b   : > { %10671 = vmatprep.mubr.msk.bf16.mxu1 %vm363_vm1, %v2989_v45  ;;  %10980 = vmatmul.mubr.msk.bf16.gmra.mrb[16].mxu0 %vm363_vm1, %v2985_v42  ;;  %v3317_v42 = vld [vmem:[#allocation2 + $0x589] sm:$0xff] }
 0x20c   : > { %10983 = vmatprep.mubr.msk.bf16.mxu0 %vm363_vm1, %v2986_v46  ;;  %v3373_v48 = vpack.c.bf16 %v3318_v43, %v3317_v42  ;;  %v13160_v46 = vld [vmem:[%s13705_s3 + $0x180] sm:$0xff]   ;;  %v3705_v42 = vld [vmem:[#allocation2 + $0x409] sm:$0xff]  ;;  %v3706_v43 = vld [vmem:[#allocation2 + $0x411] sm:$0xff] }
 0x20d   : > { %v3760_v50 = vpack.c.bf16 %v3706_v43, %v3705_v42  ;;  %v4096_v43 = vld [vmem:[#allocation2 + $0x2a8] sm:$0xff] }
 0x212   : > { %10672 = vmatmul.mubr.msk.bf16.gmra.mrb[140].mxu1 %vm363_vm1, %v2990_v55 }
 0x213   : > { %10675 = vmatprep.mubr.msk.bf16.mxu1 %vm363_vm1, %v2991_v63  ;;  %10984 = vmatmul.mubr.msk.bf16.gmra.mrb[20].mxu0 %vm363_vm1, %v2987_v52  ;;  %v3321_v52 = vld [vmem:[#allocation2 + $0x5b9] sm:$0xff] }
 0x214   : > { %10987 = vmatprep.mubr.msk.bf16.mxu0 %vm363_vm1, %v2988_v59  ;;  %v3375_v54 = vpack.c.bf16 %v3322_v53, %v3321_v52  ;;  %v3326_v59 = vld [vmem:[#allocation2 + $0x5f1] sm:$0xff]  ;;  %v3710_v52 = vld [vmem:[#allocation2 + $0x441] sm:$0xff] }
 0x215   : > { %v3377_v60 = vpack.c.bf16 %v3326_v59, %v3325_v58  ;;  %v3711_v53 = vld [vmem:[#allocation2 + $0x451] sm:$0xff]  ;;  %v3715_v59 = vld [vmem:[#allocation2 + $0x481] sm:$0xff] }
 0x216   : > { %v3714_v58 = vld [vmem:[#allocation2 + $0x471] sm:$0xff] }
 0x21a   : > { %10676 = vmatmul.mubr.msk.bf16.gmra.mrb[144].mxu1 %vm363_vm1, %v2992_v5 }
 0x21b   : > { %10679 = vmatprep.mubr.msk.bf16.mxu1 %vm363_vm1, %v2993_v4  ;;  %10988 = vmatmul.mubr.msk.bf16.gmra.mrb[24].mxu0 %vm363_vm1, %v2989_v45 }
 0x21c   : > { %10991 = vmatprep.mubr.msk.bf16.mxu0 %vm363_vm1, %v2990_v55  ;;  %v3330_v55 = vld [vmem:[#allocation2 + $0x621] sm:$0xff] }
 0x21d   : > { %v3379_v0 = vpack.c.bf16 %v3330_v55, %v3329_v37  ;;  %v3718_v37 = vld [vmem:[#allocation2 + $0x4a1] sm:$0xff] }
 0x21e   : > { %v4074_v55 = vld [vmem:[#allocation2 + $0x1a0] sm:$0xff] }
 0x222   : > { %10680 = vmatmul.mubr.msk.bf16.gmra.mrb[148].mxu1 %vm363_vm1, %v2994_v10 }
 0x223   : > { %10992 = vmatmul.mubr.msk.bf16.gmra.mrb[28].mxu0 %vm363_vm1, %v2991_v63  ;;  %10691 = vmatprep.mubr.msk.bf16.mxu1 %vm363_vm1, %v3365_v9  ;;  %v3378_v63 = vpack.c.bf16 %v3328_v62, %v3327_v61  ;;  %v3692_v9 = vld [vmem:[#allocation2 + $0x369] sm:$0xff]  ;;  %v3717_v62 = vld [vmem:[#allocation2 + $0x499] sm:$0xff] }
 0x224   : > { %10995 = vmatprep.mubr.msk.bf16.mxu0 %vm363_vm1, %v2992_v5  ;;  %v3332_v5 = vld [vmem:[#allocation2 + $0x639] sm:$0xff]  ;;  %v3753_v12 = vpack.c.bf16 %v3692_v9, %v3691_v8  ;;  %v4080_v8 = vld [vmem:[#allocation2 + $0x1e8] sm:$0xff]  ;;  %v11913_v9 = vld [vmem:[%s13705_s3 + $0xb0] sm:$0xff]  }
 0x225   : > { %v3380_v6 = vpack.c.bf16 %v3332_v5, %v3331_v15  ;;  %v4078_v15 = vld [vmem:[#allocation2 + $0x1d0] sm:$0xff]  ;;  %v4140_v17 = vpack.c.bf16 %v4080_v8, %v4079_v16  ;;  %v4467_v8 = vld [vmem:[#allocation2 + $0x60] sm:$0xff] }
 0x226   : > { %v4075_v5 = vld [vmem:[#allocation2 + $0x1b0] sm:$0xff] }
 0x22a   : > { %10692 = vmatmul.mubr.msk.bf16.vlgmr.msra.gmra.mrb[120].mxu1 %vm363_vm1, %v3366_v44 }
 0x22b   : > { %10695 = vmatprep.mubr.msk.bf16.mxu1 %vm363_vm1, %v3367_v18  ;;  %10996 = vmatmul.mubr.msk.bf16.gmra.mrb[32].mxu0 %vm363_vm1, %v2993_v4  ;;  %v3751_v4 = vpack.c.bf16 %v3688_v2, %v3687_v1  ;;  %v4076_v2 = vld [vmem:[#allocation2 + $0x1b8] sm:$0xff] }
 0x22c   : > { %10999 = vmatprep.mubr.msk.bf16.mxu0 %vm363_vm1, %v2994_v10  ;;  %10724 = vmatpush3.bf16.msra.mxu1 %v13072_v36  ;;  %v11899_v36 = vld [vmem:[%s13705_s3 + $0x168] sm:$0xff]   ;;  %v3752_v10 = vpack.c.bf16 %v3690_v7, %v3689_v3 }
 0x22d   : > { %10725 = vmatprep.subr.bf16.mxu1 %v11896_v19  ;;  %v11912_v7 = vld [vmem:[%s13705_s3 + $0xa8] sm:$0xff]  }
 0x230   : > { %10726 = vmatpush3.bf16.msra.mxu1 %v11896_v19  ;;  %v3696_v19 = vld [vmem:[#allocation2 + $0x399] sm:$0xff] }
 0x231   : > { %10727 = vmatprep.subr.bf16.mxu1 %v11897_v24 }
 0x232   : > { %10696 = vmatmul.mubr.msk.bf16.gmra.mrb[124].mxu1 %vm363_vm1, %v3368_v11 }
 0x233   : > { %10699 = vmatprep.mubr.msk.bf16.mxu1 %vm363_vm1, %v3369_v28  ;;  %11000 = vmatmul.mubr.msk.bf16.gmra.mrb[36].mxu0 %vm363_vm1, %v6082_v29  ;;  %v3699_v29 = vld [vmem:[#allocation2 + $0x3c1] sm:$0xff] }
 0x234   : > { %11011 = vmatprep.mubr.msk.bf16.mxu0 %vm363_vm1, %v3366_v44  ;;  %10728 = vmatpush3.bf16.msra.mxu1 %v11897_v24  ;;  %v3695_v44 = vld [vmem:[#allocation2 + $0x391] sm:$0xff] }
 0x235   : > { %10729 = vmatprep.subr.bf16.mxu1 %v11898_v30  ;;  %v3755_v24 = vpack.c.bf16 %v3696_v19, %v3695_v44  ;;  %v4081_v44 = vld [vmem:[#allocation2 + $0x1f8] sm:$0xff] }
 0x238   : > { %10730 = vmatpush3.bf16.msra.mxu1 %v11898_v30  ;;  %v3700_v30 = vld [vmem:[#allocation2 + $0x3c9] sm:$0xff] }
 0x239   : > { %10763 = vmatprep.subr.bf16.mxu1 %v13136_v32  ;;  %v3757_v14 = vpack.c.bf16 %v3700_v30, %v3699_v29  ;;  %v11916_v29 = vld [vmem:[%s13705_s3 + $0x1b0] sm:$0xff]   ;;  %v4090_v30 = vld [vmem:[#allocation2 + $0x260] sm:$0xff] }
 0x23a   : > { %10700 = vmatmul.mubr.msk.bf16.gmra.mrb[128].mxu1 %vm363_vm1, %v3370_v38 }
 0x23b   : > { %10703 = vmatprep.mubr.msk.bf16.mxu1 %vm363_vm1, %v3371_v35  ;;  %11012 = vmatmul.mubr.msk.bf16.vlgmr.msra.gmra.mrb[8].mxu0 %vm363_vm1, %v3367_v18  ;;  %v11905_v18 = vld [vmem:[%s13705_s3 + $0x90] sm:$0xff]  }
 0x23c   : > { %11015 = vmatprep.mubr.msk.bf16.mxu0 %vm363_vm1, %v3368_v11  ;;  %11044 = vmatpush3.bf16.msra.mxu0 %v13096_v56  ;;  %v3323_v56 = vld [vmem:[#allocation2 + $0x5d1] sm:$0xff] }
 0x23d   : > { %11045 = vmatprep.subr.bf16.mxu0 %v11899_v36  ;;  %v3376_v45 = vpack.c.bf16 %v3324_v57, %v3323_v56  ;;  %v3698_v11 = vld [vmem:[#allocation2 + $0x3b1] sm:$0xff]  ;;  %v3713_v57 = vld [vmem:[#allocation2 + $0x469] sm:$0xff] }
 0x23e   : > { %v3756_v31 = vpack.c.bf16 %v3698_v11, %v3697_v27  ;;  %v11915_v11 = vld [vmem:[%s13705_s3 + $0x1a8] sm:$0xff]  }
 0x240   : > { %11046 = vmatpush3.bf16.msra.mxu0 %v11899_v36  ;;  %v3704_v36 = vld [vmem:[#allocation2 + $0x3f9] sm:$0xff] }
 0x241   : > { %11047 = vmatprep.subr.bf16.mxu0 %v11900_v41 }
 0x242   : > { %10704 = vmatmul.mubr.msk.bf16.gmra.mrb[132].mxu1 %vm363_vm1, %v3372_v47 }
 0x243   : > { %10707 = vmatprep.mubr.msk.bf16.mxu1 %vm363_vm1, %v3373_v48  ;;  %11016 = vmatmul.mubr.msk.bf16.gmra.mrb[12].mxu0 %vm363_vm1, %v3369_v28  ;;  %v13200_v28 = vld [vmem:[%s13705_s3 + $0xa0] sm:$0xff]  }
 0x244   : > { %11019 = vmatprep.mubr.msk.bf16.mxu0 %vm363_vm1, %v3370_v38  ;;  %11048 = vmatpush3.bf16.msra.mxu0 %v11900_v41  ;;  %v11908_v38 = vld [vmem:[%s13705_s3 + $0x190] sm:$0xff]   ;;  %v11909_v41 = vld [vmem:[%s13705_s3 + $0x198] sm:$0xff]  }
 0x245   : > { %11049 = vmatprep.subr.bf16.mxu0 %v11901_v49 }
 0x248   : > { %11050 = vmatpush3.bf16.msra.mxu0 %v11901_v49  ;;  %v3708_v49 = vld [vmem:[#allocation2 + $0x429] sm:$0xff] }
 0x249   : > { %11083 = vmatprep.subr.bf16.mxu0 %v13160_v46 }
 0x24a   : > { %10708 = vmatmul.mubr.msk.bf16.gmra.mrb[136].mxu1 %vm363_vm1, %v3374_v20 }
 0x24b   : > { %10711 = vmatprep.mubr.msk.bf16.mxu1 %vm363_vm1, %v3375_v54  ;;  %11020 = vmatmul.mubr.msk.bf16.gmra.mrb[16].mxu0 %vm363_vm1, %v3371_v35  ;;  %v3703_v35 = vld [vmem:[#allocation2 + $0x3f1] sm:$0xff] }
 0x24c   : > { %11023 = vmatprep.mubr.msk.bf16.mxu0 %vm363_vm1, %v3372_v47  ;;  %v3759_v40 = vpack.c.bf16 %v3704_v36, %v3703_v35  ;;  %v13224_v47 = vld [vmem:[%s13705_s3 + $0x1a0] sm:$0xff]   ;;  %v4094_v36 = vld [vmem:[#allocation2 + $0x290] sm:$0xff] }
 0x24d   : > { %v13282_v35 = vld [vmem:[%s13705_s3 + $0x1c0] sm:$0xff]  }
 0x252   : > { %10712 = vmatmul.mubr.msk.bf16.gmra.mrb[140].mxu1 %vm363_vm1, %v3376_v45 }
 0x253   : > { %10715 = vmatprep.mubr.msk.bf16.mxu1 %vm363_vm1, %v3377_v60  ;;  %11024 = vmatmul.mubr.msk.bf16.gmra.mrb[20].mxu0 %vm363_vm1, %v3373_v48  ;;  %v3707_v48 = vld [vmem:[#allocation2 + $0x421] sm:$0xff] }
 0x254   : > { %11027 = vmatprep.mubr.msk.bf16.mxu0 %vm363_vm1, %v3374_v20  ;;  %v3761_v51 = vpack.c.bf16 %v3708_v49, %v3707_v48  ;;  %v3712_v20 = vld [vmem:[#allocation2 + $0x459] sm:$0xff] }
 0x255   : > { %v3763_v56 = vpack.c.bf16 %v3712_v20, %v3711_v53  ;;  %v4095_v48 = vld [vmem:[#allocation2 + $0x2a0] sm:$0xff]  ;;  %v4099_v53 = vld [vmem:[#allocation2 + $0x2d0] sm:$0xff] }
 0x256   : > { %v4148_v49 = vpack.c.bf16 %v4096_v43, %v4095_v48 }
 0x25a   : > { %10716 = vmatmul.mubr.msk.bf16.gmra.mrb[144].mxu1 %vm363_vm1, %v3378_v63 }
 0x25b   : > { %10719 = vmatprep.mubr.msk.bf16.mxu1 %vm363_vm1, %v3379_v0  ;;  %11028 = vmatmul.mubr.msk.bf16.gmra.mrb[24].mxu0 %vm363_vm1, %v3375_v54 }
 0x25c   : > { %11031 = vmatprep.mubr.msk.bf16.mxu0 %vm363_vm1, %v3376_v45  ;;  %v3716_v45 = vld [vmem:[#allocation2 + $0x489] sm:$0xff] }
 0x25d   : > { %v3765_v61 = vpack.c.bf16 %v3716_v45, %v3715_v59  ;;  %v4103_v59 = vld [vmem:[#allocation2 + $0x300] sm:$0xff] }
 0x262   : > { %10720 = vmatmul.mubr.msk.bf16.gmra.mrb[148].mxu1 %vm363_vm1, %v3380_v6 }
 0x263   : > { %11032 = vmatmul.mubr.msk.bf16.gmra.mrb[28].mxu0 %vm363_vm1, %v3377_v60  ;;  %10731 = vmatprep.mubr.msk.bf16.mxu1 %vm363_vm1, %v3751_v4  ;;  %v3764_v60 = vpack.c.bf16 %v3714_v58, %v3713_v57  ;;  %v4138_v4 = vpack.c.bf16 %v4076_v2, %v4075_v5  ;;  %v4104_v57 = vld [vmem:[#allocation2 + $0x308] sm:$0xff]  ;;  %v7192_v2 = vld [vmem:[#allocation2 + $0x318] sm:$0xff]  ;;  %v4466_v5 = vld [vmem:[#allocation2 + $0x50] sm:$0xff] }
 0x264   : > { %11035 = vmatprep.mubr.msk.bf16.mxu0 %vm363_vm1, %v3378_v63  ;;  %v3766_v63 = vpack.c.bf16 %v3718_v37, %v3717_v62  ;;  %v4460_v58 = vld [vmem:[#allocation2 + $0x8] sm:$0xff]  ;;  %v4152_v45 = vpack.c.bf16 %v4104_v57, %v4103_v59  ;;  %v4462_v62 = vld [vmem:[#allocation2 + $0x20] sm:$0xff]  ;;  %v4464_v37 = vld [vmem:[#allocation2 + $0x38] sm:$0xff] }
 0x265   : > { %v7938_v57 = vld [vmem:[#allocation2 + $0x1d1] sm:$0xff]  ;;  %v7937_v59 = vld [vmem:[#allocation2 + $0x1c9] sm:$0xff] }
 0x26a   : > { %10732 = vmatmul.mubr.msk.bf16.vlgmr.msra.gmra.mrb[120].mxu1 %vm363_vm1, %v3752_v10 }
 0x26b   : > { %10735 = vmatprep.mubr.msk.bf16.mxu1 %vm363_vm1, %v3753_v12  ;;  %11036 = vmatmul.mubr.msk.bf16.gmra.mrb[32].mxu0 %vm363_vm1, %v3379_v0  ;;  %v4073_v0 = vld [vmem:[#allocation2 + $0x198] sm:$0xff] }
 0x26c   : > { %11039 = vmatprep.mubr.msk.bf16.mxu0 %vm363_vm1, %v3380_v6  ;;  %10764 = vmatpush3.bf16.msra.mxu1 %v13136_v32  ;;  %v11907_v32 = vld [vmem:[%s13705_s3 + $0x188] sm:$0xff]   ;;  %v4137_v1 = vpack.c.bf16 %v4074_v55, %v4073_v0  ;;  %v4461_v55 = vld [vmem:[#allocation2 + $0x18] sm:$0xff]  ;;  %v4463_v0 = vld [vmem:[#allocation2 + $0x30] sm:$0xff] }
 0x26d   : > { %10765 = vmatprep.subr.bf16.mxu1 %v11904_v13  ;;  %v4077_v6 = vld [vmem:[#allocation2 + $0x1c8] sm:$0xff] }
 0x26e   : > { %v4139_v3 = vpack.c.bf16 %v4078_v15, %v4077_v6  ;;  %v7193_v15 = vld [vmem:[#allocation2 + $0x320] sm:$0xff]  ;;  %v4465_v6 = vld [vmem:[#allocation2 + $0x48] sm:$0xff] }
 0x270   : > { %10766 = vmatpush3.bf16.msra.mxu1 %v11904_v13  ;;  %v6806_v13 = vld [vmem:[#allocation2 + $0x4b9] sm:$0xff] }
 0x271   : > { %10767 = vmatprep.subr.bf16.mxu1 %v11905_v18 }
 0x272   : > { %10736 = vmatmul.mubr.msk.bf16.gmra.mrb[124].mxu1 %vm363_vm1, %v3754_v23 }
 0x273   : > { %10739 = vmatprep.mubr.msk.bf16.mxu1 %vm363_vm1, %v3755_v24  ;;  %11040 = vmatmul.mubr.msk.bf16.gmra.mrb[36].mxu0 %vm363_vm1, %v6468_v25 }
 0x274   : > { %11051 = vmatprep.mubr.msk.bf16.mxu0 %vm363_vm1, %v3752_v10  ;;  %10768 = vmatpush3.bf16.msra.mxu1 %v11905_v18  ;;  %v4082_v10 = vld [vmem:[#allocation2 + $0x200] sm:$0xff] }
 0x275   : > { %10769 = vmatprep.subr.bf16.mxu1 %v11906_v26  ;;  %v4141_v18 = vpack.c.bf16 %v4082_v10, %v4081_v44  ;;  %v4470_v10 = vld [vmem:[#allocation2 + $0x80] sm:$0xff] }
 0x278   : > { %10770 = vmatpush3.bf16.msra.mxu1 %v11906_v26  ;;  %v4085_v26 = vld [vmem:[#allocation2 + $0x228] sm:$0xff] }
 0x279   : > { %10803 = vmatprep.subr.bf16.mxu1 %v13200_v28 }
 0x27a   : > { %10740 = vmatmul.mubr.msk.bf16.gmra.mrb[128].mxu1 %vm363_vm1, %v3756_v31 }
 0x27b   : > { %10743 = vmatprep.mubr.msk.bf16.mxu1 %vm363_vm1, %v3757_v14  ;;  %11052 = vmatmul.mubr.msk.bf16.vlgmr.msra.gmra.mrb[8].mxu0 %vm363_vm1, %v3753_v12  ;;  %v6805_v12 = vld [vmem:[#allocation2 + $0x4b1] sm:$0xff] }
 0x27c   : > { %11055 = vmatprep.mubr.msk.bf16.mxu0 %vm363_vm1, %v3754_v23  ;;  %11084 = vmatpush3.bf16.msra.mxu0 %v13160_v46  ;;  %v3709_v46 = vld [vmem:[#allocation2 + $0x439] sm:$0xff]  ;;  %v6854_v19 = vpack.c.bf16 %v6806_v13, %v6805_v12  ;;  %v4086_v23 = vld [vmem:[#allocation2 + $0x230] sm:$0xff] }
 0x27d   : > { %11085 = vmatprep.subr.bf16.mxu0 %v11907_v32  ;;  %v3762_v54 = vpack.c.bf16 %v3710_v52, %v3709_v46  ;;  %v4143_v27 = vpack.c.bf16 %v4086_v23, %v4085_v26  ;;  %v4100_v46 = vld [vmem:[#allocation2 + $0x2d8] sm:$0xff]  ;;  %v4102_v52 = vld [vmem:[#allocation2 + $0x2f0] sm:$0xff]  ;;  %v4473_v23 = vld [vmem:[#allocation2 + $0xa8] sm:$0xff] }
 0x27e   : > { %v4150_v20 = vpack.c.bf16 %v4100_v46, %v4099_v53  ;;  %v4472_v12 = vld [vmem:[#allocation2 + $0x98] sm:$0xff]  ;;  %v7579_v46 = vld [vmem:[#allocation2 + $0x180] sm:$0xff] }
 0x27f   : > { %v4469_v13 = vld [vmem:[#allocation2 + $0x78] sm:$0xff] }
 0x280   : > { %11086 = vmatpush3.bf16.msra.mxu0 %v11907_v32  ;;  %v4089_v32 = vld [vmem:[#allocation2 + $0x258] sm:$0xff]  ;;  %v4528_v16 = vpack.c.bf16 %v4470_v10, %v4469_v13  ;;  %v7950_v10 = vld [vmem:[#allocation2 + $0x261] sm:$0xff] }
 0x281   : > { %11087 = vmatprep.subr.bf16.mxu0 %v11908_v38  ;;  %v4145_v33 = vpack.c.bf16 %v4090_v30, %v4089_v32  ;;  %v4477_v30 = vld [vmem:[#allocation2 + $0xd8] sm:$0xff] }
 0x282   : > { %10744 = vmatmul.mubr.msk.bf16.gmra.mrb[132].mxu1 %vm363_vm1, %v3758_v39  ;;  %v7949_v13 = vld [vmem:[#allocation2 + $0x259] sm:$0xff] }
 0x283   : > { %10747 = vmatprep.mubr.msk.bf16.mxu1 %vm363_vm1, %v3759_v40  ;;  %11056 = vmatmul.mubr.msk.bf16.gmra.mrb[12].mxu0 %vm363_vm1, %v3755_v24  ;;  %v4083_v24 = vld [vmem:[#allocation2 + $0x210] sm:$0xff] }
 0x284   : > { %11059 = vmatprep.mubr.msk.bf16.mxu0 %vm363_vm1, %v3756_v31  ;;  %11088 = vmatpush3.bf16.msra.mxu0 %v11908_v38  ;;  %v4142_v25 = vpack.c.bf16 %v4084_v22, %v4083_v24  ;;  %v4087_v31 = vld [vmem:[#allocation2 + $0x240] sm:$0xff]  ;;  %v4092_v38 = vld [vmem:[#allocation2 + $0x278] sm:$0xff]  ;;  %v4476_v22 = vld [vmem:[#allocation2 + $0xc8] sm:$0xff] }
 0x285   : > { %11089 = vmatprep.subr.bf16.mxu0 %v11909_v41 }
 0x288   : > { %11090 = vmatpush3.bf16.msra.mxu0 %v11909_v41  ;;  %v4093_v41 = vld [vmem:[#allocation2 + $0x288] sm:$0xff] }
 0x289   : > { %11123 = vmatprep.subr.bf16.mxu0 %v13224_v47  ;;  %v4147_v42 = vpack.c.bf16 %v4094_v36, %v4093_v41  ;;  %v4483_v36 = vld [vmem:[#allocation2 + $0x120] sm:$0xff]  ;;  %v4488_v41 = vld [vmem:[#allocation2 + $0x158] sm:$0xff] }
 0x28a   : > { %10748 = vmatmul.mubr.msk.bf16.gmra.mrb[136].mxu1 %vm363_vm1, %v3760_v50 }
 0x28b   : > { %10751 = vmatprep.mubr.msk.bf16.mxu1 %vm363_vm1, %v3761_v51  ;;  %11060 = vmatmul.mubr.msk.bf16.gmra.mrb[16].mxu0 %vm363_vm1, %v3757_v14 }
 0x28c   : > { %11063 = vmatprep.mubr.msk.bf16.mxu0 %vm363_vm1, %v3758_v39  ;;  %v4091_v39 = vld [vmem:[#allocation2 + $0x270] sm:$0xff] }
 0x292   : > { %10752 = vmatmul.mubr.msk.bf16.gmra.mrb[140].mxu1 %vm363_vm1, %v3762_v54 }
 0x293   : > { %10755 = vmatprep.mubr.msk.bf16.mxu1 %vm363_vm1, %v3763_v56  ;;  %11064 = vmatmul.mubr.msk.bf16.gmra.mrb[20].mxu0 %vm363_vm1, %v3759_v40  ;;  %v4146_v40 = vpack.c.bf16 %v4092_v38, %v4091_v39  ;;  %v4481_v38 = vld [vmem:[#allocation2 + $0x108] sm:$0xff] }
 0x294   : > { %11067 = vmatprep.mubr.msk.bf16.mxu0 %vm363_vm1, %v3760_v50  ;;  %v4097_v50 = vld [vmem:[#allocation2 + $0x2b8] sm:$0xff] }
 0x29a   : > { %10756 = vmatmul.mubr.msk.bf16.gmra.mrb[144].mxu1 %vm363_vm1, %v3764_v60 }
 0x29b   : > { %10759 = vmatprep.mubr.msk.bf16.mxu1 %vm363_vm1, %v3765_v61  ;;  %11068 = vmatmul.mubr.msk.bf16.gmra.mrb[24].mxu0 %vm363_vm1, %v3761_v51 }
 0x29c   : > { %11071 = vmatprep.mubr.msk.bf16.mxu0 %vm363_vm1, %v3762_v54  ;;  %v4101_v54 = vld [vmem:[#allocation2 + $0x2e8] sm:$0xff] }
 0x2a2   : > { %10760 = vmatmul.mubr.msk.bf16.gmra.mrb[148].mxu1 %vm363_vm1, %v3766_v63 }
 0x2a3   : > { %10771 = vmatprep.mubr.msk.bf16.mxu1 %vm363_vm1, %v4137_v1  ;;  %11072 = vmatmul.mubr.msk.bf16.gmra.mrb[28].mxu0 %vm363_vm1, %v3763_v56  ;;  %v4151_v56 = vpack.c.bf16 %v4102_v52, %v4101_v54  ;;  %v4525_v1 = vpack.c.bf16 %v4464_v37, %v4463_v0  ;;  %v7580_v52 = vld [vmem:[#allocation2 + $0x188] sm:$0xff]  ;;  %v7935_v54 = vld [vmem:[#allocation2 + $0x1b1] sm:$0xff]  ;;  %v7941_v0 = vld [vmem:[#allocation2 + $0x1f9] sm:$0xff] }
 0x2a4   : > { %11075 = vmatprep.mubr.msk.bf16.mxu0 %vm363_vm1, %v3764_v60  ;;  %v4459_v60 = vld [vmem:[#allocation2] sm:$0xff]  ;;  %v7628_v53 = vpack.c.bf16 %v7580_v52, %v7579_v46  ;;  %v11924_v37 = vld [vmem:[%s13705_s3 + $0x1f0] sm:$0xff]  }
 0x2a5   : > { %v8328_v46 = vld [vmem:[#allocation2 + $0x69] sm:$0xff]  ;;  %v8329_v52 = vld [vmem:[#allocation2 + $0x79] sm:$0xff] }
 0x2aa   : > { %10772 = vmatmul.mubr.msk.bf16.vlgmr.msra.gmra.mrb[120].mxu1 %vm363_vm1, %v4138_v4 }
 0x2ab   : > { %10775 = vmatprep.mubr.msk.bf16.mxu1 %vm363_vm1, %v4139_v3  ;;  %11076 = vmatmul.mubr.msk.bf16.gmra.mrb[32].mxu0 %vm363_vm1, %v3765_v61  ;;  %v4523_v61 = vpack.c.bf16 %v4460_v58, %v4459_v60  ;;  %v7940_v58 = vld [vmem:[#allocation2 + $0x1e9] sm:$0xff]  ;;  %v7939_v60 = vld [vmem:[#allocation2 + $0x1e1] sm:$0xff] }
 0x2ac   : > { %11079 = vmatprep.mubr.msk.bf16.mxu0 %vm363_vm1, %v3766_v63  ;;  %10804 = vmatpush3.bf16.msra.mxu1 %v13200_v28  ;;  %v4088_v28 = vld [vmem:[#allocation2 + $0x248] sm:$0xff]  ;;  %v4524_v63 = vpack.c.bf16 %v4462_v62, %v4461_v55  ;;  %v8001_v62 = vpack.c.bf16 %v7940_v58, %v7939_v60 }
 0x2ad   : > { %10805 = vmatprep.subr.bf16.mxu1 %v11912_v7  ;;  %v4144_v14 = vpack.c.bf16 %v4088_v28, %v4087_v31  ;;  %v11922_v28 = vld [vmem:[%s13705_s3 + $0x1e0] sm:$0xff]   ;;  %v8333_v58 = vld [vmem:[#allocation2 + $0xa9] sm:$0xff] }
 0x2ae   : > { %v7942_v55 = vld [vmem:[#allocation2 + $0x201] sm:$0xff] }
 0x2b0   : > { %10806 = vmatpush3.bf16.msra.mxu1 %v11912_v7  ;;  %v4526_v7 = vpack.c.bf16 %v4466_v5, %v4465_v6  ;;  %v7948_v6 = vld [vmem:[#allocation2 + $0x249] sm:$0xff] }
 0x2b1   : > { %10807 = vmatprep.subr.bf16.mxu1 %v11913_v9 }
 0x2b2   : > { %10776 = vmatmul.mubr.msk.bf16.gmra.mrb[124].mxu1 %vm363_vm1, %v4140_v17 }
 0x2b3   : > { %10779 = vmatprep.mubr.msk.bf16.mxu1 %vm363_vm1, %v4141_v18  ;;  %11080 = vmatmul.mubr.msk.bf16.gmra.mrb[36].mxu0 %vm363_vm1, %v6854_v19  ;;  %v4474_v19 = vld [vmem:[#allocation2 + $0xb0] sm:$0xff] }
 0x2b4   : > { %11091 = vmatprep.mubr.msk.bf16.mxu0 %vm363_vm1, %v4138_v4  ;;  %10808 = vmatpush3.bf16.msra.mxu1 %v11913_v9  ;;  %v4468_v4 = vld [vmem:[#allocation2 + $0x68] sm:$0xff]  ;;  %v4530_v24 = vpack.c.bf16 %v4474_v19, %v4473_v23 }
 0x2b5   : > { %10809 = vmatprep.subr.bf16.mxu1 %v11914_v21  ;;  %v4527_v9 = vpack.c.bf16 %v4468_v4, %v4467_v8  ;;  %v7946_v4 = vld [vmem:[#allocation2 + $0x231] sm:$0xff]  ;;  %v7947_v8 = vld [vmem:[#allocation2 + $0x241] sm:$0xff]  ;;  %v7956_v19 = vld [vmem:[#allocation2 + $0x2a9] sm:$0xff] }
 0x2b6   : > { %v7955_v23 = vld [vmem:[#allocation2 + $0x2a1] sm:$0xff] }
 0x2b8   : > { %10810 = vmatpush3.bf16.msra.mxu1 %v11914_v21  ;;  %v11920_v21 = vld [vmem:[%s13705_s3 + $0x1d0] sm:$0xff]  }
 0x2ba   : > { %10780 = vmatmul.mubr.msk.bf16.gmra.mrb[128].mxu1 %vm363_vm1, %v4142_v25 }
 0x2bb   : > { %10783 = vmatprep.mubr.msk.bf16.mxu1 %vm363_vm1, %v4143_v27  ;;  %11092 = vmatmul.mubr.msk.bf16.vlgmr.msra.gmra.mrb[8].mxu0 %vm363_vm1, %v4139_v3  ;;  %v7241_v3 = vpack.c.bf16 %v7193_v15, %v7192_v2  ;;  %v7943_v2 = vld [vmem:[#allocation2 + $0x211] sm:$0xff] }
 0x2bc   : > { %11095 = vmatprep.mubr.msk.bf16.mxu0 %vm363_vm1, %v4140_v17  ;;  %11124 = vmatpush3.bf16.msra.mxu0 %v13224_v47  ;;  %v4098_v47 = vld [vmem:[#allocation2 + $0x2c0] sm:$0xff]  ;;  %v4471_v17 = vld [vmem:[#allocation2 + $0x90] sm:$0xff]  ;;  %v11925_v15 = vld [vmem:[%s13705_s3 + $0x1f8] sm:$0xff]  }
 0x2bd   : > { %11125 = vmatprep.subr.bf16.mxu0 %v11915_v11  ;;  %v4149_v51 = vpack.c.bf16 %v4098_v47, %v4097_v50  ;;  %v4529_v44 = vpack.c.bf16 %v4472_v12, %v4471_v17  ;;  %v4487_v47 = vld [vmem:[#allocation2 + $0x150] sm:$0xff]  ;;  %v4489_v50 = vld [vmem:[#allocation2 + $0x168] sm:$0xff]  ;;  %v7952_v12 = vld [vmem:[#allocation2 + $0x279] sm:$0xff] }
 0x2be   : > { %v4537_v48 = vpack.c.bf16 %v4488_v41, %v4487_v47  ;;  %v7951_v17 = vld [vmem:[#allocation2 + $0x271] sm:$0xff]  ;;  %v8325_v47 = vld [vmem:[#allocation2 + $0x49] sm:$0xff] }
 0x2c0   : > { %11126 = vmatpush3.bf16.msra.mxu0 %v11915_v11  ;;  %v4478_v11 = vld [vmem:[#allocation2 + $0xe0] sm:$0xff] }
 0x2c1   : > { %11127 = vmatprep.subr.bf16.mxu0 %v11916_v29  ;;  %v4532_v31 = vpack.c.bf16 %v4478_v11, %v4477_v30  ;;  %v7962_v30 = vld [vmem:[#allocation2 + $0x2f1] sm:$0xff] }
 0x2c2   : > { %10784 = vmatmul.mubr.msk.bf16.gmra.mrb[132].mxu1 %vm363_vm1, %v4144_v14 }
 0x2c3   : > { %10787 = vmatprep.mubr.msk.bf16.mxu1 %vm363_vm1, %v4145_v33  ;;  %11096 = vmatmul.mubr.msk.bf16.gmra.mrb[12].mxu0 %vm363_vm1, %v4141_v18  ;;  %v11919_v18 = vld [vmem:[%s13705_s3 + $0x1c8] sm:$0xff]  }
 0x2c4   : > { %11099 = vmatprep.mubr.msk.bf16.mxu0 %vm363_vm1, %v4142_v25  ;;  %11128 = vmatpush3.bf16.msra.mxu0 %v11916_v29  ;;  %v4475_v25 = vld [vmem:[#allocation2 + $0xc0] sm:$0xff]  ;;  %v4480_v29 = vld [vmem:[#allocation2 + $0xf8] sm:$0xff] }
 0x2c5   : > { %11129 = vmatprep.subr.bf16.mxu0 %v11917_v34  ;;  %v4531_v26 = vpack.c.bf16 %v4476_v22, %v4475_v25  ;;  %v7958_v25 = vld [vmem:[#allocation2 + $0x2c1] sm:$0xff] }
 0x2c8   : > { %11130 = vmatpush3.bf16.msra.mxu0 %v11917_v34  ;;  %v4484_v34 = vld [vmem:[#allocation2 + $0x128] sm:$0xff] }
 0x2c9   : > { %11163 = vmatprep.subr.bf16.mxu0 %v13282_v35  ;;  %v4535_v39 = vpack.c.bf16 %v4484_v34, %v4483_v36 }
 0x2ca   : > { %10788 = vmatmul.mubr.msk.bf16.gmra.mrb[136].mxu1 %vm363_vm1, %v4146_v40 }
 0x2cb   : > { %10791 = vmatprep.mubr.msk.bf16.mxu1 %vm363_vm1, %v4147_v42  ;;  %11100 = vmatmul.mubr.msk.bf16.gmra.mrb[16].mxu0 %vm363_vm1, %v4143_v27  ;;  %v11921_v27 = vld [vmem:[%s13705_s3 + $0x1d8] sm:$0xff]  }
 0x2cc   : > { %11103 = vmatprep.mubr.msk.bf16.mxu0 %vm363_vm1, %v4144_v14  ;;  %v4479_v14 = vld [vmem:[#allocation2 + $0xf0] sm:$0xff] }
 0x2cd   : > { %v4533_v32 = vpack.c.bf16 %v4480_v29, %v4479_v14  ;;  %v7961_v14 = vld [vmem:[#allocation2 + $0x2e9] sm:$0xff] }
 0x2d2   : > { %10792 = vmatmul.mubr.msk.bf16.gmra.mrb[140].mxu1 %vm363_vm1, %v4148_v49 }
 0x2d3   : > { %10795 = vmatprep.mubr.msk.bf16.mxu1 %vm363_vm1, %v4149_v51  ;;  %11104 = vmatmul.mubr.msk.bf16.gmra.mrb[20].mxu0 %vm363_vm1, %v4145_v33  ;;  %v4482_v33 = vld [vmem:[#allocation2 + $0x110] sm:$0xff] }
 0x2d4   : > { %11107 = vmatprep.mubr.msk.bf16.mxu0 %vm363_vm1, %v4146_v40  ;;  %v4486_v40 = vld [vmem:[#allocation2 + $0x140] sm:$0xff] }
 0x2da   : > { %10796 = vmatmul.mubr.msk.bf16.gmra.mrb[144].mxu1 %vm363_vm1, %v4150_v20 }
 0x2db   : > { %10799 = vmatprep.mubr.msk.bf16.mxu1 %vm363_vm1, %v4151_v56  ;;  %11108 = vmatmul.mubr.msk.bf16.gmra.mrb[24].mxu0 %vm363_vm1, %v4147_v42  ;;  %v4485_v42 = vld [vmem:[#allocation2 + $0x138] sm:$0xff] }
 0x2dc   : > { %11111 = vmatprep.mubr.msk.bf16.mxu0 %vm363_vm1, %v4148_v49  ;;  %v4536_v43 = vpack.c.bf16 %v4486_v40, %v4485_v42  ;;  %v4490_v49 = vld [vmem:[#allocation2 + $0x170] sm:$0xff]  ;;  %v8322_v40 = vld [vmem:[#allocation2 + $0x21] sm:$0xff] }
 0x2dd   : > { %v8323_v42 = vld [vmem:[#allocation2 + $0x31] sm:$0xff] }
 0x2e2   : > { %10800 = vmatmul.mubr.msk.bf16.gmra.mrb[148].mxu1 %vm363_vm1, %v4152_v45 }
 0x2e3   : > { %10811 = vmatprep.mubr.msk.bf16.mxu1 %vm363_vm1, %v4523_v61  ;;  %11112 = vmatmul.mubr.msk.bf16.gmra.mrb[28].mxu0 %vm363_vm1, %v4149_v51  ;;  %v4538_v51 = vpack.c.bf16 %v4490_v49, %v4489_v50  ;;  %v11923_v61 = vld [vmem:[%s13705_s3 + $0x1e8] sm:$0xff]  }
 0x2e4   : > { %11115 = vmatprep.mubr.msk.bf16.mxu0 %vm363_vm1, %v4150_v20  ;;  %v7936_v20 = vld [vmem:[#allocation2 + $0x1b9] sm:$0xff] }
 0x2ea   : > { %10812 = vmatmul.mubr.msk.bf16.vlgmr.msra.gmra.mrb[120].mxu1 %vm363_vm1, %v4524_v63 }
 0x2eb   : > { %10815 = vmatprep.mubr.msk.bf16.mxu1 %vm363_vm1, %v4525_v1  ;;  %11116 = vmatmul.mubr.msk.bf16.gmra.mrb[32].mxu0 %vm363_vm1, %v4151_v56  ;;  %v7999_v56 = vpack.c.bf16 %v7936_v20, %v7935_v54 }
 0x2ec   : > { %11119 = vmatprep.mubr.msk.bf16.mxu0 %vm363_vm1, %v4152_v45  ;;  %v8000_v45 = vpack.c.bf16 %v7938_v57, %v7937_v59  ;;  %v8332_v57 = vld [vmem:[#allocation2 + $0x99] sm:$0xff]  ;;  %v8334_v59 = vld [vmem:[#allocation2 + $0xb1] sm:$0xff] }
 0x2ed   : > { %v8391_v60 = vpack.c.bf16 %v8334_v59, %v8333_v58  ;;  %v13442_v58 = vld [vmem:[%s13706_s4] ss:$0 sm:$0xff] }
 0x2f2   : > { %10816 = vmatmul.mubr.msk.bf16.gmra.mrb[124].mxu1 %vm363_vm1, %v4526_v7 }
 0x2f3   : > { %10819 = vmatprep.mubr.msk.bf16.mxu1 %vm363_vm1, %v4527_v9  ;;  %11120 = vmatmul.mubr.msk.bf16.gmra.mrb[36].mxu0 %vm363_vm1, %v7241_v3  ;;  %v7945_v3 = vld [vmem:[#allocation2 + $0x229] sm:$0xff] }
 0x2f4   : > { %11131 = vmatprep.mubr.msk.bf16.mxu0 %vm363_vm1, %v4524_v63  ;;  %v7944_v63 = vld [vmem:[#allocation2 + $0x219] sm:$0xff] }
 0x2f5   : > { %v8003_v5 = vpack.c.bf16 %v7944_v63, %v7943_v2  ;;  %v8340_v2 = vld [vmem:[#allocation2 + $0xf9] sm:$0xff] }
 0x2fa   : > { %10820 = vmatmul.mubr.msk.bf16.gmra.mrb[128].mxu1 %vm363_vm1, %v4528_v16 }
 0x2fb   : > { %10823 = vmatprep.mubr.msk.bf16.mxu1 %vm363_vm1, %v4529_v44  ;;  %11132 = vmatmul.mubr.msk.bf16.vlgmr.msra.gmra.mrb[8].mxu0 %vm363_vm1, %v4525_v1  ;;  %v8002_v1 = vpack.c.bf16 %v7942_v55, %v7941_v0  ;;  %v8338_v55 = vld [vmem:[#allocation2 + $0xe1] sm:$0xff] }
 0x2fc   : > { %11135 = vmatprep.mubr.msk.bf16.mxu0 %vm363_vm1, %v4526_v7  ;;  %11164 = vmatpush3.bf16.msra.mxu0 %v13282_v35  ;;  %v4534_v35 = vpack.c.bf16 %v4482_v33, %v4481_v38  ;;  %v8004_v7 = vpack.c.bf16 %v7946_v4, %v7945_v3  ;;  %v7963_v33 = vld [vmem:[#allocation2 + $0x301] sm:$0xff]  ;;  %v7965_v38 = vld [vmem:[#allocation2 + $0x319] sm:$0xff] }
 0x2fd   : > { %11165 = vmatprep.subr.bf16.mxu0 %v11919_v18  ;;  %v8343_v3 = vld [vmem:[#allocation2 + $0x121] sm:$0xff] }
 0x300   : > { %11166 = vmatpush3.bf16.msra.mxu0 %v11919_v18  ;;  %v7954_v18 = vld [vmem:[#allocation2 + $0x291] sm:$0xff] }
 0x301   : > { %11167 = vmatprep.subr.bf16.mxu0 %v11920_v21 }
 0x302   : > { %10824 = vmatmul.mubr.msk.bf16.gmra.mrb[132].mxu1 %vm363_vm1, %v4530_v24 }
 0x303   : > { %10827 = vmatprep.mubr.msk.bf16.mxu1 %vm363_vm1, %v4531_v26  ;;  %11136 = vmatmul.mubr.msk.bf16.gmra.mrb[12].mxu0 %vm363_vm1, %v4527_v9  ;;  %v8005_v9 = vpack.c.bf16 %v7948_v6, %v7947_v8  ;;  %v8345_v8 = vld [vmem:[#allocation2 + $0x139] sm:$0xff] }
 0x304   : > { %11139 = vmatprep.mubr.msk.bf16.mxu0 %vm363_vm1, %v4528_v16  ;;  %11168 = vmatpush3.bf16.msra.mxu0 %v11920_v21  ;;  %v8006_v16 = vpack.c.bf16 %v7950_v10, %v7949_v13  ;;  %v7953_v21 = vld [vmem:[#allocation2 + $0x289] sm:$0xff]  ;;  %v8347_v13 = vld [vmem:[#allocation2 + $0x151] sm:$0xff] }
 0x305   : > { %11169 = vmatprep.subr.bf16.mxu0 %v11921_v27  ;;  %v8008_v22 = vpack.c.bf16 %v7954_v18, %v7953_v21  ;;  %v8351_v21 = vld [vmem:[#allocation2 + $0x181] sm:$0xff] }
 0x308   : > { %11170 = vmatpush3.bf16.msra.mxu0 %v11921_v27  ;;  %v7957_v27 = vld [vmem:[#allocation2 + $0x2b9] sm:$0xff] }
 0x309   : > { %11203 = vmatprep.subr.bf16.mxu0 %v11922_v28  ;;  %v8010_v11 = vpack.c.bf16 %v7958_v25, %v7957_v27 }
 0x30a   : > { %10828 = vmatmul.mubr.msk.bf16.gmra.mrb[136].mxu1 %vm363_vm1, %v4532_v31 }
 0x30b   : > { %10831 = vmatprep.mubr.msk.bf16.mxu1 %vm363_vm1, %v4533_v32  ;;  %11140 = vmatmul.mubr.msk.bf16.gmra.mrb[16].mxu0 %vm363_vm1, %v4529_v44  ;;  %v8007_v44 = vpack.c.bf16 %v7952_v12, %v7951_v17  ;;  %v8349_v17 = vld [vmem:[#allocation2 + $0x169] sm:$0xff] }
 0x30c   : > { %11143 = vmatprep.mubr.msk.bf16.mxu0 %vm363_vm1, %v4530_v24  ;;  %v8009_v24 = vpack.c.bf16 %v7956_v19, %v7955_v23 }
 0x312   : > { %10832 = vmatmul.mubr.msk.bf16.gmra.mrb[140].mxu1 %vm363_vm1, %v4534_v35 }
 0x313   : > { %10835 = vmatprep.mubr.msk.bf16.mxu1 %vm363_vm1, %v4535_v39  ;;  %11144 = vmatmul.mubr.msk.bf16.gmra.mrb[20].mxu0 %vm363_vm1, %v4531_v26  ;;  %v7960_v26 = vld [vmem:[#allocation2 + $0x2d9] sm:$0xff] }
 0x314   : > { %11147 = vmatprep.mubr.msk.bf16.mxu0 %vm363_vm1, %v4532_v31  ;;  %v7964_v31 = vld [vmem:[#allocation2 + $0x309] sm:$0xff] }
 0x315   : > { %v8013_v34 = vpack.c.bf16 %v7964_v31, %v7963_v33 }
 0x31a   : > { %10836 = vmatmul.mubr.msk.bf16.gmra.mrb[144].mxu1 %vm363_vm1, %v4536_v43 }
 0x31b   : > { %10839 = vmatprep.mubr.msk.bf16.mxu1 %vm363_vm1, %v4537_v48  ;;  %11148 = vmatmul.mubr.msk.bf16.gmra.mrb[24].mxu0 %vm363_vm1, %v4533_v32  ;;  %v8012_v32 = vpack.c.bf16 %v7962_v30, %v7961_v14 }
 0x31c   : > { %11151 = vmatprep.mubr.msk.bf16.mxu0 %vm363_vm1, %v4534_v35  ;;  %v7966_v35 = vld [vmem:[#allocation2 + $0x321] sm:$0xff] }
 0x31d   : > { %v8014_v36 = vpack.c.bf16 %v7966_v35, %v7965_v38 }
 0x322   : > { %10840 = vmatmul.mubr.msk.bf16.gmra.mrb[148].mxu1 %vm363_vm1, %v4538_v51 }
 0x323   : > { %11152 = vmatmul.mubr.msk.bf16.gmra.mrb[28].mxu0 %vm363_vm1, %v4535_v39  ;;  %v8321_v39 = vld [vmem:[#allocation2 + $0x19] sm:$0xff] }
 0x324   : > { %11155 = vmatprep.mubr.msk.bf16.mxu0 %vm363_vm1, %v4536_v43  ;;  %v8385_v41 = vpack.c.bf16 %v8322_v40, %v8321_v39  ;;  %v8324_v43 = vld [vmem:[#allocation2 + $0x39] sm:$0xff] }
 0x325   : > { %v8386_v49 = vpack.c.bf16 %v8324_v43, %v8323_v42 }
 0x32b   : > { %11156 = vmatmul.mubr.msk.bf16.gmra.mrb[32].mxu0 %vm363_vm1, %v4537_v48  ;;  %v8326_v48 = vld [vmem:[#allocation2 + $0x51] sm:$0xff] }
 0x32c   : > { %11159 = vmatprep.mubr.msk.bf16.mxu0 %vm363_vm1, %v4538_v51  ;;  %v8387_v50 = vpack.c.bf16 %v8326_v48, %v8325_v47  ;;  %v8327_v51 = vld [vmem:[#allocation2 + $0x61] sm:$0xff] }
 0x32d   : > { %v8388_v20 = vpack.c.bf16 %v8328_v46, %v8327_v51 }
 0x333   : > { %11160 = vmatmul.mubr.msk.bf16.gmra.mrb[36].mxu0 %vm363_vm1, %v7628_v53  ;;  %v8330_v53 = vld [vmem:[#allocation2 + $0x81] sm:$0xff] }
 0x334   : > { %11171 = vmatprep.mubr.msk.bf16.mxu0 %vm363_vm1, %v7999_v56  ;;  %v8389_v54 = vpack.c.bf16 %v8330_v53, %v8329_v52  ;;  %v8331_v56 = vld [vmem:[#allocation2 + $0x91] sm:$0xff] }
 0x33b   : > { %11172 = vmatmul.mubr.msk.bf16.vlgmr.msra.gmra.mrb[8].mxu0 %vm363_vm1, %v8000_v45  ;;  %v8390_v45 = vpack.c.bf16 %v8332_v57, %v8331_v56 }
 0x33c   : > { %11175 = vmatprep.mubr.msk.bf16.mxu0 %vm363_vm1, %v8001_v62  ;;  %11204 = vmatpush3.bf16.msra.mxu0 %v11922_v28  ;;  %v7959_v28 = vld [vmem:[#allocation2 + $0x2d1] sm:$0xff]  ;;  %v8336_v62 = vld [vmem:[#allocation2 + $0xc9] sm:$0xff] }
 0x33d   : > { %11205 = vmatprep.subr.bf16.mxu0 %v11923_v61  ;;  %v8011_v29 = vpack.c.bf16 %v7960_v26, %v7959_v28 }
 0x340   : > { %11206 = vmatpush3.bf16.msra.mxu0 %v11923_v61  ;;  %v8335_v61 = vld [vmem:[#allocation2 + $0xc1] sm:$0xff] }
 0x341   : > { %11207 = vmatprep.subr.bf16.mxu0 %v11924_v37  ;;  %v8392_v63 = vpack.c.bf16 %v8336_v62, %v8335_v61 }
 0x343   : > { %11176 = vmatmul.mubr.msk.bf16.gmra.mrb[12].mxu0 %vm363_vm1, %v8002_v1  ;;  %v8339_v1 = vld [vmem:[#allocation2 + $0xf1] sm:$0xff] }
 0x344   : > { %11179 = vmatprep.mubr.msk.bf16.mxu0 %vm363_vm1, %v8003_v5  ;;  %11208 = vmatpush3.bf16.msra.mxu0 %v11924_v37  ;;  %v8337_v37 = vld [vmem:[#allocation2 + $0xd9] sm:$0xff]  ;;  %v8342_v5 = vld [vmem:[#allocation2 + $0x111] sm:$0xff]  ;;  %v8394_v4 = vpack.c.bf16 %v8340_v2, %v8339_v1 }
 0x345   : > { %11209 = vmatprep.subr.bf16.mxu0 %v11925_v15  ;;  %v8393_v0 = vpack.c.bf16 %v8338_v55, %v8337_v37 }
 0x348   : > { %11210 = vmatpush3.bf16.msra.mxu0 %v11925_v15  ;;  %v8341_v15 = vld [vmem:[#allocation2 + $0x109] sm:$0xff] }
 0x349   : > { %v8395_v6 = vpack.c.bf16 %v8342_v5, %v8341_v15  ;;  %v13450_v15 = vld [vmem:[%s13707_s5] ss:$0 sm:$0xff] }
 0x34b   : > { %11180 = vmatmul.mubr.msk.bf16.gmra.mrb[16].mxu0 %vm363_vm1, %v8004_v7  ;;  %v8344_v7 = vld [vmem:[#allocation2 + $0x129] sm:$0xff] }
 0x34c   : > { %11183 = vmatprep.mubr.msk.bf16.mxu0 %vm363_vm1, %v8005_v9  ;;  %v8346_v9 = vld [vmem:[#allocation2 + $0x141] sm:$0xff]  ;;  %v8396_v10 = vpack.c.bf16 %v8344_v7, %v8343_v3 }
 0x34d   : > { %v8397_v12 = vpack.c.bf16 %v8346_v9, %v8345_v8 }
 0x353   : > { %11184 = vmatmul.mubr.msk.bf16.gmra.mrb[20].mxu0 %vm363_vm1, %v8006_v16  ;;  %v8348_v16 = vld [vmem:[#allocation2 + $0x159] sm:$0xff] }
 0x354   : > { %11187 = vmatprep.mubr.msk.bf16.mxu0 %vm363_vm1, %v8007_v44  ;;  %v8350_v44 = vld [vmem:[#allocation2 + $0x171] sm:$0xff]  ;;  %v8398_v18 = vpack.c.bf16 %v8348_v16, %v8347_v13 }
 0x355   : > { %v8399_v19 = vpack.c.bf16 %v8350_v44, %v8349_v17 }
 0x35b   : > { %11188 = vmatmul.mubr.msk.bf16.gmra.mrb[24].mxu0 %vm363_vm1, %v8008_v22  ;;  %v8352_v22 = vld [vmem:[#allocation2 + $0x189] sm:$0xff] }
 0x35c   : > { %11191 = vmatprep.mubr.msk.bf16.mxu0 %vm363_vm1, %v8009_v24  ;;  %v8400_v23 = vpack.c.bf16 %v8352_v22, %v8351_v21 }
 0x363   : > { %11192 = vmatmul.mubr.msk.bf16.gmra.mrb[28].mxu0 %vm363_vm1, %v8010_v11 }
 0x364   : > { %11195 = vmatprep.mubr.msk.bf16.mxu0 %vm363_vm1, %v8011_v29 }
 0x36b   : > { %11196 = vmatmul.mubr.msk.bf16.gmra.mrb[32].mxu0 %vm363_vm1, %v8012_v32 }
 0x36c   : > { %11199 = vmatprep.mubr.msk.bf16.mxu0 %vm363_vm1, %v8013_v34 }
 0x373   : > { %11200 = vmatmul.mubr.msk.bf16.gmra.mrb[36].mxu0 %vm363_vm1, %v8014_v36 }
 0x374   : > { %11211 = vmatprep.mubr.msk.bf16.mxu0 %vm363_vm1, %v8385_v41 }
 0x37b   : > { %11212 = vmatmul.mubr.msk.bf16.vlgmr.msra.gmra.mrb[8].mxu0 %vm363_vm1, %v8386_v49 }
 0x37c   : > { %11215 = vmatprep.mubr.msk.bf16.mxu0 %vm363_vm1, %v8387_v50 }
 0x383   : > { %11216 = vmatmul.mubr.msk.bf16.gmra.mrb[12].mxu0 %vm363_vm1, %v8388_v20 }
 0x384   : > { %11219 = vmatprep.mubr.msk.bf16.mxu0 %vm363_vm1, %v8389_v54 }
 0x38b   : > { %11220 = vmatmul.mubr.msk.bf16.gmra.mrb[16].mxu0 %vm363_vm1, %v8390_v45 }
 0x38c   : > { %11223 = vmatprep.mubr.msk.bf16.mxu0 %vm363_vm1, %v8391_v60 }
 0x393   : > { %11224 = vmatmul.mubr.msk.bf16.gmra.mrb[20].mxu0 %vm363_vm1, %v8392_v63 }
 0x394   : > { %11227 = vmatprep.mubr.msk.bf16.mxu0 %vm363_vm1, %v8393_v0 }
 0x39b   : > { %11228 = vmatmul.mubr.msk.bf16.gmra.mrb[24].mxu0 %vm363_vm1, %v8394_v4 }
 0x39c   : > { %11231 = vmatprep.mubr.msk.bf16.mxu0 %vm363_vm1, %v8395_v6 }
 0x3a3   : > { %11232 = vmatmul.mubr.msk.bf16.gmra.mrb[28].mxu0 %vm363_vm1, %v8396_v10 }
 0x3a4   : > { %11235 = vmatprep.mubr.msk.bf16.mxu0 %vm363_vm1, %v8397_v12 }
 0x3ab   : > { %11236 = vmatmul.mubr.msk.bf16.gmra.mrb[32].mxu0 %vm363_vm1, %v8398_v18 }
 0x3ac   : > { %11239 = vmatprep.mubr.msk.bf16.mxu0 %vm363_vm1, %v8399_v19 }
 0x3b3   : > { %11240 = vmatmul.mubr.msk.bf16.gmra.mrb[36].mxu0 %vm363_vm1, %v8400_v23 }
 0x3bd   : > { %v10813_v24 = vpop.f32.mrb[120].mxu1 }
 0x3be   : > { %v4654_v25 = vpop.f32.mrb[121].mxu1 }
 0x3bf   : > { %v10814_v26 = vpop.f32.mrb[122].mxu1 }
 0x3c0   : > { %v4657_v27 = vpop.f32.mrb[123].mxu1 }
 0x3c5   : > { %v10817_v11 = vpop.f32.mrb[124].mxu1 }
 0x3c6   : > { %v4670_v28 = vpop.f32.mrb[125].mxu1 }
 0x3c7   : > { %v10818_v29 = vpop.f32.mrb[126].mxu1 }
 0x3c8   : > { %v13389_v30 = vpop.f32.mrb[127].mxu1 }
 0x3cd   : > { %v13391_v31 = vpop.f32.mrb[128].mxu1 }
 0x3ce   : > { %v13393_v14 = vpop.f32.mrb[129].mxu1 }
 0x3cf   : > { %v13395_v32 = vpop.f32.mrb[130].mxu1 }
 0x3d0   : > { %v13397_v33 = vpop.f32.mrb[131].mxu1 }
 0x3d5   : > { %v13399_v34 = vpop.f32.mrb[132].mxu1 }
 0x3d6   : > { %v13401_v38 = vpop.f32.mrb[133].mxu1 }
 0x3d7   : > { %v13403_v35 = vpop.f32.mrb[134].mxu1 }
 0x3d8   : > { %v13405_v36 = vpop.f32.mrb[135].mxu1 }
 0x3dd   : > { %v13407_v39 = vpop.f32.mrb[136].mxu1 }
 0x3de   : > { %v13409_v40 = vpop.f32.mrb[137].mxu1 }
 0x3df   : > { %v13411_v41 = vpop.f32.mrb[138].mxu1 }
 0x3e0   : > { %v13413_v42 = vpop.f32.mrb[139].mxu1 }
 0x3e5   : > { %v13415_v43 = vpop.f32.mrb[140].mxu1 }
 0x3e6   : > { %v13417_v47 = vpop.f32.mrb[141].mxu1 }
 0x3e7   : > { %v13419_v48 = vpop.f32.mrb[142].mxu1 }
 0x3e8   : > { %v13421_v49 = vpop.f32.mrb[143].mxu1 }
 0x3ed   : > { %v13423_v50 = vpop.f32.mrb[144].mxu1 }
 0x3ee   : > { %v13425_v51 = vpop.f32.mrb[145].mxu1 }
 0x3ef   : > { %v13427_v46 = vpop.f32.mrb[146].mxu1 }
 0x3f0   : > { %v13429_v52 = vpop.f32.mrb[147].mxu1 }
 0x3f5   : > { %v13431_v53 = vpop.f32.mrb[148].mxu1 }
 0x3f6   : > { %v13433_v20 = vpop.f32.mrb[149].mxu1 }
 0x3f7   : > { %v13435_v54 = vpop.f32.mrb[150].mxu1 }
 0x3f8   : > { %v13437_v56 = vpop.f32.mrb[151].mxu1 }
 0x44e   : > { %v11213_v57 = vpop.f32.mrb[8].mxu0 }
 0x44f   : > { %v11295_v59 = vadd.f32 %v11213_v57, %v10813_v24  ;;  %v8516_v45 = vpop.f32.mrb[9].mxu0 }
 0x450   : > { %v11296_v60 = vadd.f32 %v8516_v45, %v4654_v25  ;;  %v11214_v61 = vpop.f32.mrb[10].mxu0 }
 0x451   : > { %v8748_v62 = vadd.f32 %v11295_v59, %v13442_v58  ;;  %v11297_v37 = vadd.f32 %v11214_v61, %v10814_v26  ;;  %v8519_v55 = vpop.f32.mrb[11].mxu0 }
 0x452   : > { %v8746_v63 = vadd.f32 %v11296_v60, %v13442_v58  ;;  %v11298_v0 = vadd.f32 %v8519_v55, %v4657_v27 }
 0x453   : > { %v8749_v1 = vadd.f32 %v11297_v37, %v13442_v58  ;;  %vm8780_vm1 = vcmp.ge.f32.partialorder %v8748_v62, 0.0  ;;  %v8812_v2 = vmul.f32 0.2, %v8748_v62 }
 0x454   : > { %v8747_v5 = vadd.f32 %v11298_v0, %v13442_v58  ;;  %vm8778_vm11 = vcmp.ge.f32.partialorder %v8746_v63, 0.0  ;;  %v8810_v4 = vmul.f32 0.2, %v8746_v63 }
 0x455   : > { %v8844_v6 = vsel %vm8780_vm1, %v8748_v62, %v8812_v2  ;;  %vm8781_vm12 = vcmp.ge.f32.partialorder %v8749_v1, 0.0  ;;  %v8813_v3 = vmul.f32 0.2, %v8749_v1 }
 0x456   : > { %v11217_v7 = vpop.f32.mrb[12].mxu0  ;;  %v8883_v8 = vmul.f32 %v13450_v15, %v8844_v6  ;;  %v8842_v9 = vsel %vm8778_vm11, %v8746_v63, %v8810_v4  ;;  %v8811_v18 = vmul.f32 0.2, %v8747_v5  ;;  %vm8779_vm13 = vcmp.ge.f32.partialorder %v8747_v5, 0.0 }
 0x457   : > { %v11299_v10 = vadd.f32 %v11217_v7, %v10817_v11  ;;  %v8532_v12 = vpop.f32.mrb[13].mxu0  ;;  %v8881_v13 = vmul.f32 %v13450_v15, %v8842_v9  ;;  %v8845_v44 = vsel %vm8781_vm12, %v8749_v1, %v8813_v3 }
 0x458   : > { %v11300_v16 = vadd.f32 %v8532_v12, %v4670_v28  ;;  %v11218_v17 = vpop.f32.mrb[14].mxu0  ;;  %8917 = vadd.xlane.f32.xlu0 %v8883_v8  ;;  %v8884_v26 = vmul.f32 %v13450_v15, %v8845_v44  ;;  %v8843_v28 = vsel %vm8779_vm13, %v8747_v5, %v8811_v18 }
 0x459   : > { %v8752_v19 = vadd.f32 %v11299_v10, %v13442_v58  ;;  %v11301_v21 = vadd.f32 %v11218_v17, %v10818_v29  ;;  %v8535_v22 = vpop.f32.mrb[15].mxu0  ;;  %8913 = vadd.xlane.f32.xlu1 %v8881_v13  ;;  %v8882_v62 = vmul.f32 %v13450_v15, %v8843_v28 }
 0x45a   : > { %v8750_v23 = vadd.f32 %v11300_v16, %v13442_v58  ;;  %v11302_v24 = vadd.f32 %v8535_v22, %v13389_v30 }
 0x45b   : > { %v8753_v25 = vadd.f32 %v11301_v21, %v13442_v58  ;;  %vm8784_vm14 = vcmp.ge.f32.partialorder %v8752_v19, 0.0  ;;  %v8816_v27 = vmul.f32 0.2, %v8752_v19 }
 0x45c   : > { %v8751_v11 = vadd.f32 %v11302_v24, %v13442_v58  ;;  %vm8782_vm15 = vcmp.ge.f32.partialorder %v8750_v23, 0.0  ;;  %v8814_v57 = vmul.f32 0.2, %v8750_v23 }
 0x45d   : > { %8919 = vadd.xlane.f32.xlu1 %v8884_v26  ;;  %v8848_v29 = vsel %vm8784_vm14, %v8752_v19, %v8816_v27  ;;  %vm8785_vm0 = vcmp.ge.f32.partialorder %v8753_v25, 0.0  ;;  %v8817_v59 = vmul.f32 0.2, %v8753_v25 }
 0x45e   : > { %v11221_v45 = vpop.f32.mrb[16].mxu0  ;;  %v8887_v60 = vmul.f32 %v13450_v15, %v8848_v29  ;;  %v8846_v37 = vsel %vm8782_vm15, %v8750_v23, %v8814_v57  ;;  %v8815_v1 = vmul.f32 0.2, %v8751_v11  ;;  %vm8783_vm2 = vcmp.ge.f32.partialorder %v8751_v11, 0.0 }
 0x45f   : > { %v11303_v30 = vadd.f32 %v11221_v45, %v13391_v31  ;;  %v8548_v61 = vpop.f32.mrb[17].mxu0  ;;  %v8849_v0 = vsel %vm8785_vm0, %v8753_v25, %v8817_v59  ;;  %v8885_v3 = vmul.f32 %v13450_v15, %v8846_v37 }
 0x460   : > { %v11304_v55 = vadd.f32 %v8548_v61, %v13393_v14  ;;  %v11222_v63 = vpop.f32.mrb[18].mxu0  ;;  %8925 = vadd.xlane.f32.xlu0 %v8887_v60  ;;  %v8888_v14 = vmul.f32 %v13450_v15, %v8849_v0  ;;  %v8847_v10 = vsel %vm8783_vm2, %v8751_v11, %v8815_v1 }
 0x461   : > { %v8756_v2 = vadd.f32 %v11303_v30, %v13442_v58  ;;  %v11305_v5 = vadd.f32 %v11222_v63, %v13395_v32  ;;  %v8551_v4 = vpop.f32.mrb[19].mxu0  ;;  %8915 = vadd.xlane.f32.xlu1 %v8882_v62  ;;  %v8886_v18 = vmul.f32 %v13450_v15, %v8847_v10 }
 0x462   : > { %v8754_v6 = vadd.f32 %v11304_v55, %v13442_v58  ;;  %v11306_v31 = vadd.f32 %v8551_v4, %v13397_v33 }
 0x463   : > { %v8757_v7 = vadd.f32 %v11305_v5, %v13442_v58  ;;  %vm8788_vm3 = vcmp.ge.f32.partialorder %v8756_v2, 0.0  ;;  %v8820_v8 = vmul.f32 0.2, %v8756_v2 }
 0x464   : > { %v8755_v9 = vadd.f32 %v11306_v31, %v13442_v58  ;;  %8921 = vadd.xlane.f32.xlu0 %v8885_v3  ;;  %vm8786_vm4 = vcmp.ge.f32.partialorder %v8754_v6, 0.0  ;;  %v8818_v32 = vmul.f32 0.2, %v8754_v6 }
 0x465   : > { %8927 = vadd.xlane.f32.xlu1 %v8888_v14  ;;  %v8852_v12 = vsel %vm8788_vm3, %v8756_v2, %v8820_v8  ;;  %vm8789_vm5 = vcmp.ge.f32.partialorder %v8757_v7, 0.0  ;;  %v8821_v13 = vmul.f32 0.2, %v8757_v7 }
 0x466   : > { %v11225_v16 = vpop.f32.mrb[20].mxu0  ;;  %v8891_v33 = vmul.f32 %v13450_v15, %v8852_v12  ;;  %v8850_v19 = vsel %vm8786_vm4, %v8754_v6, %v8818_v32  ;;  %v8819_v24 = vmul.f32 0.2, %v8755_v9  ;;  %vm8787_vm6 = vcmp.ge.f32.partialorder %v8755_v9, 0.0 }
 0x467   : > { %v11307_v17 = vadd.f32 %v11225_v16, %v13399_v34  ;;  %v8564_v44 = vpop.f32.mrb[21].mxu0  ;;  %v8853_v23 = vsel %vm8789_vm5, %v8757_v7, %v8821_v13  ;;  %v8889_v11 = vmul.f32 %v13450_v15, %v8850_v19 }
 0x468   : > { %v13477_v21 = vadd.f32 %v8564_v44, %v13401_v38  ;;  %v11226_v22 = vpop.f32.mrb[22].mxu0  ;;  %8933 = vadd.xlane.f32.xlu0 %v8891_v33  ;;  %v8892_v38 = vmul.f32 %v13450_v15, %v8853_v23  ;;  %v8851_v29 = vsel %vm8787_vm6, %v8755_v9, %v8819_v24 }
 0x469   : > { %v8760_v25 = vadd.f32 %v11307_v17, %v13442_v58  ;;  %v11309_v26 = vadd.f32 %v11226_v22, %v13403_v35  ;;  %v8567_v27 = vpop.f32.mrb[23].mxu0  ;;  %8923 = vadd.xlane.f32.xlu1 %v8886_v18  ;;  %v8890_v61 = vmul.f32 %v13450_v15, %v8851_v29 }
 0x46a   : > { %v13482_v34 = vadd.f32 %v8567_v27, %v13405_v36 }
 0x46b   : > { %v8761_v28 = vadd.f32 %v11309_v26, %v13442_v58  ;;  %vm8792_vm7 = vcmp.ge.f32.partialorder %v8760_v25, 0.0  ;;  %v8824_v57 = vmul.f32 0.2, %v8760_v25 }
 0x46c   : > { %8929 = vadd.xlane.f32.xlu0 %v8889_v11 }
 0x46d   : > { %8935 = vadd.xlane.f32.xlu1 %v8892_v38  ;;  %vm8793_vm8 = vcmp.ge.f32.partialorder %v8761_v28, 0.0  ;;  %v8825_v59 = vmul.f32 0.2, %v8761_v28  ;;  %v8856_v35 = vsel %vm8792_vm7, %v8760_v25, %v8824_v57 }
 0x46e   : > { %v11229_v45 = vpop.f32.mrb[24].mxu0  ;;  %v13488_v60 = vmul.f32 %v13450_v15, %v8856_v35 }
 0x46f   : > { %v11311_v36 = vadd.f32 %v11229_v45, %v13407_v39  ;;  %v8580_v30 = vpop.f32.mrb[25].mxu0  ;;  %v8857_v62 = vsel %vm8793_vm8, %v8761_v28, %v8825_v59  ;;  %v8759_v45 = vadd.f32 %v13482_v34, %v13442_v58  ;;  %v8758_v34 = vadd.f32 %v13477_v21, %v13442_v58 }
 0x470   : > { %v11312_v37 = vadd.f32 %v8580_v30, %v13409_v40  ;;  %v11230_v55 = vpop.f32.mrb[26].mxu0  ;;  %v13494_v63 = vmul.f32 %v13450_v15, %v8857_v62 }
 0x471   : > { %v8764_v0 = vadd.f32 %v11311_v36, %v13442_v58  ;;  %v11313_v1 = vadd.f32 %v11230_v55, %v13411_v41  ;;  %v8583_v2 = vpop.f32.mrb[27].mxu0  ;;  %8931 = vadd.xlane.f32.xlu1 %v8890_v61  ;;  %vm8791_vm5 = vcmp.ge.f32.partialorder %v8759_v45, 0.0  ;;  %vm8790_vm6 = vcmp.ge.f32.partialorder %v8758_v34, 0.0 }
 0x472   : > { %v8762_v5 = vadd.f32 %v11312_v37, %v13442_v58  ;;  %v11314_v39 = vadd.f32 %v8583_v2, %v13413_v42 }
 0x473   : > { %v8765_v4 = vadd.f32 %v11313_v1, %v13442_v58  ;;  %vm8796_vm9 = vcmp.ge.f32.partialorder %v8764_v0, 0.0  ;;  %v8828_v6 = vmul.f32 0.2, %v8764_v0 }
 0x474   : > { %v8763_v40 = vadd.f32 %v11314_v39, %v13442_v58  ;;  %vm8794_vm10 = vcmp.ge.f32.partialorder %v8762_v5, 0.0  ;;  %v8826_v31 = vmul.f32 0.2, %v8762_v5  ;;  %v8823_v39 = vmul.f32 0.2, %v8759_v45 }
 0x475   : > { %v8860_v3 = vsel %vm8796_vm9, %v8764_v0, %v8828_v6  ;;  %vm8797_vm1 = vcmp.ge.f32.partialorder %v8765_v4, 0.0  ;;  %v8829_v7 = vmul.f32 0.2, %v8765_v4 }
 0x476   : > { %v11233_v14 = vpop.f32.mrb[28].mxu0  ;;  %v8899_v41 = vmul.f32 %v13450_v15, %v8860_v3  ;;  %v8858_v32 = vsel %vm8794_vm10, %v8762_v5, %v8826_v31  ;;  %v8827_v42 = vmul.f32 0.2, %v8763_v40  ;;  %vm8795_vm11 = vcmp.ge.f32.partialorder %v8763_v40, 0.0 }
 0x477   : > { %v11315_v8 = vadd.f32 %v11233_v14, %v13415_v43  ;;  %v8596_v9 = vpop.f32.mrb[29].mxu0  ;;  %v8861_v10 = vsel %vm8797_vm1, %v8765_v4, %v8829_v7  ;;  %v8897_v43 = vmul.f32 %v13450_v15, %v8858_v32  ;;  %vm9146_vm1 = vcmask 130048  }
 0x478   : > { %v11316_v12 = vadd.f32 %v8596_v9, %v13417_v47  ;;  %v11234_v13 = vpop.f32.mrb[30].mxu0  ;;  %8949 = vadd.xlane.f32.xlu0 %v8899_v41  ;;  %v8900_v16 = vmul.f32 %v13450_v15, %v8861_v10  ;;  %v8859_v47 = vsel %vm8795_vm11, %v8763_v40, %v8827_v42  ;;  %vm9244_vm11 = vcmask 244736  }
 0x479   : > { %v8768_v33 = vadd.f32 %v11315_v8, %v13442_v58  ;;  %v11317_v17 = vadd.f32 %v11234_v13, %v13419_v48  ;;  %v8599_v44 = vpop.f32.mrb[31].mxu0  ;;  %v8898_v48 = vmul.f32 %v13450_v15, %v8859_v47 }
 0x47a   : > { %v11318_v18 = vadd.f32 %v8599_v44, %v13421_v49  ;;  %8951 = vadd.xlane.f32.xlu1 %v8900_v16  ;;  %v8766_v19 = vadd.f32 %v11316_v12, %v13442_v58 }
 0x47b   : > { %v8769_v22 = vadd.f32 %v11317_v17, %v13442_v58  ;;  %v8832_v23 = vmul.f32 0.2, %v8768_v33  ;;  %vm8800_vm12 = vcmp.ge.f32.partialorder %v8768_v33, 0.0  ;;  %v8855_v17 = vsel %vm8791_vm5, %v8759_v45, %v8823_v39 }
 0x47c   : > { %v8767_v24 = vadd.f32 %v11318_v18, %v13442_v58  ;;  %8945 = vadd.xlane.f32.xlu0 %v8897_v43  ;;  %v8830_v57 = vmul.f32 0.2, %v8766_v19  ;;  %vm8798_vm15 = vcmp.ge.f32.partialorder %v8766_v19, 0.0 }
 0x47d   : > { %vm8801_vm13 = vcmp.ge.f32.partialorder %v8769_v22, 0.0  ;;  %v8833_v25 = vmul.f32 0.2, %v8769_v22  ;;  %v8864_v38 = vsel %vm8800_vm12, %v8768_v33, %v8832_v23  ;;  %vm9248_vm12 = vcmask 242688  }
 0x47e   : > { %v11237_v26 = vpop.f32.mrb[32].mxu0  ;;  %vm8799_vm14 = vcmp.ge.f32.partialorder %v8767_v24, 0.0  ;;  %v8831_v49 = vmul.f32 0.2, %v8767_v24  ;;  %v8862_v0 = vsel %vm8798_vm15, %v8766_v19, %v8830_v57 }
 0x47f   : > { %v11319_v27 = vadd.f32 %v11237_v26, %v13423_v50  ;;  %v8612_v11 = vpop.f32.mrb[33].mxu0  ;;  %v8865_v28 = vsel %vm8801_vm13, %v8769_v22, %v8833_v25  ;;  %v8901_v4 = vmul.f32 %v13450_v15, %v8862_v0 }
 0x480   : > { %v11320_v29 = vadd.f32 %v8612_v11, %v13425_v51  ;;  %v11238_v59 = vpop.f32.mrb[34].mxu0  ;;  %8947 = vadd.xlane.f32.xlu0 %v8898_v48  ;;  %v8904_v35 = vmul.f32 %v13450_v15, %v8865_v28  ;;  %v8863_v50 = vsel %vm8799_vm14, %v8767_v24, %v8831_v49  ;;  %v8903_v51 = vmul.f32 %v13450_v15, %v8864_v38  ;;  %v9042_v38 = vld [vmem:[%s13709_s7 + $0x8] sm:$0xff] }
 0x481   : > { %v8772_v36 = vadd.f32 %v11319_v27, %v13442_v58  ;;  %v11321_v30 = vadd.f32 %v11238_v59, %v13427_v46  ;;  %v8615_v61 = vpop.f32.mrb[35].mxu0  ;;  %v8902_v46 = vmul.f32 %v13450_v15, %v8863_v50  ;;  %v8894_v48 = vmul.f32 %v13450_v15, %v8855_v17  ;;  %9113 = vmatprep.mubr.f32.mxu1 %v9042_v38  ;;  %v9002_v38 = vld [vmem:[%s13708_s6 + $0xc8] sm:$0xff] }
 0x482   : > { %v8770_v62 = vadd.f32 %v11320_v29, %v13442_v58  ;;  %v11322_v37 = vadd.f32 %v8615_v61, %v13429_v52  ;;  %8959 = vadd.xlane.f32.xlu1 %v8904_v35 }
 0x483   : > { %v8773_v55 = vadd.f32 %v11321_v30, %v13442_v58  ;;  %v8836_v1 = vmul.f32 0.2, %v8772_v36  ;;  %vm8804_vm0 = vcmp.ge.f32.partialorder %v8772_v36, 0.0 }
 0x484   : > { %v8771_v2 = vadd.f32 %v11322_v37, %v13442_v58  ;;  %8957 = vadd.xlane.f32.xlu0 %v8903_v51  ;;  %v8834_v40 = vmul.f32 0.2, %v8770_v62  ;;  %vm8802_vm4 = vcmp.ge.f32.partialorder %v8770_v62, 0.0  ;;  %v8978_v51 = vld [vmem:[%s13708_s6 + $0x8] sm:$0xff] }
 0x485   : > { %vm8805_vm2 = vcmp.ge.f32.partialorder %v8773_v55, 0.0  ;;  %v8837_v5 = vmul.f32 0.2, %v8773_v55  ;;  %v8868_v7 = vsel %vm8804_vm0, %v8772_v36, %v8836_v1  ;;  %v8993_v1 = vld [vmem:[%s13708_s6 + $0x80] sm:$0xff] }
 0x486   : > { %v11241_v52 = vpop.f32.mrb[36].mxu0  ;;  %8955 = vadd.xlane.f32.xlu1 %v8902_v46  ;;  %vm8803_vm3 = vcmp.ge.f32.partialorder %v8771_v2, 0.0  ;;  %v8835_v6 = vmul.f32 0.2, %v8771_v2  ;;  %v8866_v16 = vsel %vm8802_vm4, %v8770_v62, %v8834_v40 }
 0x487   : > { %v11323_v31 = vadd.f32 %v11241_v52, %v13431_v53  ;;  %v8628_v3 = vpop.f32.mrb[37].mxu0  ;;  %v8869_v21 = vsel %vm8805_vm2, %v8773_v55, %v8837_v5  ;;  %v8822_v53 = vmul.f32 0.2, %v8758_v34  ;;  %v8905_v19 = vmul.f32 %v13450_v15, %v8866_v16  ;;  %v8996_v55 = vld [vmem:[%s13708_s6 + $0x98] sm:$0xff]  ;;  %v8995_v5 = vld [vmem:[%s13708_s6 + $0x90] sm:$0xff]  ;;  %v8981_v16 = vld [vmem:[%s13708_s6 + $0x20] sm:$0xff] }
 0x488   : > { %v11324_v14 = vadd.f32 %v8628_v3, %v13433_v20  ;;  %v11242_v41 = vpop.f32.mrb[38].mxu0  ;;  %8953 = vadd.xlane.f32.xlu0 %v8901_v4  ;;  %v8908_v8 = vmul.f32 %v13450_v15, %v8869_v21  ;;  %v8867_v42 = vsel %vm8803_vm3, %v8771_v2, %v8835_v6  ;;  %v8907_v20 = vmul.f32 %v13450_v15, %v8868_v7  ;;  %v8977_v2 = vld [vmem:[%s13708_s6] sm:$0xff]  ;;  %v8980_v52 = vld [vmem:[%s13708_s6 + $0x18] sm:$0xff]  ;;  %v8979_v21 = vld [vmem:[%s13708_s6 + $0x10] sm:$0xff] }
 0x489   : > { %v8776_v9 = vadd.f32 %v11323_v31, %v13442_v58  ;;  %v11325_v10 = vadd.f32 %v11242_v41, %v13435_v54  ;;  %v8631_v32 = vpop.f32.mrb[39].mxu0  ;;  %v8906_v18 = vmul.f32 %v13450_v15, %v8867_v42  ;;  %v8854_v25 = vsel %vm8790_vm6, %v8758_v34, %v8822_v53  ;;  %v8994_v34 = vld [vmem:[%s13708_s6 + $0x88] sm:$0xff]  ;;  %v8999_v53 = vld [vmem:[%s13708_s6 + $0xb0] sm:$0xff] }
 0x48a   : > { %v8774_v12 = vadd.f32 %v11324_v14, %v13442_v58  ;;  %v11326_v13 = vadd.f32 %v8631_v32, %v13437_v56  ;;  %8967 = vadd.xlane.f32.xlu1 %v8908_v8  ;;  %v8893_v11 = vmul.f32 %v13450_v15, %v8854_v25 }
 0x48b   : > { %v8777_v33 = vadd.f32 %v11325_v10, %v13442_v58  ;;  %vm8808_vm7 = vcmp.ge.f32.partialorder %v8776_v9, 0.0  ;;  %v8840_v44 = vmul.f32 0.2, %v8776_v9  ;;  %v8982_v10 = vld [vmem:[%s13708_s6 + $0x28] sm:$0xff] }
 0x48c   : > { %v8775_v54 = vadd.f32 %v11326_v13, %v13442_v58  ;;  %8965 = vadd.xlane.f32.xlu0 %v8907_v20  ;;  %vm8806_vm8 = vcmp.ge.f32.partialorder %v8774_v12, 0.0  ;;  %v8838_v43 = vmul.f32 0.2, %v8774_v12  ;;  %v8997_v20 = vld [vmem:[%s13708_s6 + $0xa0] sm:$0xff] }
 0x48d   : > { %vm8809_vm9 = vcmp.ge.f32.partialorder %v8777_v33, 0.0  ;;  %v8841_v56 = vmul.f32 0.2, %v8777_v33  ;;  %v8872_v22 = vsel %vm8808_vm7, %v8776_v9, %v8840_v44  ;;  %v9000_v44 = vld [vmem:[%s13708_s6 + $0xb8] sm:$0xff] }
 0x48e   : > { %8963 = vadd.xlane.f32.xlu1 %v8906_v18  ;;  %vm8807_vm10 = vcmp.ge.f32.partialorder %v8775_v54, 0.0  ;;  %v8839_v47 = vmul.f32 0.2, %v8775_v54  ;;  %v8870_v23 = vsel %vm8806_vm8, %v8774_v12, %v8838_v43  ;;  %v8911_v24 = vmul.f32 %v13450_v15, %v8872_v22  ;;  %v8998_v12 = vld [vmem:[%s13708_s6 + $0xa8] sm:$0xff]  ;;  %v8984_v18 = vld [vmem:[%s13708_s6 + $0x38] sm:$0xff] }
 0x48f   : > { %v8909_v58 = vmul.f32 %v13450_v15, %v8870_v23  ;;  %v8873_v26 = vsel %vm8809_vm9, %v8777_v33, %v8841_v56  ;;  %v8983_v23 = vld [vmem:[%s13708_s6 + $0x30] sm:$0xff] }
 0x490   : > { %8961 = vadd.xlane.f32.xlu0 %v8905_v19  ;;  %v8912_v49 = vmul.f32 %v13450_v15, %v8873_v26  ;;  %v8871_v27 = vsel %vm8807_vm10, %v8775_v54, %v8839_v47 }
 0x491   : > { %v8910_v28 = vmul.f32 %v13450_v15, %v8871_v27 }
 0x492   : > { %8939 = vadd.xlane.f32.xlu1 %v8894_v48 }
 0x494   : > { %8937 = vadd.xlane.f32.xlu0 %v8893_v11 }
 0x496   : > { %8971 = vadd.xlane.f32.xlu1 %v8910_v28  ;;  %v9003_v28 = vld [vmem:[%s13708_s6 + $0xd0] sm:$0xff] }
 0x498   : > { %8969 = vadd.xlane.f32.xlu0 %v8909_v58 }
 0x49a   : > { %8975 = vadd.xlane.f32.xlu1 %v8912_v49  ;;  %v8986_v49 = vld [vmem:[%s13708_s6 + $0x48] sm:$0xff] }
 0x49c   : > { %8973 = vadd.xlane.f32.xlu0 %v8911_v24 }
 0x49e   : > { %8943 = vadd.xlane.f32.xlu1 %v13494_v63 }
 0x4a0   : > { %8941 = vadd.xlane.f32.xlu0 %v13488_v60 }
 0x4e5   : > { %v8918_v59 = vpop.xlane.xlu0 %8917 }
 0x4e6   : > { %v8914_v57 = vpop.xlane.xlu1 %8913  ;;  %v9011_v42 = vmul.f32 %v8979_v21, %v8918_v59  ;;  %v8985_v59 = vld [vmem:[%s13708_s6 + $0x40] sm:$0xff] }
 0x4e7   : > { %v9009_v31 = vmul.f32 %v8977_v2, %v8914_v57 }
 0x4ea   : > { %v8920_v29 = vpop.xlane.xlu1 %8919 }
 0x4eb   : > { %v9012_v41 = vmul.f32 %v8980_v52, %v8920_v29  ;;  %v9001_v29 = vld [vmem:[%s13708_s6 + $0xc0] sm:$0xff] }
 0x4ec   : > { %v8989_v52 = vld [vmem:[%s13708_s6 + $0x60] sm:$0xff] }
 0x4ed   : > { %v13557_v35 = vpop.xlane.xlu0 %8925  ;;  %v11259_v33 = vpack.c.bf16 %v9012_v41, %v9011_v42  ;;  %v9008_v41 = vld [vmem:[%s13708_s6 + $0xf8] sm:$0xff] }
 0x4ee   : > { %v8916_v45 = vpop.xlane.xlu1 %8915  ;;  %v9015_v11 = vmul.f32 %v8983_v23, %v13557_v35  ;;  %v9043_v23 = vld [vmem:[%s13709_s7 + $0x10] sm:$0xff] }
 0x4ef   : > { %v9010_v46 = vmul.f32 %v8978_v51, %v8916_v45 }
 0x4f1   : > { %v8922_v15 = vpop.xlane.xlu0 %8921  ;;  %v11255_v8 = vpack.c.bf16 %v9010_v46, %v9009_v31 }
 0x4f2   : > { %v8928_v36 = vpop.xlane.xlu1 %8927  ;;  %v9013_v22 = vmul.f32 %v8981_v16, %v8922_v15  ;;  %v9004_v15 = vld [vmem:[%s13708_s6 + $0xd8] sm:$0xff]  ;;  %v8991_v16 = vld [vmem:[%s13708_s6 + $0x70] sm:$0xff] }
 0x4f3   : > { %v9016_v58 = vmul.f32 %v8984_v18, %v8928_v36 }
 0x4f5   : > { %v13559_v30 = vpop.xlane.xlu0 %8933  ;;  %v11267_v35 = vpack.c.bf16 %v9016_v58, %v9015_v11  ;;  %v9048_v58 = vld [vmem:[%s13709_s7 + $0x38] sm:$0x3f] }
 0x4f6   : > { %v8924_v61 = vpop.xlane.xlu1 %8923 }
 0x4f7   : > { %v9014_v17 = vmul.f32 %v8982_v10, %v8924_v61  ;;  %v8988_v61 = vld [vmem:[%s13708_s6 + $0x58] sm:$0xff] }
 0x4f9   : > { %v13561_v50 = vpop.xlane.xlu0 %8929  ;;  %v11263_v26 = vpack.c.bf16 %v9014_v17, %v9013_v22  ;;  %v9134_v17 = vld [vmem:[%s13710_s8] sm:$0xff] }
 0x4fa   : > { %v13563_v63 = vpop.xlane.xlu1 %8935  ;;  %v9041_v22 = vld [vmem:[%s13709_s7] sm:$0xff] }
 0x4fb   : > { %v9020_v2 = vmul.f32 %v8988_v61, %v13563_v63  ;;  %v9005_v63 = vld [vmem:[%s13708_s6 + $0xe0] sm:$0xff] }
 0x4fe   : > { %v13565_v62 = vpop.xlane.xlu1 %8931 }
 0x4ff   : > { %v9018_v45 = vmul.f32 %v8986_v49, %v13565_v62  ;;  %v8987_v62 = vld [vmem:[%s13708_s6 + $0x50] sm:$0xff]  ;;  %v11936_v49 = vmov 0  }
 0x500   : > { %11785 = vset.pattern.permute.xlu0 %v11936_v49 }
 0x505   : > { %v8950_v60 = vpop.xlane.xlu0 %8949 }
 0x506   : > { %v9027_v7 = vmul.f32 %v8995_v5, %v8950_v60 }
 0x507   : > { %v8952_v0 = vpop.xlane.xlu1 %8951 }
 0x508   : > { %v9028_v4 = vmul.f32 %v8996_v55, %v8952_v0  ;;  %v9017_v55 = vmul.f32 %v8985_v59, %v13561_v50  ;;  %v9019_v50 = vmul.f32 %v8987_v62, %v13559_v30 }
 0x509   : > { %v8946_v37 = vpop.xlane.xlu0 %8945 }
 0x50a   : > { %v9025_v6 = vmul.f32 %v8993_v1, %v8946_v37  ;;  %v11257_v32 = vpack.c.bf16 %v9028_v4, %v9027_v7  ;;  %v11271_v46 = vpack.c.bf16 %v9018_v45, %v9017_v55  ;;  %v9006_v4 = vld [vmem:[%s13708_s6 + $0xe8] sm:$0xff]  ;;  %v11275_v31 = vpack.c.bf16 %v9020_v2, %v9019_v50 }
 0x50d   : > { %v8948_v39 = vpop.xlane.xlu0 %8947 }
 0x50e   : > { %v9026_v40 = vmul.f32 %v8994_v34, %v8948_v39 }
 0x50f   : > { %v8960_v3 = vpop.xlane.xlu1 %8959 }
 0x510   : > { %v11253_v14 = vpack.c.bf16 %v9026_v40, %v9025_v6  ;;  %v9032_v24 = vmul.f32 %v9000_v44, %v8960_v3  ;;  %v8990_v40 = vld [vmem:[%s13708_s6 + $0x68] sm:$0xff] }
 0x511   : > { %v8958_v9 = vpop.xlane.xlu0 %8957  ;;  %v9135_v44 = vld [vmem:[%s13710_s8 + $0x8] sm:$0xff] }
 0x512   : > { %11254 = vmatprep.subr.bf16.mxu1 %v11253_v14  ;;  %v9031_v43 = vmul.f32 %v8999_v53, %v8958_v9  ;;  %v9007_v9 = vld [vmem:[%s13708_s6 + $0xf0] sm:$0xff] }
 0x513   : > { %11256 = vmatpush3.bf16.msra.mxu1 %v11255_v8  ;;  %v8956_v13 = vpop.xlane.xlu1 %8955 }
 0x514   : > { %11258 = vmatprep.subr.bf16.mxu1 %v11257_v32  ;;  %v9030_v19 = vmul.f32 %v8998_v12, %v8956_v13  ;;  %v11265_v27 = vpack.c.bf16 %v9032_v24, %v9031_v43  ;;  %v8992_v13 = vld [vmem:[%s13708_s6 + $0x78] sm:$0xff]  ;;  %v9046_v24 = vld [vmem:[%s13709_s7 + $0x28] sm:$0xff] }
 0x515   : > { %v8954_v54 = vpop.xlane.xlu0 %8953 }
 0x516   : > { %v9029_v56 = vmul.f32 %v8997_v20, %v8954_v54 }
 0x517   : > { %11260 = vmatpush3.bf16.msra.mxu1 %v11259_v33  ;;  %v8968_v47 = vpop.xlane.xlu1 %8967 }
 0x518   : > { %v11261_v25 = vpack.c.bf16 %v9030_v19, %v9029_v56  ;;  %v9036_v1 = vmul.f32 %v9004_v15, %v8968_v47  ;;  %v11285_v19 = vpack.c.bf16 %v9135_v44, %v9134_v17  ;;  %v9044_v47 = vld [vmem:[%s13709_s7 + $0x18] sm:$0xff] }
 0x519   : > { %v8966_v48 = vpop.xlane.xlu0 %8965 }
 0x51a   : > { %11262 = vmatprep.subr.bf16.mxu1 %v11261_v25  ;;  %v9035_v60 = vmul.f32 %v9003_v28, %v8966_v48  ;;  %v9045_v25 = vld [vmem:[%s13709_s7 + $0x20] sm:$0xff] }
 0x51b   : > { %11264 = vmatpush3.bf16.msra.mxu1 %v11263_v26  ;;  %v8964_v57 = vpop.xlane.xlu1 %8963  ;;  %v9047_v26 = vld [vmem:[%s13709_s7 + $0x30] sm:$0x3f]  ;;  %v9996_v48 = vld [vmem:[#allocation4] ss:$0 sm:$0xff] }
 0x51c   : > { %11266 = vmatprep.subr.bf16.mxu1 %v11265_v27  ;;  %v9034_v37 = vmul.f32 %v9002_v38, %v8964_v57  ;;  %v11273_v39 = vpack.c.bf16 %v9036_v1, %v9035_v60  ;;  %9143 = vperm.xlu0 %11785, %v9996_v48  }
 0x51d   : > { %v8962_v36 = vpop.xlane.xlu0 %8961 }
 0x51e   : > { %v9033_v51 = vmul.f32 %v9001_v29, %v8962_v36 }
 0x51f   : > { %11268 = vmatpush3.bf16.msra.mxu1 %v11267_v35  ;;  %v8940_v0 = vpop.xlane.xlu1 %8939 }
 0x520   : > { %v11269_v34 = vpack.c.bf16 %v9034_v37, %v9033_v51  ;;  %v9022_v14 = vmul.f32 %v8990_v40, %v8940_v0 }
 0x521   : > { %v8938_v5 = vpop.xlane.xlu0 %8937 }
 0x522   : > { %11270 = vmatprep.subr.bf16.mxu1 %v11269_v34  ;;  %v9021_v3 = vmul.f32 %v8989_v52, %v8938_v5 }
 0x523   : > { %11272 = vmatpush3.bf16.msra.mxu1 %v11271_v46  ;;  %v8972_v6 = vpop.xlane.xlu1 %8971 }
 0x524   : > { %11274 = vmatprep.subr.bf16.mxu1 %v11273_v39  ;;  %v9038_v7 = vmul.f32 %v9006_v4, %v8972_v6  ;;  %v11279_v32 = vpack.c.bf16 %v9022_v14, %v9021_v3 }
 0x525   : > { %v8970_v21 = vpop.xlane.xlu0 %8969 }
 0x526   : > { %v9037_v30 = vmul.f32 %v9005_v63, %v8970_v21 }
 0x527   : > { %11276 = vmatpush3.bf16.msra.mxu1 %v11275_v31  ;;  %v8976_v8 = vpop.xlane.xlu1 %8975 }
 0x528   : > { %v11277_v10 = vpack.c.bf16 %v9038_v7, %v9037_v30  ;;  %v9040_v53 = vmul.f32 %v9008_v41, %v8976_v8 }
 0x529   : > { %v8974_v42 = vpop.xlane.xlu0 %8973 }
 0x52a   : > { %v9039_v12 = vmul.f32 %v9007_v9, %v8974_v42  ;;  %11278 = vmatprep.subr.bf16.mxu1 %v11277_v10 }
 0x52b   : > { %11280 = vmatpush3.bf16.msra.mxu1 %v11279_v32  ;;  %v8944_v20 = vpop.xlane.xlu1 %8943 }
 0x52c   : > { %v11281_v33 = vpack.c.bf16 %v9040_v53, %v9039_v12  ;;  %v9024_v18 = vmul.f32 %v8992_v13, %v8944_v20 }
 0x52d   : > { %v8942_v54 = vpop.xlane.xlu0 %8941 }
 0x52e   : > { %v9023_v43 = vmul.f32 %v8991_v16, %v8942_v54  ;;  %11282 = vmatprep.subr.bf16.mxu1 %v11281_v33 }
 0x530   : > { %v11283_v56 = vpack.c.bf16 %v9024_v18, %v9023_v43 }
 0x532   : > { %11284 = vmatpush3.bf16.msra.mxu1 %v11283_v56 }
 0x533   : > { %11286 = vmatprep.subr.bf16.mxu1 %v11285_v19 }
 0x535   : > { %9114 = vmatmul.mubr.f32.vlgmr.msra.gmra.mrb[152].mxu1 %v9041_v22 }
 0x536   : > { %9118 = vmatprep.mubr.f32.mxu1 %v9044_v47  ;;  %11288 = vmatpush3.bf16.msra.mxu1 %v11285_v19 }
 0x539   : > { %9119 = vmatmul.mubr.f32.gmra.mrb[154].mxu1 %v9043_v23 }
 0x53a   : > { %9123 = vmatprep.mubr.f32.mxu1 %v9046_v24 }
 0x53d   : > { %9124 = vmatmul.mubr.f32.gmra.mrb[156].mxu1 %v9045_v25 }
 0x53e   : > { %9128 = vmatprep.mubr.f32.mxu1 %v9048_v58 }
 0x541   : > { %9129 = vmatmul.mubr.f32.gmra.mrb[158].mxu1 %v9047_v26 }
 0x59b   : > { %v9144_v60 = vpop.permute.xlu0 %9143 }
 0x608   : > { %v10433_v27 = vpop.f32.mrb[152].mxu1 }
 0x609   : > { %v10434_v11 = vpop.f32.mrb[153].mxu1 }
 0x60a   : > { %v10435_v28 = vadd.f32 %v10434_v11, %v10433_v27 }
 0x60c   : > { %v10436_v38 = vpop.f32.mrb[154].mxu1  ;;  %11247 = vmatprep.mubr.msk.f32.mxu1 %vm9146_vm1, %v10435_v28 }
 0x60d   : > { %v10437_v57 = vpop.f32.mrb[155].mxu1 }
 0x60e   : > { %v10438_v29 = vadd.f32 %v10437_v57, %v10436_v38 }
 0x610   : > { %11248 = vmatmul.mubr.msk.f32.vlgmr.msra.gmra.mrb[160].mxu1 %vm9146_vm1, %v10438_v29  ;;  %v10439_v59 = vpop.f32.mrb[156].mxu1 }
 0x611   : > { %v10440_v35 = vpop.f32.mrb[157].mxu1 }
 0x612   : > { %v10441_v45 = vadd.f32 %v10440_v35, %v10439_v59 }
 0x614   : > { %v10442_v15 = vpop.f32.mrb[158].mxu1  ;;  %11250 = vmatprep.mubr.msk.f32.mxu1 %vm9146_vm1, %v10441_v45 }
 0x615   : > { %v10443_v36 = vpop.f32.mrb[159].mxu1 }
 0x616   : > { %v10444_v61 = vadd.f32 %v10443_v36, %v10442_v15 }
 0x618   : > { %11251 = vmatmul.mubr.msk.f32.gmra.mrb[162].mxu1 %vm9146_vm1, %v10444_v61 }
 0x6e3   : > { %v11249_v37 = vpop.f32.mrb[160].mxu1 }
 0x6e4   : > { %v9231_v51 = vadd.f32 %v11249_v37, %v9144_v60  ;;  %v9225_v55 = vpop.f32.mrb[161].mxu1 }
 0x6e5   : > { %v9226_v0 = vadd.f32 %v9225_v55, %v9144_v60 }
 0x6e6   : > { %9246 = vst.msk [vmem:[%s361_s22 + $0x8] sm:$0xff] %vm9244_vm11, %v9231_v51 }
 0x6e7   : > { %9245 = vst.msk [vmem:[%s361_s22] sm:$0xff] %vm9244_vm11, %v9226_v0 }
 0x6eb   : > { %v11252_v62 = vpop.f32.mrb[162].mxu1 }
 0x6ec   : > { %v9241_v1 = vadd.f32 %v11252_v62, %v9144_v60  ;;  %v9235_v34 = vpop.f32.mrb[163].mxu1 }
 0x6ed   : > { %v9236_v2 = vadd.f32 %v9235_v34, %v9144_v60 }
 0x6ee   : > { %9249 = vst.msk [vmem:[%s361_s22 + $0x18] sm:$0x3f] %vm9248_vm12, %v9241_v1 }
 0x6ef   : > { %9247 = vst.msk [vmem:[%s361_s22 + $0x10] sm:$0xff] %vm9244_vm11, %v9236_v2 }
 0x6f0 PF: > { %s22_s15 = sadd.s32 1, %s11933_s15  }
 0x6f1   : > { %p19_p4 = scmp.ge.s32.totalorder %s22_s15, 4  }
 0x6f3   :  { %21 = sbr.rel (!%p19_p4) target bundleno = 3 (0x3), region = 115 }

</bundles_post_ra>
